<compile_context>
chip_gen: v6e
topology: v6e:2x2x1
jax: 0.10.0
libtpu: 0.0.40
codegen_flags: <defaults>
</compile_context>

<pallas_src>
import functools
from collections import OrderedDict

import jax
import jax.numpy as jnp
from jax.experimental import pallas as pl
from jax.experimental.pallas import tpu as pltpu


ACT_DTYPE = jnp.bfloat16          # activation / weight storage dtype (MXU bf16)
NORM_MEAN = jnp.array([0.485, 0.456, 0.406], jnp.float32)
NORM_STD = jnp.array([0.229, 0.224, 0.225], jnp.float32)
_TM_TARGET = 1024                 # rows per M tile (512-2048 recommended)


def _round_up(x, m):
    return ((x + m - 1) // m) * m


def _pick_tm(m):
    if m >= _TM_TARGET:
        return _TM_TARGET
    return max(8, _round_up(m, 8))


# --------------------------------------------------------------------------
# Pallas kernels
# --------------------------------------------------------------------------
def _matmul_bias_act_kernel(x_ref, w_ref, b_ref, *rest, relu, has_residual):
    """One M-tile: (TM, K) @ (K, Cout) + bias [+ residual] [+ ReLU]."""
    if has_residual:
        r_ref, o_ref = rest
    else:
        (o_ref,) = rest
    acc = jnp.dot(x_ref[...], w_ref[...], preferred_element_type=jnp.float32)
    acc = acc + b_ref[...].astype(jnp.float32)
    if has_residual:
        acc = acc + r_ref[...].astype(jnp.float32)
    if relu:
        acc = jnp.maximum(acc, 0.0)
    o_ref[...] = acc.astype(o_ref.dtype)


def _max9_kernel(x0, x1, x2, x3, x4, x5, x6, x7, x8, o_ref):
    """Elementwise max of the 9 shifted 3x3-pool windows for one M tile."""
    m = jnp.maximum(x0[...], x1[...])
    for r in (x2, x3, x4, x5, x6, x7, x8):
        m = jnp.maximum(m, r[...])
    o_ref[...] = m.astype(o_ref.dtype)


# --------------------------------------------------------------------------
# Generic tiled matmul wrapper (all convs lower to this)
# --------------------------------------------------------------------------
def matmul_bias_act(x2d, w2d, b2d, *, residual=None, relu=True,
                    out_dtype=ACT_DTYPE):
    M, K = x2d.shape
    Cout = w2d.shape[1]
    TM = _pick_tm(M)
    M_pad = _round_up(M, TM)
    if M_pad != M:
        x2d = jnp.pad(x2d, ((0, M_pad - M), (0, 0)))
        if residual is not None:
            residual = jnp.pad(residual, ((0, M_pad - M), (0, 0)))

    in_specs = [
        pl.BlockSpec((TM, K), lambda m: (m, 0)),       # activation tile
        pl.BlockSpec((K, Cout), lambda m: (0, 0)),     # resident weights
        pl.BlockSpec((1, Cout), lambda m: (0, 0)),     # resident bias
    ]
    args = [x2d, w2d, b2d]
    if residual is not None:
        in_specs.append(pl.BlockSpec((TM, Cout), lambda m: (m, 0)))
        args.append(residual)

    out = pl.pallas_call(
        functools.partial(_matmul_bias_act_kernel, relu=relu,
                          has_residual=residual is not None),
        out_shape=jax.ShapeDtypeStruct((M_pad, Cout), out_dtype),
        grid_spec=pltpu.PrefetchScalarGridSpec(
            num_scalar_prefetch=0,
            grid=(M_pad // TM,),
            in_specs=in_specs,
            out_specs=pl.BlockSpec((TM, Cout), lambda m: (m, 0)),
        ),
        compiler_params=pltpu.CompilerParams(
            dimension_semantics=("parallel",)),
    )(*args)
    if M_pad != M:
        out = out[:M]
    return out


# --------------------------------------------------------------------------
# Conv / pool wrappers (JAX glue: padding / window slicing / reshapes)
# --------------------------------------------------------------------------
def conv1x1(x_nhwc, layer, *, relu, residual=None, out_dtype=ACT_DTYPE):
    N, H, W, Cin = x_nhwc.shape
    Cout = layer["w"].shape[1]
    M = N * H * W
    x2d = x_nhwc.reshape(M, Cin)
    r2d = None if residual is None else residual.reshape(M, Cout)
    out = matmul_bias_act(x2d, layer["w"], layer["b"], residual=r2d,
                          relu=relu, out_dtype=out_dtype)
    return out.reshape(N, H, W, Cout)


def conv3x3_s1_p1(x_nhwc, layer, *, relu, out_dtype=ACT_DTYPE):
    N, H, W, Cin = x_nhwc.shape
    Cout = layer["w"].shape[1]
    xp = jnp.pad(x_nhwc, ((0, 0), (1, 1), (1, 1), (0, 0)))
    # Fold the 3x3 offsets into the contraction dim -> one K=9*Cin matmul.
    cols = [xp[:, kh:kh + H, kw:kw + W, :]
            for kh in range(3) for kw in range(3)]
    patches = jnp.concatenate(cols, axis=-1).reshape(N * H * W, 9 * Cin)
    patches = patches.astype(ACT_DTYPE)
    out = matmul_bias_act(patches, layer["w"], layer["b"], relu=relu,
                          out_dtype=out_dtype)
    return out.reshape(N, H, W, Cout)


def stem_conv7x7_s2_p3(x_nhwc, layer, *, pretrained, out_dtype=ACT_DTYPE):
    N, H, W, Cin = x_nhwc.shape
    Cout = layer["w"].shape[1]
    if pretrained:
        # Mean subtraction fuses into the im2col gather below; 1/std is folded
        # into the conv weights -> exact w.r.t. PyTorch's normalize + zero-pad.
        x_nhwc = x_nhwc - NORM_MEAN.reshape(1, 1, 1, Cin)
    Ho = (H + 6 - 7) // 2 + 1
    Wo = (W + 6 - 7) // 2 + 1
    xp = jnp.pad(x_nhwc, ((0, 0), (3, 3), (3, 3), (0, 0)))
    # Fold the 49 offsets into the contraction dim -> one K=147 matmul.
    cols = [xp[:, kh:kh + 2 * Ho:2, kw:kw + 2 * Wo:2, :]
            for kh in range(7) for kw in range(7)]
    patches = jnp.concatenate(cols, axis=-1).reshape(N * Ho * Wo, 49 * Cin)
    patches = patches.astype(ACT_DTYPE)
    out = matmul_bias_act(patches, layer["w"], layer["b"], relu=True,
                          out_dtype=out_dtype)
    return out.reshape(N, Ho, Wo, Cout)


def maxpool_3x3_s2_p1(x_nhwc):
    N, H, W, C = x_nhwc.shape
    Ho = (H + 2 - 3) // 2 + 1
    Wo = (W + 2 - 3) // 2 + 1
    M = N * Ho * Wo
    xp = jnp.pad(x_nhwc, ((0, 0), (1, 1), (1, 1), (0, 0)),
                 constant_values=-jnp.inf)
    windows = [xp[:, kh:kh + 2 * Ho:2, kw:kw + 2 * Wo:2, :].reshape(M, C)
               for kh in range(3) for kw in range(3)]

    TM = _pick_tm(M)
    M_pad = _round_up(M, TM)
    if M_pad != M:
        windows = [jnp.pad(w, ((0, M_pad - M), (0, 0))) for w in windows]

    out = pl.pallas_call(
        _max9_kernel,
        out_shape=jax.ShapeDtypeStruct((M_pad, C), x_nhwc.dtype),
        grid_spec=pltpu.PrefetchScalarGridSpec(
            num_scalar_prefetch=0,
            grid=(M_pad // TM,),
            in_specs=[pl.BlockSpec((TM, C), lambda m: (m, 0))] * 9,
            out_specs=pl.BlockSpec((TM, C), lambda m: (m, 0)),
        ),
        compiler_params=pltpu.CompilerParams(
            dimension_semantics=("parallel",)),
    )(*windows)
    if M_pad != M:
        out = out[:M]
    return out.reshape(N, Ho, Wo, C)


# --------------------------------------------------------------------------
# Deterministic synthetic parameters (resnet50 stem + layer1, BN folded)
# --------------------------------------------------------------------------
def make_params(key):
    keys = iter(jax.random.split(key, 80))

    def conv_bn(cin, cout, k, eps=1e-5):
        w = jax.random.normal(next(keys), (k, k, cin, cout), jnp.float32)
        w = w * (2.0 / (k * k * cin)) ** 0.5
        gamma = 1.0 + 0.1 * jax.random.normal(next(keys), (cout,), jnp.float32)
        beta = 0.1 * jax.random.normal(next(keys), (cout,), jnp.float32)
        mean = 0.1 * jax.random.normal(next(keys), (cout,), jnp.float32)
        var = jnp.abs(jax.random.normal(next(keys), (cout,), jnp.float32)) + 0.5
        scale = gamma / jnp.sqrt(var + eps)
        return {"w": w * scale, "b": beta - mean * scale}

    params = {"conv1": conv_bn(3, 64, 7)}
    inplanes = 64
    for i in range(3):  # resnet50 layer1: 3 Bottleneck blocks, expansion 4
        blk = {
            "conv1": conv_bn(inplanes, 64, 1),
            "conv2": conv_bn(64, 64, 3),
            "conv3": conv_bn(64, 256, 1),
        }
        if i == 0:
            blk["downsample"] = conv_bn(inplanes, 256, 1)
        params[f"layer1_{i}"] = blk
        inplanes = 256
    return params


def prepare_inference_params(params, pretrained=True):
    """Reshape conv weights to (KH*KW*Cin, Cout), cast to bf16, fold 1/std."""
    def prep(p, fold_std=False):
        w = p["w"]
        if fold_std:
            w = w / NORM_STD.reshape(1, 1, 3, 1)
        kh, kw, cin, cout = w.shape
        return {"w": w.reshape(kh * kw * cin, cout).astype(ACT_DTYPE),
                "b": p["b"].reshape(1, cout).astype(jnp.float32)}

    out = {"conv1": prep(params["conv1"], fold_std=pretrained)}
    for i in range(3):
        out[f"layer1_{i}"] = {k: prep(v)
                              for k, v in params[f"layer1_{i}"].items()}
    return out


# --------------------------------------------------------------------------
# SegTemplate forward
# --------------------------------------------------------------------------
def backbone_to_layer1(x_nhwc, ip, pretrained=True):
    x = stem_conv7x7_s2_p3(x_nhwc, ip["conv1"], pretrained=pretrained)
    x = maxpool_3x3_s2_p1(x)
    # TODO(synk): the 64-channel intermediates still round-trip to HBM with a
    # 64-wide (lane-sparse) last dim; a per-M-tile fused Bottleneck pipeline
    # (emit_pipeline) would keep them resident in VMEM.
    for i in range(3):
        p = ip[f"layer1_{i}"]
        is_last = i == 2
        identity = (conv1x1(x, p["downsample"], relu=False)
                    if "downsample" in p else x)
        out = conv1x1(x, p["conv1"], relu=True)
        out = conv3x3_s1_p1(out, p["conv2"], relu=True)
        # Residual add + ReLU fused into the conv3 epilogue.
        x = conv1x1(out, p["conv3"], relu=True, residual=identity,
                    out_dtype=jnp.float32 if is_last else ACT_DTYPE)
    return x


def seg_template_forward(images_nchw, inference_params,
                         feat_extract_layer=("layer1",), pretrained=True):
    """images: (N, 3, H, W) NCHW, like the PyTorch module."""
    x = jnp.transpose(images_nchw, (0, 2, 3, 1))  # NHWC: channels on TPU lanes
    feat = backbone_to_layer1(x, inference_params, pretrained=pretrained)
    # TODO(synk): the original IntermediateLayerGetter also runs layer2-4 whose
    # outputs are discarded by the early `return result`; we skip that dead work.
    result = OrderedDict()
    for _layer in feat_extract_layer:
        result[_layer] = jnp.transpose(feat, (0, 3, 1, 2))  # back to NCHW
    return result


# --------------------------------------------------------------------------
if __name__ == "__main__":
    key = jax.random.PRNGKey(0)
    pkey, xkey = jax.random.split(key)
    params = make_params(pkey)
    iparams = prepare_inference_params(params, pretrained=True)

    # Small input consistent with forward: (N, 3, H_in, W_in)
    images = jax.random.uniform(xkey, (2, 3, 32, 32), jnp.float32)

    fwd = jax.jit(functools.partial(seg_template_forward,
                                    feat_extract_layer=("layer1",),
                                    pretrained=True))
    result = fwd(images, iparams)
    feat = result["layer1"]
    jax.block_until_ready(feat)

    assert feat.shape == (2, 256, 8, 8), feat.shape
    assert feat.dtype == jnp.float32
    assert bool(jnp.all(jnp.isfinite(feat)))
    print("KERNEL_OK")
</pallas_src>

<mosaic_0001>
module attributes {stable_mosaic.version = 11 : i64} {
  func.func @_matmul_bias_act_kernel(%arg0: i32, %arg1: memref<512x147xbf16, #tpu.memory_space<vmem>>, %arg2: memref<147x64xbf16, #tpu.memory_space<vmem>>, %arg3: memref<1x64xf32, #tpu.memory_space<vmem>>, %arg4: memref<512x64xbf16, #tpu.memory_space<vmem>>) attributes {dimension_semantics = [#tpu.dimension_semantics<parallel>], iteration_bounds = array<i64: 1>, scalar_prefetch = 0 : i64, scratch_operands = 0 : i64, tpu.core_type = #tpu.core_type<tc>, window_params = [{transform_indices = @transform_0, window_bounds = array<i64: 512, 147>}, {pipeline_mode = #tpu.pipeline_mode<synchronous>, transform_indices = @transform_1, window_bounds = array<i64: 147, 64>}, {pipeline_mode = #tpu.pipeline_mode<synchronous>, transform_indices = @transform_2, window_bounds = array<i64: 1, 64>}, {transform_indices = @transform_3, window_bounds = array<i64: 512, 64>}]} {
    %c0 = arith.constant 0 : index
    %c0_0 = arith.constant 0 : index
    %0 = vector.load %arg1[%c0, %c0_0] : memref<512x147xbf16, #tpu.memory_space<vmem>>, vector<512x147xbf16>
    %c0_1 = arith.constant 0 : index
    %c0_2 = arith.constant 0 : index
    %1 = vector.load %arg2[%c0_1, %c0_2] : memref<147x64xbf16, #tpu.memory_space<vmem>>, vector<147x64xbf16>
    %cst = arith.constant dense<0.000000e+00> : vector<512x64xf32>
    %2 = tpu.matmul %0, %1, %cst {dimension_numbers = #tpu.dot_dimension_numbers<[1], [0], [0], [1], [0, 0, 1, 1], [], []>} : vector<512x147xbf16>, vector<147x64xbf16>, vector<512x64xf32> -> vector<512x64xf32>
    %c0_3 = arith.constant 0 : index
    %c0_4 = arith.constant 0 : index
    %3 = vector.load %arg3[%c0_3, %c0_4] : memref<1x64xf32, #tpu.memory_space<vmem>>, vector<1x64xf32>
    %4 = vector.broadcast %3 : vector<1x64xf32> to vector<512x64xf32>
    %5 = arith.addf %2, %4 : vector<512x64xf32>
    %cst_5 = arith.constant 0.000000e+00 : f32
    %6 = vector.broadcast %cst_5 : f32 to vector<512x64xf32>
    %7 = arith.maximumf %5, %6 : vector<512x64xf32>
    %8 = arith.truncf %7 : vector<512x64xf32> to vector<512x64xbf16>
    %c0_6 = arith.constant 0 : index
    %c0_7 = arith.constant 0 : index
    %9 = vector.load %arg4[%c0_6, %c0_7] : memref<512x64xbf16, #tpu.memory_space<vmem>>, vector<512x64xbf16>
    tpu.vector_store %arg4[%c0_6, %c0_7], %8 {strides = array<i32>} : memref<512x64xbf16, #tpu.memory_space<vmem>>, vector<512x64xbf16>,
    return
  }
  func.func @transform_0(%arg0: i32) -> (i32, i32) {
    %c0_i32 = arith.constant 0 : i32
    %c0_i32_0 = arith.constant 0 : i32
    return %arg0, %c0_i32 : i32, i32
  }
  func.func @transform_1(%arg0: i32) -> (i32, i32) {
    %c0_i32 = arith.constant 0 : i32
    %c0_i32_0 = arith.constant 0 : i32
    %c0_i32_1 = arith.constant 0 : i32
    return %c0_i32, %c0_i32_0 : i32, i32
  }
  func.func @transform_2(%arg0: i32) -> (i32, i32) {
    %c0_i32 = arith.constant 0 : i32
    %c0_i32_0 = arith.constant 0 : i32
    %c0_i32_1 = arith.constant 0 : i32
    return %c0_i32, %c0_i32_0 : i32, i32
  }
  func.func @transform_3(%arg0: i32) -> (i32, i32) {
    %c0_i32 = arith.constant 0 : i32
    %c0_i32_0 = arith.constant 0 : i32
    return %arg0, %c0_i32 : i32, i32
  }
}

module attributes {stable_mosaic.version = 11 : i64} {
  func.func @_matmul_bias_act_kernel(%arg0: i32, %arg1: memref<128x64xbf16, #tpu.memory_space<vmem>>, %arg2: memref<64x64xbf16, #tpu.memory_space<vmem>>, %arg3: memref<1x64xf32, #tpu.memory_space<vmem>>, %arg4: memref<128x64xbf16, #tpu.memory_space<vmem>>) attributes {dimension_semantics = [#tpu.dimension_semantics<parallel>], iteration_bounds = array<i64: 1>, scalar_prefetch = 0 : i64, scratch_operands = 0 : i64, tpu.core_type = #tpu.core_type<tc>, window_params = [{transform_indices = @transform_0, window_bounds = array<i64: 128, 64>}, {pipeline_mode = #tpu.pipeline_mode<synchronous>, transform_indices = @transform_1, window_bounds = array<i64: 64, 64>}, {pipeline_mode = #tpu.pipeline_mode<synchronous>, transform_indices = @transform_2, window_bounds = array<i64: 1, 64>}, {transform_indices = @transform_3, window_bounds = array<i64: 128, 64>}]} {
    %c0 = arith.constant 0 : index
    %c0_0 = arith.constant 0 : index
    %0 = vector.load %arg1[%c0, %c0_0] : memref<128x64xbf16, #tpu.memory_space<vmem>>, vector<128x64xbf16>
    %c0_1 = arith.constant 0 : index
    %c0_2 = arith.constant 0 : index
    %1 = vector.load %arg2[%c0_1, %c0_2] : memref<64x64xbf16, #tpu.memory_space<vmem>>, vector<64x64xbf16>
    %cst = arith.constant dense<0.000000e+00> : vector<128x64xf32>
    %2 = tpu.matmul %0, %1, %cst {dimension_numbers = #tpu.dot_dimension_numbers<[1], [0], [0], [1], [0, 0, 1, 1], [], []>} : vector<128x64xbf16>, vector<64x64xbf16>, vector<128x64xf32> -> vector<128x64xf32>
    %c0_3 = arith.constant 0 : index
    %c0_4 = arith.constant 0 : index
    %3 = vector.load %arg3[%c0_3, %c0_4] : memref<1x64xf32, #tpu.memory_space<vmem>>, vector<1x64xf32>
    %4 = vector.broadcast %3 : vector<1x64xf32> to vector<128x64xf32>
    %5 = arith.addf %2, %4 : vector<128x64xf32>
    %cst_5 = arith.constant 0.000000e+00 : f32
    %6 = vector.broadcast %cst_5 : f32 to vector<128x64xf32>
    %7 = arith.maximumf %5, %6 : vector<128x64xf32>
    %8 = arith.truncf %7 : vector<128x64xf32> to vector<128x64xbf16>
    %c0_6 = arith.constant 0 : index
    %c0_7 = arith.constant 0 : index
    %9 = vector.load %arg4[%c0_6, %c0_7] : memref<128x64xbf16, #tpu.memory_space<vmem>>, vector<128x64xbf16>
    tpu.vector_store %arg4[%c0_6, %c0_7], %8 {strides = array<i32>} : memref<128x64xbf16, #tpu.memory_space<vmem>>, vector<128x64xbf16>,
    return
  }
  func.func @transform_0(%arg0: i32) -> (i32, i32) {
    %c0_i32 = arith.constant 0 : i32
    %c0_i32_0 = arith.constant 0 : i32
    return %arg0, %c0_i32 : i32, i32
  }
  func.func @transform_1(%arg0: i32) -> (i32, i32) {
    %c0_i32 = arith.constant 0 : i32
    %c0_i32_0 = arith.constant 0 : i32
    %c0_i32_1 = arith.constant 0 : i32
    return %c0_i32, %c0_i32_0 : i32, i32
  }
  func.func @transform_2(%arg0: i32) -> (i32, i32) {
    %c0_i32 = arith.constant 0 : i32
    %c0_i32_0 = arith.constant 0 : i32
    %c0_i32_1 = arith.constant 0 : i32
    return %c0_i32, %c0_i32_0 : i32, i32
  }
  func.func @transform_3(%arg0: i32) -> (i32, i32) {
    %c0_i32 = arith.constant 0 : i32
    %c0_i32_0 = arith.constant 0 : i32
    return %arg0, %c0_i32 : i32, i32
  }
}

module attributes {stable_mosaic.version = 11 : i64} {
  func.func @_max9_kernel(%arg0: i32, %arg1: memref<128x64xbf16, #tpu.memory_space<vmem>>, %arg2: memref<128x64xbf16, #tpu.memory_space<vmem>>, %arg3: memref<128x64xbf16, #tpu.memory_space<vmem>>, %arg4: memref<128x64xbf16, #tpu.memory_space<vmem>>, %arg5: memref<128x64xbf16, #tpu.memory_space<vmem>>, %arg6: memref<128x64xbf16, #tpu.memory_space<vmem>>, %arg7: memref<128x64xbf16, #tpu.memory_space<vmem>>, %arg8: memref<128x64xbf16, #tpu.memory_space<vmem>>, %arg9: memref<128x64xbf16, #tpu.memory_space<vmem>>, %arg10: memref<128x64xbf16, #tpu.memory_space<vmem>>) attributes {dimension_semantics = [#tpu.dimension_semantics<parallel>], iteration_bounds = array<i64: 1>, scalar_prefetch = 0 : i64, scratch_operands = 0 : i64, tpu.core_type = #tpu.core_type<tc>, window_params = [{transform_indices = @transform_0, window_bounds = array<i64: 128, 64>}, {transform_indices = @transform_1, window_bounds = array<i64: 128, 64>}, {transform_indices = @transform_2, window_bounds = array<i64: 128, 64>}, {transform_indices = @transform_3, window_bounds = array<i64: 128, 64>}, {transform_indices = @transform_4, window_bounds = array<i64: 128, 64>}, {transform_indices = @transform_5, window_bounds = array<i64: 128, 64>}, {transform_indices = @transform_6, window_bounds = array<i64: 128, 64>}, {transform_indices = @transform_7, window_bounds = array<i64: 128, 64>}, {transform_indices = @transform_8, window_bounds = array<i64: 128, 64>}, {transform_indices = @transform_9, window_bounds = array<i64: 128, 64>}]} {
    %c0 = arith.constant 0 : index
    %c0_0 = arith.constant 0 : index
    %0 = vector.load %arg1[%c0, %c0_0] : memref<128x64xbf16, #tpu.memory_space<vmem>>, vector<128x64xbf16>
    %c0_1 = arith.constant 0 : index
    %c0_2 = arith.constant 0 : index
    %1 = vector.load %arg2[%c0_1, %c0_2] : memref<128x64xbf16, #tpu.memory_space<vmem>>, vector<128x64xbf16>
    %2 = arith.maximumf %0, %1 : vector<128x64xbf16>
    %c0_3 = arith.constant 0 : index
    %c0_4 = arith.constant 0 : index
    %3 = vector.load %arg3[%c0_3, %c0_4] : memref<128x64xbf16, #tpu.memory_space<vmem>>, vector<128x64xbf16>
    %4 = arith.maximumf %2, %3 : vector<128x64xbf16>
    %c0_5 = arith.constant 0 : index
    %c0_6 = arith.constant 0 : index
    %5 = vector.load %arg4[%c0_5, %c0_6] : memref<128x64xbf16, #tpu.memory_space<vmem>>, vector<128x64xbf16>
    %6 = arith.maximumf %4, %5 : vector<128x64xbf16>
    %c0_7 = arith.constant 0 : index
    %c0_8 = arith.constant 0 : index
    %7 = vector.load %arg5[%c0_7, %c0_8] : memref<128x64xbf16, #tpu.memory_space<vmem>>, vector<128x64xbf16>
    %8 = arith.maximumf %6, %7 : vector<128x64xbf16>
    %c0_9 = arith.constant 0 : index
    %c0_10 = arith.constant 0 : index
    %9 = vector.load %arg6[%c0_9, %c0_10] : memref<128x64xbf16, #tpu.memory_space<vmem>>, vector<128x64xbf16>
    %10 = arith.maximumf %8, %9 : vector<128x64xbf16>
    %c0_11 = arith.constant 0 : index
    %c0_12 = arith.constant 0 : index
    %11 = vector.load %arg7[%c0_11, %c0_12] : memref<128x64xbf16, #tpu.memory_space<vmem>>, vector<128x64xbf16>
    %12 = arith.maximumf %10, %11 : vector<128x64xbf16>
    %c0_13 = arith.constant 0 : index
    %c0_14 = arith.constant 0 : index
    %13 = vector.load %arg8[%c0_13, %c0_14] : memref<128x64xbf16, #tpu.memory_space<vmem>>, vector<128x64xbf16>
    %14 = arith.maximumf %12, %13 : vector<128x64xbf16>
    %c0_15 = arith.constant 0 : index
    %c0_16 = arith.constant 0 : index
    %15 = vector.load %arg9[%c0_15, %c0_16] : memref<128x64xbf16, #tpu.memory_space<vmem>>, vector<128x64xbf16>
    %16 = arith.maximumf %14, %15 : vector<128x64xbf16>
    %c0_17 = arith.constant 0 : index
    %c0_18 = arith.constant 0 : index
    %17 = vector.load %arg10[%c0_17, %c0_18] : memref<128x64xbf16, #tpu.memory_space<vmem>>, vector<128x64xbf16>
    tpu.vector_store %arg10[%c0_17, %c0_18], %16 {strides = array<i32>} : memref<128x64xbf16, #tpu.memory_space<vmem>>, vector<128x64xbf16>,
    return
  }
  func.func @transform_0(%arg0: i32) -> (i32, i32) {
    %c0_i32 = arith.constant 0 : i32
    %c0_i32_0 = arith.constant 0 : i32
    return %arg0, %c0_i32 : i32, i32
  }
  func.func @transform_1(%arg0: i32) -> (i32, i32) {
    %c0_i32 = arith.constant 0 : i32
    %c0_i32_0 = arith.constant 0 : i32
    return %arg0, %c0_i32 : i32, i32
  }
  func.func @transform_2(%arg0: i32) -> (i32, i32) {
    %c0_i32 = arith.constant 0 : i32
    %c0_i32_0 = arith.constant 0 : i32
    return %arg0, %c0_i32 : i32, i32
  }
  func.func @transform_3(%arg0: i32) -> (i32, i32) {
    %c0_i32 = arith.constant 0 : i32
    %c0_i32_0 = arith.constant 0 : i32
    return %arg0, %c0_i32 : i32, i32
  }
  func.func @transform_4(%arg0: i32) -> (i32, i32) {
    %c0_i32 = arith.constant 0 : i32
    %c0_i32_0 = arith.constant 0 : i32
    return %arg0, %c0_i32 : i32, i32
  }
  func.func @transform_5(%arg0: i32) -> (i32, i32) {
    %c0_i32 = arith.constant 0 : i32
    %c0_i32_0 = arith.constant 0 : i32
    return %arg0, %c0_i32 : i32, i32
  }
  func.func @transform_6(%arg0: i32) -> (i32, i32) {
    %c0_i32 = arith.constant 0 : i32
    %c0_i32_0 = arith.constant 0 : i32
    return %arg0, %c0_i32 : i32, i32
  }
  func.func @transform_7(%arg0: i32) -> (i32, i32) {
    %c0_i32 = arith.constant 0 : i32
    %c0_i32_0 = arith.constant 0 : i32
    return %arg0, %c0_i32 : i32, i32
  }
  func.func @transform_8(%arg0: i32) -> (i32, i32) {
    %c0_i32 = arith.constant 0 : i32
    %c0_i32_0 = arith.constant 0 : i32
    return %arg0, %c0_i32 : i32, i32
  }
  func.func @transform_9(%arg0: i32) -> (i32, i32) {
    %c0_i32 = arith.constant 0 : i32
    %c0_i32_0 = arith.constant 0 : i32
    return %arg0, %c0_i32 : i32, i32
  }
}

module attributes {stable_mosaic.version = 11 : i64} {
  func.func @_matmul_bias_act_kernel(%arg0: i32, %arg1: memref<128x576xbf16, #tpu.memory_space<vmem>>, %arg2: memref<576x64xbf16, #tpu.memory_space<vmem>>, %arg3: memref<1x64xf32, #tpu.memory_space<vmem>>, %arg4: memref<128x64xbf16, #tpu.memory_space<vmem>>) attributes {dimension_semantics = [#tpu.dimension_semantics<parallel>], iteration_bounds = array<i64: 1>, scalar_prefetch = 0 : i64, scratch_operands = 0 : i64, tpu.core_type = #tpu.core_type<tc>, window_params = [{transform_indices = @transform_0, window_bounds = array<i64: 128, 576>}, {pipeline_mode = #tpu.pipeline_mode<synchronous>, transform_indices = @transform_1, window_bounds = array<i64: 576, 64>}, {pipeline_mode = #tpu.pipeline_mode<synchronous>, transform_indices = @transform_2, window_bounds = array<i64: 1, 64>}, {transform_indices = @transform_3, window_bounds = array<i64: 128, 64>}]} {
    %c0 = arith.constant 0 : index
    %c0_0 = arith.constant 0 : index
    %0 = vector.load %arg1[%c0, %c0_0] : memref<128x576xbf16, #tpu.memory_space<vmem>>, vector<128x576xbf16>
    %c0_1 = arith.constant 0 : index
    %c0_2 = arith.constant 0 : index
    %1 = vector.load %arg2[%c0_1, %c0_2] : memref<576x64xbf16, #tpu.memory_space<vmem>>, vector<576x64xbf16>
    %cst = arith.constant dense<0.000000e+00> : vector<128x64xf32>
    %2 = tpu.matmul %0, %1, %cst {dimension_numbers = #tpu.dot_dimension_numbers<[1], [0], [0], [1], [0, 0, 1, 1], [], []>} : vector<128x576xbf16>, vector<576x64xbf16>, vector<128x64xf32> -> vector<128x64xf32>
    %c0_3 = arith.constant 0 : index
    %c0_4 = arith.constant 0 : index
    %3 = vector.load %arg3[%c0_3, %c0_4] : memref<1x64xf32, #tpu.memory_space<vmem>>, vector<1x64xf32>
    %4 = vector.broadcast %3 : vector<1x64xf32> to vector<128x64xf32>
    %5 = arith.addf %2, %4 : vector<128x64xf32>
    %cst_5 = arith.constant 0.000000e+00 : f32
    %6 = vector.broadcast %cst_5 : f32 to vector<128x64xf32>
    %7 = arith.maximumf %5, %6 : vector<128x64xf32>
    %8 = arith.truncf %7 : vector<128x64xf32> to vector<128x64xbf16>
    %c0_6 = arith.constant 0 : index
    %c0_7 = arith.constant 0 : index
    %9 = vector.load %arg4[%c0_6, %c0_7] : memref<128x64xbf16, #tpu.memory_space<vmem>>, vector<128x64xbf16>
    tpu.vector_store %arg4[%c0_6, %c0_7], %8 {strides = array<i32>} : memref<128x64xbf16, #tpu.memory_space<vmem>>, vector<128x64xbf16>,
    return
  }
  func.func @transform_0(%arg0: i32) -> (i32, i32) {
    %c0_i32 = arith.constant 0 : i32
    %c0_i32_0 = arith.constant 0 : i32
    return %arg0, %c0_i32 : i32, i32
  }
  func.func @transform_1(%arg0: i32) -> (i32, i32) {
    %c0_i32 = arith.constant 0 : i32
    %c0_i32_0 = arith.constant 0 : i32
    %c0_i32_1 = arith.constant 0 : i32
    return %c0_i32, %c0_i32_0 : i32, i32
  }
  func.func @transform_2(%arg0: i32) -> (i32, i32) {
    %c0_i32 = arith.constant 0 : i32
    %c0_i32_0 = arith.constant 0 : i32
    %c0_i32_1 = arith.constant 0 : i32
    return %c0_i32, %c0_i32_0 : i32, i32
  }
  func.func @transform_3(%arg0: i32) -> (i32, i32) {
    %c0_i32 = arith.constant 0 : i32
    %c0_i32_0 = arith.constant 0 : i32
    return %arg0, %c0_i32 : i32, i32
  }
}

module attributes {stable_mosaic.version = 11 : i64} {
  func.func @_matmul_bias_act_kernel(%arg0: i32, %arg1: memref<128x64xbf16, #tpu.memory_space<vmem>>, %arg2: memref<64x256xbf16, #tpu.memory_space<vmem>>, %arg3: memref<1x256xf32, #tpu.memory_space<vmem>>, %arg4: memref<128x256xbf16, #tpu.memory_space<vmem>>, %arg5: memref<128x256xbf16, #tpu.memory_space<vmem>>) attributes {dimension_semantics = [#tpu.dimension_semantics<parallel>], iteration_bounds = array<i64: 1>, scalar_prefetch = 0 : i64, scratch_operands = 0 : i64, tpu.core_type = #tpu.core_type<tc>, window_params = [{transform_indices = @transform_0, window_bounds = array<i64: 128, 64>}, {pipeline_mode = #tpu.pipeline_mode<synchronous>, transform_indices = @transform_1, window_bounds = array<i64: 64, 256>}, {pipeline_mode = #tpu.pipeline_mode<synchronous>, transform_indices = @transform_2, window_bounds = array<i64: 1, 256>}, {transform_indices = @transform_3, window_bounds = array<i64: 128, 256>}, {transform_indices = @transform_4, window_bounds = array<i64: 128, 256>}]} {
    %c0 = arith.constant 0 : index
    %c0_0 = arith.constant 0 : index
    %0 = vector.load %arg1[%c0, %c0_0] : memref<128x64xbf16, #tpu.memory_space<vmem>>, vector<128x64xbf16>
    %c0_1 = arith.constant 0 : index
    %c0_2 = arith.constant 0 : index
    %1 = vector.load %arg2[%c0_1, %c0_2] : memref<64x256xbf16, #tpu.memory_space<vmem>>, vector<64x256xbf16>
    %cst = arith.constant dense<0.000000e+00> : vector<128x256xf32>
    %2 = tpu.matmul %0, %1, %cst {dimension_numbers = #tpu.dot_dimension_numbers<[1], [0], [0], [1], [0, 0, 1, 1], [], []>} : vector<128x64xbf16>, vector<64x256xbf16>, vector<128x256xf32> -> vector<128x256xf32>
    %c0_3 = arith.constant 0 : index
    %c0_4 = arith.constant 0 : index
    %3 = vector.load %arg3[%c0_3, %c0_4] : memref<1x256xf32, #tpu.memory_space<vmem>>, vector<1x256xf32>
    %4 = vector.broadcast %3 : vector<1x256xf32> to vector<128x256xf32>
    %5 = arith.addf %2, %4 : vector<128x256xf32>
    %c0_5 = arith.constant 0 : index
    %c0_6 = arith.constant 0 : index
    %6 = vector.load %arg4[%c0_5, %c0_6] : memref<128x256xbf16, #tpu.memory_space<vmem>>, vector<128x256xbf16>
    %7 = arith.extf %6 : vector<128x256xbf16> to vector<128x256xf32>
    %8 = arith.addf %5, %7 : vector<128x256xf32>
    %cst_7 = arith.constant 0.000000e+00 : f32
    %9 = vector.broadcast %cst_7 : f32 to vector<128x256xf32>
    %10 = arith.maximumf %8, %9 : vector<128x256xf32>
    %11 = arith.truncf %10 : vector<128x256xf32> to vector<128x256xbf16>
    %c0_8 = arith.constant 0 : index
    %c0_9 = arith.constant 0 : index
    %12 = vector.load %arg5[%c0_8, %c0_9] : memref<128x256xbf16, #tpu.memory_space<vmem>>, vector<128x256xbf16>
    tpu.vector_store %arg5[%c0_8, %c0_9], %11 {strides = array<i32>} : memref<128x256xbf16, #tpu.memory_space<vmem>>, vector<128x256xbf16>,
    return
  }
  func.func @transform_0(%arg0: i32) -> (i32, i32) {
    %c0_i32 = arith.constant 0 : i32
    %c0_i32_0 = arith.constant 0 : i32
    return %arg0, %c0_i32 : i32, i32
  }
  func.func @transform_1(%arg0: i32) -> (i32, i32) {
    %c0_i32 = arith.constant 0 : i32
    %c0_i32_0 = arith.constant 0 : i32
    %c0_i32_1 = arith.constant 0 : i32
    return %c0_i32, %c0_i32_0 : i32, i32
  }
  func.func @transform_2(%arg0: i32) -> (i32, i32) {
    %c0_i32 = arith.constant 0 : i32
    %c0_i32_0 = arith.constant 0 : i32
    %c0_i32_1 = arith.constant 0 : i32
    return %c0_i32, %c0_i32_0 : i32, i32
  }
  func.func @transform_3(%arg0: i32) -> (i32, i32) {
    %c0_i32 = arith.constant 0 : i32
    %c0_i32_0 = arith.constant 0 : i32
    return %arg0, %c0_i32 : i32, i32
  }
  func.func @transform_4(%arg0: i32) -> (i32, i32) {
    %c0_i32 = arith.constant 0 : i32
    %c0_i32_0 = arith.constant 0 : i32
    return %arg0, %c0_i32 : i32, i32
  }
}

module attributes {stable_mosaic.version = 11 : i64} {
  func.func @_matmul_bias_act_kernel(%arg0: i32, %arg1: memref<128x64xbf16, #tpu.memory_space<vmem>>, %arg2: memref<64x256xbf16, #tpu.memory_space<vmem>>, %arg3: memref<1x256xf32, #tpu.memory_space<vmem>>, %arg4: memref<128x256xbf16, #tpu.memory_space<vmem>>) attributes {dimension_semantics = [#tpu.dimension_semantics<parallel>], iteration_bounds = array<i64: 1>, scalar_prefetch = 0 : i64, scratch_operands = 0 : i64, tpu.core_type = #tpu.core_type<tc>, window_params = [{transform_indices = @transform_0, window_bounds = array<i64: 128, 64>}, {pipeline_mode = #tpu.pipeline_mode<synchronous>, transform_indices = @transform_1, window_bounds = array<i64: 64, 256>}, {pipeline_mode = #tpu.pipeline_mode<synchronous>, transform_indices = @transform_2, window_bounds = array<i64: 1, 256>}, {transform_indices = @transform_3, window_bounds = array<i64: 128, 256>}]} {
    %c0 = arith.constant 0 : index
    %c0_0 = arith.constant 0 : index
    %0 = vector.load %arg1[%c0, %c0_0] : memref<128x64xbf16, #tpu.memory_space<vmem>>, vector<128x64xbf16>
    %c0_1 = arith.constant 0 : index
    %c0_2 = arith.constant 0 : index
    %1 = vector.load %arg2[%c0_1, %c0_2] : memref<64x256xbf16, #tpu.memory_space<vmem>>, vector<64x256xbf16>
    %cst = arith.constant dense<0.000000e+00> : vector<128x256xf32>
    %2 = tpu.matmul %0, %1, %cst {dimension_numbers = #tpu.dot_dimension_numbers<[1], [0], [0], [1], [0, 0, 1, 1], [], []>} : vector<128x64xbf16>, vector<64x256xbf16>, vector<128x256xf32> -> vector<128x256xf32>
    %c0_3 = arith.constant 0 : index
    %c0_4 = arith.constant 0 : index
    %3 = vector.load %arg3[%c0_3, %c0_4] : memref<1x256xf32, #tpu.memory_space<vmem>>, vector<1x256xf32>
    %4 = vector.broadcast %3 : vector<1x256xf32> to vector<128x256xf32>
    %5 = arith.addf %2, %4 : vector<128x256xf32>
    %6 = arith.truncf %5 : vector<128x256xf32> to vector<128x256xbf16>
    %c0_5 = arith.constant 0 : index
    %c0_6 = arith.constant 0 : index
    %7 = vector.load %arg4[%c0_5, %c0_6] : memref<128x256xbf16, #tpu.memory_space<vmem>>, vector<128x256xbf16>
    tpu.vector_store %arg4[%c0_5, %c0_6], %6 {strides = array<i32>} : memref<128x256xbf16, #tpu.memory_space<vmem>>, vector<128x256xbf16>,
    return
  }
  func.func @transform_0(%arg0: i32) -> (i32, i32) {
    %c0_i32 = arith.constant 0 : i32
    %c0_i32_0 = arith.constant 0 : i32
    return %arg0, %c0_i32 : i32, i32
  }
  func.func @transform_1(%arg0: i32) -> (i32, i32) {
    %c0_i32 = arith.constant 0 : i32
    %c0_i32_0 = arith.constant 0 : i32
    %c0_i32_1 = arith.constant 0 : i32
    return %c0_i32, %c0_i32_0 : i32, i32
  }
  func.func @transform_2(%arg0: i32) -> (i32, i32) {
    %c0_i32 = arith.constant 0 : i32
    %c0_i32_0 = arith.constant 0 : i32
    %c0_i32_1 = arith.constant 0 : i32
    return %c0_i32, %c0_i32_0 : i32, i32
  }
  func.func @transform_3(%arg0: i32) -> (i32, i32) {
    %c0_i32 = arith.constant 0 : i32
    %c0_i32_0 = arith.constant 0 : i32
    return %arg0, %c0_i32 : i32, i32
  }
}

module attributes {stable_mosaic.version = 11 : i64} {
  func.func @_matmul_bias_act_kernel(%arg0: i32, %arg1: memref<128x256xbf16, #tpu.memory_space<vmem>>, %arg2: memref<256x64xbf16, #tpu.memory_space<vmem>>, %arg3: memref<1x64xf32, #tpu.memory_space<vmem>>, %arg4: memref<128x64xbf16, #tpu.memory_space<vmem>>) attributes {dimension_semantics = [#tpu.dimension_semantics<parallel>], iteration_bounds = array<i64: 1>, scalar_prefetch = 0 : i64, scratch_operands = 0 : i64, tpu.core_type = #tpu.core_type<tc>, window_params = [{transform_indices = @transform_0, window_bounds = array<i64: 128, 256>}, {pipeline_mode = #tpu.pipeline_mode<synchronous>, transform_indices = @transform_1, window_bounds = array<i64: 256, 64>}, {pipeline_mode = #tpu.pipeline_mode<synchronous>, transform_indices = @transform_2, window_bounds = array<i64: 1, 64>}, {transform_indices = @transform_3, window_bounds = array<i64: 128, 64>}]} {
    %c0 = arith.constant 0 : index
    %c0_0 = arith.constant 0 : index
    %0 = vector.load %arg1[%c0, %c0_0] : memref<128x256xbf16, #tpu.memory_space<vmem>>, vector<128x256xbf16>
    %c0_1 = arith.constant 0 : index
    %c0_2 = arith.constant 0 : index
    %1 = vector.load %arg2[%c0_1, %c0_2] : memref<256x64xbf16, #tpu.memory_space<vmem>>, vector<256x64xbf16>
    %cst = arith.constant dense<0.000000e+00> : vector<128x64xf32>
    %2 = tpu.matmul %0, %1, %cst {dimension_numbers = #tpu.dot_dimension_numbers<[1], [0], [0], [1], [0, 0, 1, 1], [], []>} : vector<128x256xbf16>, vector<256x64xbf16>, vector<128x64xf32> -> vector<128x64xf32>
    %c0_3 = arith.constant 0 : index
    %c0_4 = arith.constant 0 : index
    %3 = vector.load %arg3[%c0_3, %c0_4] : memref<1x64xf32, #tpu.memory_space<vmem>>, vector<1x64xf32>
    %4 = vector.broadcast %3 : vector<1x64xf32> to vector<128x64xf32>
    %5 = arith.addf %2, %4 : vector<128x64xf32>
    %cst_5 = arith.constant 0.000000e+00 : f32
    %6 = vector.broadcast %cst_5 : f32 to vector<128x64xf32>
    %7 = arith.maximumf %5, %6 : vector<128x64xf32>
    %8 = arith.truncf %7 : vector<128x64xf32> to vector<128x64xbf16>
    %c0_6 = arith.constant 0 : index
    %c0_7 = arith.constant 0 : index
    %9 = vector.load %arg4[%c0_6, %c0_7] : memref<128x64xbf16, #tpu.memory_space<vmem>>, vector<128x64xbf16>
    tpu.vector_store %arg4[%c0_6, %c0_7], %8 {strides = array<i32>} : memref<128x64xbf16, #tpu.memory_space<vmem>>, vector<128x64xbf16>,
    return
  }
  func.func @transform_0(%arg0: i32) -> (i32, i32) {
    %c0_i32 = arith.constant 0 : i32
    %c0_i32_0 = arith.constant 0 : i32
    return %arg0, %c0_i32 : i32, i32
  }
  func.func @transform_1(%arg0: i32) -> (i32, i32) {
    %c0_i32 = arith.constant 0 : i32
    %c0_i32_0 = arith.constant 0 : i32
    %c0_i32_1 = arith.constant 0 : i32
    return %c0_i32, %c0_i32_0 : i32, i32
  }
  func.func @transform_2(%arg0: i32) -> (i32, i32) {
    %c0_i32 = arith.constant 0 : i32
    %c0_i32_0 = arith.constant 0 : i32
    %c0_i32_1 = arith.constant 0 : i32
    return %c0_i32, %c0_i32_0 : i32, i32
  }
  func.func @transform_3(%arg0: i32) -> (i32, i32) {
    %c0_i32 = arith.constant 0 : i32
    %c0_i32_0 = arith.constant 0 : i32
    return %arg0, %c0_i32 : i32, i32
  }
}

module attributes {stable_mosaic.version = 11 : i64} {
  func.func @_matmul_bias_act_kernel(%arg0: i32, %arg1: memref<128x64xbf16, #tpu.memory_space<vmem>>, %arg2: memref<64x256xbf16, #tpu.memory_space<vmem>>, %arg3: memref<1x256xf32, #tpu.memory_space<vmem>>, %arg4: memref<128x256xbf16, #tpu.memory_space<vmem>>, %arg5: memref<128x256xf32, #tpu.memory_space<vmem>>) attributes {dimension_semantics = [#tpu.dimension_semantics<parallel>], iteration_bounds = array<i64: 1>, scalar_prefetch = 0 : i64, scratch_operands = 0 : i64, tpu.core_type = #tpu.core_type<tc>, window_params = [{transform_indices = @transform_0, window_bounds = array<i64: 128, 64>}, {pipeline_mode = #tpu.pipeline_mode<synchronous>, transform_indices = @transform_1, window_bounds = array<i64: 64, 256>}, {pipeline_mode = #tpu.pipeline_mode<synchronous>, transform_indices = @transform_2, window_bounds = array<i64: 1, 256>}, {transform_indices = @transform_3, window_bounds = array<i64: 128, 256>}, {transform_indices = @transform_4, window_bounds = array<i64: 128, 256>}]} {
    %c0 = arith.constant 0 : index
    %c0_0 = arith.constant 0 : index
    %0 = vector.load %arg1[%c0, %c0_0] : memref<128x64xbf16, #tpu.memory_space<vmem>>, vector<128x64xbf16>
    %c0_1 = arith.constant 0 : index
    %c0_2 = arith.constant 0 : index
    %1 = vector.load %arg2[%c0_1, %c0_2] : memref<64x256xbf16, #tpu.memory_space<vmem>>, vector<64x256xbf16>
    %cst = arith.constant dense<0.000000e+00> : vector<128x256xf32>
    %2 = tpu.matmul %0, %1, %cst {dimension_numbers = #tpu.dot_dimension_numbers<[1], [0], [0], [1], [0, 0, 1, 1], [], []>} : vector<128x64xbf16>, vector<64x256xbf16>, vector<128x256xf32> -> vector<128x256xf32>
    %c0_3 = arith.constant 0 : index
    %c0_4 = arith.constant 0 : index
    %3 = vector.load %arg3[%c0_3, %c0_4] : memref<1x256xf32, #tpu.memory_space<vmem>>, vector<1x256xf32>
    %4 = vector.broadcast %3 : vector<1x256xf32> to vector<128x256xf32>
    %5 = arith.addf %2, %4 : vector<128x256xf32>
    %c0_5 = arith.constant 0 : index
    %c0_6 = arith.constant 0 : index
    %6 = vector.load %arg4[%c0_5, %c0_6] : memref<128x256xbf16, #tpu.memory_space<vmem>>, vector<128x256xbf16>
    %7 = arith.extf %6 : vector<128x256xbf16> to vector<128x256xf32>
    %8 = arith.addf %5, %7 : vector<128x256xf32>
    %cst_7 = arith.constant 0.000000e+00 : f32
    %9 = vector.broadcast %cst_7 : f32 to vector<128x256xf32>
    %10 = arith.maximumf %8, %9 : vector<128x256xf32>
    %c0_8 = arith.constant 0 : index
    %c0_9 = arith.constant 0 : index
    %11 = vector.load %arg5[%c0_8, %c0_9] : memref<128x256xf32, #tpu.memory_space<vmem>>, vector<128x256xf32>
    tpu.vector_store %arg5[%c0_8, %c0_9], %10 {strides = array<i32>} : memref<128x256xf32, #tpu.memory_space<vmem>>, vector<128x256xf32>,
    return
  }
  func.func @transform_0(%arg0: i32) -> (i32, i32) {
    %c0_i32 = arith.constant 0 : i32
    %c0_i32_0 = arith.constant 0 : i32
    return %arg0, %c0_i32 : i32, i32
  }
  func.func @transform_1(%arg0: i32) -> (i32, i32) {
    %c0_i32 = arith.constant 0 : i32
    %c0_i32_0 = arith.constant 0 : i32
    %c0_i32_1 = arith.constant 0 : i32
    return %c0_i32, %c0_i32_0 : i32, i32
  }
  func.func @transform_2(%arg0: i32) -> (i32, i32) {
    %c0_i32 = arith.constant 0 : i32
    %c0_i32_0 = arith.constant 0 : i32
    %c0_i32_1 = arith.constant 0 : i32
    return %c0_i32, %c0_i32_0 : i32, i32
  }
  func.func @transform_3(%arg0: i32) -> (i32, i32) {
    %c0_i32 = arith.constant 0 : i32
    %c0_i32_0 = arith.constant 0 : i32
    return %arg0, %c0_i32 : i32, i32
  }
  func.func @transform_4(%arg0: i32) -> (i32, i32) {
    %c0_i32 = arith.constant 0 : i32
    %c0_i32_0 = arith.constant 0 : i32
    return %arg0, %c0_i32 : i32, i32
  }
}

</mosaic_0001>

<bundles_post_ra>
// kernel: seg_template_forward.15
= control target key start
LH: loop header
LB: loop body
LE: loop exit
PB: predicated region body
PF: predicated region fallthrough
CT: control target
= control target key end

     0   :  { %vm110_vm0 = vcmask 523264   ;;  %vm312_vm1 = vcmask 519168   ;;  %s591_s1 = inlined_call_operand.vmem [shape: bf16[64,64], index: 1, kind: input, shape index: {}]   ;;  %s592_s0 = inlined_call_operand.vmem [shape: bf16[128,64], index: 0, kind: input, shape index: {}]   ;;  %s593_s2 = inlined_call_operand.vmem [shape: f32[1,64], index: 2, kind: input, shape index: {}]   ;;  %s594_s3 = inlined_call_operand.vmem [shape: bf16[128,64], index: 3, kind: output, shape index: {}]  }
   0x1   :  { %v430_v0 = vld [vmem:[%s591_s1 + $0x18] sm:$0xff]   ;;  %v431_v1 = vld [vmem:[%s591_s1 + $0x10] sm:$0xff]   ;;  %v432_v2 = vld [vmem:[%s591_s1 + $0x8] sm:$0xff]  }
   0x2   :  { %398 = vmatprep.subr.bf16.mxu0 %v430_v0  ;;  %422 = vmatprep.subr.bf16.mxu1 %v430_v0  ;;  %v434_v3 = vld [vmem:[%s592_s0] sm:$0xff]   ;;  %v436_v6 = vld [vmem:[%s592_s0 + $0x8] sm:$0xff]   ;;  %v438_v8 = vld [vmem:[%s592_s0 + $0x10] sm:$0xff]  }
   0x3   :  { %399 = vmatpush3.bf16.msra.mxu0 %v430_v0  ;;  %426 = vmatpush3.bf16.msra.mxu1 %v430_v0  ;;  %v435_v4 = vld [vmem:[%s592_s0 + $0x20] sm:$0xff]   ;;  %v437_v7 = vld [vmem:[%s592_s0 + $0x28] sm:$0xff]   ;;  %v439_v9 = vld [vmem:[%s592_s0 + $0x30] sm:$0xff]  }
   0x4   :  { %400 = vmatprep.subr.bf16.mxu0 %v431_v1  ;;  %423 = vmatprep.subr.bf16.mxu1 %v431_v1  ;;  %v433_v5 = vld [vmem:[%s591_s1] sm:$0xff]   ;;  %v440_v10 = vld [vmem:[%s592_s0 + $0x18] sm:$0xff]  }
   0x5   :  { %406 = vmatprep.mubr.msk.bf16.mxu0 %vm110_vm0, %v434_v3  ;;  %414 = vmatprep.mubr.msk.bf16.mxu1 %vm110_vm0, %v435_v4  ;;  %v441_v11 = vld [vmem:[%s592_s0 + $0x38] sm:$0xff]   ;;  %v509_v12 = vld [vmem:[%s593_s2] ss:$0 sm:$0xff] }
   0x7   :  { %401 = vmatpush3.bf16.msra.mxu0 %v431_v1  ;;  %427 = vmatpush3.bf16.msra.mxu1 %v431_v1 }
   0x8   :  { %402 = vmatprep.subr.bf16.mxu0 %v432_v2  ;;  %424 = vmatprep.subr.bf16.mxu1 %v432_v2 }
   0xb   :  { %403 = vmatpush3.bf16.msra.mxu0 %v432_v2  ;;  %428 = vmatpush3.bf16.msra.mxu1 %v432_v2 }
   0xc   :  { %404 = vmatprep.subr.bf16.mxu0 %v433_v5  ;;  %425 = vmatprep.subr.bf16.mxu1 %v433_v5 }
   0xf   :  { %405 = vmatpush3.bf16.msra.mxu0 %v433_v5  ;;  %429 = vmatpush3.bf16.msra.mxu1 %v433_v5 }
  0x12   :  { %407 = vmatmul.mubr.msk.bf16.vlgmr.msra.gmra.mxu0 %vm110_vm0, %v436_v6  ;;  %415 = vmatmul.mubr.msk.bf16.vlgmr.msra.gmra.mxu1 %vm110_vm0, %v437_v7 }
  0x13   :  { %410 = vmatprep.mubr.msk.bf16.mxu0 %vm110_vm0, %v438_v8  ;;  %418 = vmatprep.mubr.msk.bf16.mxu1 %vm110_vm0, %v439_v9 }
  0x1a   :  { %411 = vmatmul.mubr.msk.bf16.gmra.mxu0 %vm110_vm0, %v440_v10  ;;  %419 = vmatmul.mubr.msk.bf16.gmra.mxu1 %vm110_vm0, %v441_v11 }
  0xd2   :  { %v408_v13 = vpop.f32.mrf.mxu0  ;;  %v416_v14 = vpop.f32.mrf.mxu1 }
  0xd3   :  { %v178_v15 = vadd.f32 %v408_v13, %v509_v12  ;;  %v210_v16 = vadd.f32 %v416_v14, %v509_v12 }
  0xd4   :  { %v169_v17 = vpop.f32.mrf.mxu0  ;;  %v201_v18 = vpop.f32.mrf.mxu1 }
  0xd5   :  { %v234_v19 = vmax.f32 %v178_v15, 0.0  ;;  %v242_v20 = vmax.f32 %v210_v16, 0.0  ;;  %v170_v21 = vadd.f32 %v509_v12, %v169_v17  ;;  %v202_v22 = vadd.f32 %v509_v12, %v201_v18 }
  0xd6   :  { %v409_v23 = vpop.f32.mrf.mxu0  ;;  %v417_v24 = vpop.f32.mrf.mxu1 }
  0xd7   :  { %v372_v25 = vpack.c.bf16 %v234_v19, %v234_v19  ;;  %v380_v26 = vpack.c.bf16 %v242_v20, %v242_v20  ;;  %v232_v27 = vmax.f32 %v170_v21, 0.0  ;;  %v240_v28 = vmax.f32 %v202_v22, 0.0 }
  0xd8   :  { %v181_v29 = vadd.f32 %v409_v23, %v509_v12  ;;  %v213_v30 = vadd.f32 %v417_v24, %v509_v12  ;;  %v172_v31 = vpop.f32.mrf.mxu0  ;;  %v204_v32 = vpop.f32.mrf.mxu1 }
  0xd9   :  { %315 = vst.msk [vmem:[%s594_s3 + $0x8] sm:$0xf] %vm312_vm1, %v372_v25  ;;  %323 = vst.msk [vmem:[%s594_s3 + $0x28] sm:$0xf] %vm312_vm1, %v380_v26  ;;  %v370_v33 = vpack.c.bf16 %v232_v27, %v232_v27  ;;  %v378_v34 = vpack.c.bf16 %v240_v28, %v240_v28  ;;  %v173_v35 = vadd.f32 %v509_v12, %v172_v31 }
  0xda   :  { %v205_v36 = vadd.f32 %v509_v12, %v204_v32  ;;  %v235_v37 = vmax.f32 %v181_v29, 0.0  ;;  %v243_v38 = vmax.f32 %v213_v30, 0.0  ;;  %v412_v39 = vpop.f32.mrf.mxu0  ;;  %v420_v40 = vpop.f32.mrf.mxu1 }
  0xdb   :  { %313 = vst.msk [vmem:[%s594_s3] sm:$0xf] %vm312_vm1, %v370_v33  ;;  %321 = vst.msk [vmem:[%s594_s3 + $0x20] sm:$0xf] %vm312_vm1, %v378_v34  ;;  %v233_v41 = vmax.f32 %v173_v35, 0.0  ;;  %v194_v43 = vadd.f32 %v412_v39, %v509_v12  ;;  %v226_v44 = vadd.f32 %v420_v40, %v509_v12 }
  0xdc   :  { %v241_v42 = vmax.f32 %v205_v36, 0.0  ;;  %v373_v45 = vpack.c.bf16 %v235_v37, %v235_v37  ;;  %v381_v46 = vpack.c.bf16 %v243_v38, %v243_v38  ;;  %v185_v47 = vpop.f32.mrf.mxu0  ;;  %v217_v48 = vpop.f32.mrf.mxu1 }
  0xdd   :  { %v371_v49 = vpack.c.bf16 %v233_v41, %v233_v41  ;;  %v238_v51 = vmax.f32 %v194_v43, 0.0  ;;  %v246_v52 = vmax.f32 %v226_v44, 0.0  ;;  %v186_v53 = vadd.f32 %v509_v12, %v185_v47 }
  0xde   :  { %v379_v50 = vpack.c.bf16 %v241_v42, %v241_v42  ;;  %316 = vst.msk [vmem:[%s594_s3 + $0xc] sm:$0xf] %vm312_vm1, %v373_v45  ;;  %324 = vst.msk [vmem:[%s594_s3 + $0x2c] sm:$0xf] %vm312_vm1, %v381_v46  ;;  %v218_v54 = vadd.f32 %v509_v12, %v217_v48  ;;  %v413_v55 = vpop.f32.mrf.mxu0  ;;  %v421_v56 = vpop.f32.mrf.mxu1 }
  0xdf   :  { %314 = vst.msk [vmem:[%s594_s3 + $0x4] sm:$0xf] %vm312_vm1, %v371_v49  ;;  %v376_v57 = vpack.c.bf16 %v238_v51, %v238_v51  ;;  %v384_v58 = vpack.c.bf16 %v246_v52, %v246_v52  ;;  %v197_v59 = vadd.f32 %v413_v55, %v509_v12  ;;  %v229_v60 = vadd.f32 %v421_v56, %v509_v12 }
  0xe0   :  { %322 = vst.msk [vmem:[%s594_s3 + $0x24] sm:$0xf] %vm312_vm1, %v379_v50  ;;  %v236_v61 = vmax.f32 %v186_v53, 0.0  ;;  %v244_v62 = vmax.f32 %v218_v54, 0.0  ;;  %v188_v63 = vpop.f32.mrf.mxu0  ;;  %v220_v0 = vpop.f32.mrf.mxu1 }
  0xe1   :  { %319 = vst.msk [vmem:[%s594_s3 + $0x18] sm:$0xf] %vm312_vm1, %v376_v57  ;;  %327 = vst.msk [vmem:[%s594_s3 + $0x38] sm:$0xf] %vm312_vm1, %v384_v58  ;;  %v239_v1 = vmax.f32 %v197_v59, 0.0  ;;  %v247_v2 = vmax.f32 %v229_v60, 0.0  ;;  %v189_v3 = vadd.f32 %v509_v12, %v188_v63  ;;  %v221_v4 = vadd.f32 %v509_v12, %v220_v0 }
  0xe2   :  { %v374_v5 = vpack.c.bf16 %v236_v61, %v236_v61  ;;  %v382_v6 = vpack.c.bf16 %v244_v62, %v244_v62 }
  0xe3   :  { %v377_v7 = vpack.c.bf16 %v239_v1, %v239_v1  ;;  %v385_v8 = vpack.c.bf16 %v247_v2, %v247_v2  ;;  %v237_v9 = vmax.f32 %v189_v3, 0.0  ;;  %v245_v10 = vmax.f32 %v221_v4, 0.0 }
  0xe4   :  { %317 = vst.msk [vmem:[%s594_s3 + $0x10] sm:$0xf] %vm312_vm1, %v374_v5  ;;  %325 = vst.msk [vmem:[%s594_s3 + $0x30] sm:$0xf] %vm312_vm1, %v382_v6 }
  0xe5   :  { %320 = vst.msk [vmem:[%s594_s3 + $0x1c] sm:$0xf] %vm312_vm1, %v377_v7  ;;  %328 = vst.msk [vmem:[%s594_s3 + $0x3c] sm:$0xf] %vm312_vm1, %v385_v8  ;;  %v375_v11 = vpack.c.bf16 %v237_v9, %v237_v9  ;;  %v383_v12 = vpack.c.bf16 %v245_v10, %v245_v10 }
  0xe7   :  { %318 = vst.msk [vmem:[%s594_s3 + $0x14] sm:$0xf] %vm312_vm1, %v375_v11  ;;  %326 = vst.msk [vmem:[%s594_s3 + $0x34] sm:$0xf] %vm312_vm1, %v383_v12 }

// kernel: seg_template_forward.12
= control target key start
LH: loop header
LB: loop body
LE: loop exit
PB: predicated region body
PF: predicated region fallthrough
CT: control target
= control target key end

     0   :  { %v1595_v0 = vmov 0   ;;  %vm450_vm0 = vcmask 154624   ;;  %vm547_vm1 = vcmask 1040384   ;;  %vm548_vm2 = vcmask 1041408   ;;  %s2196_s1 = inlined_call_operand.vmem [shape: bf16[147,64], index: 1, kind: input, shape index: {}]   ;;  %s2197_s0 = inlined_call_operand.vmem [shape: bf16[512,147], index: 0, kind: input, shape index: {}]   ;;  %s2198_s2 = inlined_call_operand.vmem [shape: f32[1,64], index: 2, kind: input, shape index: {}]   ;;  %s2199_s3 = inlined_call_operand.vmem [shape: bf16[512,64], index: 3, kind: output, shape index: {}]  }
   0x1   :  { %554 = vmatprep.subr.bf16.mxu0 %v1595_v0  ;;  %1467 = vmatprep.subr.bf16.mxu1 %v1595_v0  ;;  %v1489_v1 = vld [vmem:[%s2196_s1 + $0x38] sm:$0xff]   ;;  %v1490_v2 = vld [vmem:[%s2196_s1 + $0x30] sm:$0xff]   ;;  %v1491_v3 = vld [vmem:[%s2196_s1 + $0x28] sm:$0xff]   ;;  %v1596_v10 = vmov 65535   ;;  %vm1163_vm3 = vcmask 519168  }
   0x2   :  { %555 = vmatpush1.bf16.msra.mxu0 %v1489_v1  ;;  %1477 = vmatpush1.bf16.msra.mxu1 %v1489_v1  ;;  %v1492_v4 = vld [vmem:[%s2196_s1 + $0x20] sm:$0xff]   ;;  %v1493_v7 = vld [vmem:[%s2196_s1 + $0x18] sm:$0xff]   ;;  %v1494_v8 = vld [vmem:[%s2196_s1 + $0x10] sm:$0xff]   ;;  %v549_v11 = vsel %vm547_vm1, 4294967295, %v1596_v10 }
   0x3   :  { %556 = vmatprep.subr.bf16.mxu0 %v1595_v0  ;;  %1468 = vmatprep.subr.bf16.mxu1 %v1595_v0  ;;  %v1501_v5 = vld [vmem:[%s2197_s0 + $0x4] ss:$8 sps:$4 sm:$0xff]   ;;  %v1497_v13 = vld [vmem:[%s2196_s1 + $0x48] ss:$0 sps:$4 sm:$0x33]   ;;  %v550_v14 = vsel %vm548_vm2, %v549_v11, 0 }
   0x4   :  { %1307 = vmatprep.mubr.msk.bf16.mxu0 %vm450_vm0, %v1501_v5  ;;  %v1504_v6 = vld [vmem:[%s2197_s0 + $0x104] ss:$8 sps:$4 sm:$0xff]   ;;  %v552_v15 = vand.u32 %v1497_v13, %v550_v14  ;;  %v1499_v17 = vld [vmem:[%s2197_s0] ss:$8 sps:$4 sm:$0xff]   ;;  %v1505_v19 = vld [vmem:[%s2197_s0 + $0x14] ss:$8 sps:$4 sm:$0xff]  }
   0x5   :  { %1323 = vmatprep.mubr.msk.bf16.mxu1 %vm450_vm0, %v1504_v6  ;;  %v1495_v9 = vld [vmem:[%s2196_s1 + $0x8] sm:$0xff]   ;;  %v1496_v12 = vld [vmem:[%s2196_s1] sm:$0xff]   ;;  %v1507_v20 = vld [vmem:[%s2197_s0 + $0x114] ss:$8 sps:$4 sm:$0xff]  }
   0x6   :  { %557 = vmatpush1.bf16.msra.mxu0 %v1490_v2  ;;  %1478 = vmatpush1.bf16.msra.mxu1 %v1490_v2  ;;  %v1498_v16 = vld [vmem:[%s2196_s1 + $0x40] sm:$0xff]   ;;  %v1509_v21 = vld [vmem:[%s2197_s0 + $0x10] ss:$8 sps:$4 sm:$0xff]   ;;  %v1517_v27 = vld [vmem:[%s2197_s0 + $0x34] ss:$8 sps:$4 sm:$0xff]  }
   0x7   :  { %558 = vmatprep.subr.bf16.mxu0 %v1595_v0  ;;  %1469 = vmatprep.subr.bf16.mxu1 %v1595_v0  ;;  %v1502_v18 = vld [vmem:[%s2197_s0 + $0x100] ss:$8 sps:$4 sm:$0xff]   ;;  %v1510_v22 = vld [vmem:[%s2197_s0 + $0x110] ss:$8 sps:$4 sm:$0xff]   ;;  %v1511_v23 = vld [vmem:[%s2197_s0 + $0x24] ss:$8 sps:$4 sm:$0xff]  }
   0x8   :  { %v1513_v24 = vld [vmem:[%s2197_s0 + $0x124] ss:$8 sps:$4 sm:$0xff]   ;;  %v1515_v25 = vld [vmem:[%s2197_s0 + $0x20] ss:$8 sps:$4 sm:$0xff]   ;;  %v1519_v28 = vld [vmem:[%s2197_s0 + $0x134] ss:$8 sps:$4 sm:$0xff]  }
   0x9   :  { %v1516_v26 = vld [vmem:[%s2197_s0 + $0x120] ss:$8 sps:$4 sm:$0xff]   ;;  %v1521_v29 = vld [vmem:[%s2197_s0 + $0x30] ss:$8 sps:$4 sm:$0xff]   ;;  %v1523_v31 = vld [vmem:[%s2197_s0 + $0x44] ss:$8 sps:$4 sm:$0xff]  }
   0xa   :  { %559 = vmatpush1.bf16.msra.mxu0 %v1491_v3  ;;  %1479 = vmatpush1.bf16.msra.mxu1 %v1491_v3  ;;  %v1522_v30 = vld [vmem:[%s2197_s0 + $0x130] ss:$8 sps:$4 sm:$0xff]   ;;  %v1525_v32 = vld [vmem:[%s2197_s0 + $0x144] ss:$8 sps:$4 sm:$0xff]   ;;  %v1527_v33 = vld [vmem:[%s2197_s0 + $0x40] ss:$8 sps:$4 sm:$0xff]  }
   0xb   :  { %560 = vmatprep.subr.bf16.mxu0 %v1595_v0  ;;  %1470 = vmatprep.subr.bf16.mxu1 %v1595_v0  ;;  %v1528_v34 = vld [vmem:[%s2197_s0 + $0x140] ss:$8 sps:$4 sm:$0xff]   ;;  %v1529_v35 = vld [vmem:[%s2197_s0 + $0x54] ss:$8 sps:$4 sm:$0xff]   ;;  %v1533_v37 = vld [vmem:[%s2197_s0 + $0x50] ss:$8 sps:$4 sm:$0xff]  }
   0xc   :  { %v1531_v36 = vld [vmem:[%s2197_s0 + $0x154] ss:$8 sps:$4 sm:$0xff]   ;;  %v1534_v38 = vld [vmem:[%s2197_s0 + $0x150] ss:$8 sps:$4 sm:$0xff]   ;;  %v1535_v39 = vld [vmem:[%s2197_s0 + $0x64] ss:$8 sps:$4 sm:$0xff]  }
   0xd   :  { %v1537_v40 = vld [vmem:[%s2197_s0 + $0x164] ss:$8 sps:$4 sm:$0xff]   ;;  %v1539_v41 = vld [vmem:[%s2197_s0 + $0x60] ss:$8 sps:$4 sm:$0xff]   ;;  %v1541_v43 = vld [vmem:[%s2197_s0 + $0x74] ss:$8 sps:$4 sm:$0xff]  }
   0xe   :  { %561 = vmatpush1.bf16.msra.mxu0 %v1492_v4  ;;  %1480 = vmatpush1.bf16.msra.mxu1 %v1492_v4  ;;  %v1540_v42 = vld [vmem:[%s2197_s0 + $0x160] ss:$8 sps:$4 sm:$0xff]   ;;  %v1543_v44 = vld [vmem:[%s2197_s0 + $0x174] ss:$8 sps:$4 sm:$0xff]   ;;  %v1545_v45 = vld [vmem:[%s2197_s0 + $0x70] ss:$8 sps:$4 sm:$0xff]  }
   0xf   :  { %562 = vmatprep.subr.bf16.mxu0 %v1595_v0  ;;  %1471 = vmatprep.subr.bf16.mxu1 %v1595_v0  ;;  %v1546_v46 = vld [vmem:[%s2197_s0 + $0x170] ss:$8 sps:$4 sm:$0xff]   ;;  %v1547_v47 = vld [vmem:[%s2197_s0 + $0x84] ss:$8 sps:$4 sm:$0xff]   ;;  %v1551_v49 = vld [vmem:[%s2197_s0 + $0x80] ss:$8 sps:$4 sm:$0xff]  }
  0x10   :  { %v1549_v48 = vld [vmem:[%s2197_s0 + $0x184] ss:$8 sps:$4 sm:$0xff]   ;;  %v1552_v50 = vld [vmem:[%s2197_s0 + $0x180] ss:$8 sps:$4 sm:$0xff]   ;;  %v1553_v51 = vld [vmem:[%s2197_s0 + $0x94] ss:$8 sps:$4 sm:$0xff]  }
  0x11   :  { %v1555_v52 = vld [vmem:[%s2197_s0 + $0x194] ss:$8 sps:$4 sm:$0xff]   ;;  %v1557_v53 = vld [vmem:[%s2197_s0 + $0x90] ss:$8 sps:$4 sm:$0xff]   ;;  %v1559_v55 = vld [vmem:[%s2197_s0 + $0xa4] ss:$8 sps:$4 sm:$0xff]  }
  0x12   :  { %563 = vmatpush1.bf16.msra.mxu0 %v1493_v7  ;;  %1481 = vmatpush1.bf16.msra.mxu1 %v1493_v7  ;;  %v1558_v54 = vld [vmem:[%s2197_s0 + $0x190] ss:$8 sps:$4 sm:$0xff]   ;;  %v1561_v56 = vld [vmem:[%s2197_s0 + $0x1a4] ss:$8 sps:$4 sm:$0xff]   ;;  %v1563_v57 = vld [vmem:[%s2197_s0 + $0xa0] ss:$8 sps:$4 sm:$0xff]  }
  0x13   :  { %564 = vmatprep.subr.bf16.mxu0 %v1595_v0  ;;  %1472 = vmatprep.subr.bf16.mxu1 %v1595_v0  ;;  %v1564_v58 = vld [vmem:[%s2197_s0 + $0x1a0] ss:$8 sps:$4 sm:$0xff]   ;;  %v1565_v59 = vld [vmem:[%s2197_s0 + $0xb4] ss:$8 sps:$4 sm:$0xff]   ;;  %v1569_v61 = vld [vmem:[%s2197_s0 + $0xb0] ss:$8 sps:$4 sm:$0xff]  }
  0x14   :  { %v1567_v60 = vld [vmem:[%s2197_s0 + $0x1b4] ss:$8 sps:$4 sm:$0xff]   ;;  %v1570_v62 = vld [vmem:[%s2197_s0 + $0x1b0] ss:$8 sps:$4 sm:$0xff]   ;;  %v1571_v63 = vld [vmem:[%s2197_s0 + $0xc4] ss:$8 sps:$4 sm:$0xff]  }
  0x15   :  { %v1575_v1 = vld [vmem:[%s2197_s0 + $0xc0] ss:$8 sps:$4 sm:$0xff]   ;;  %v1577_v3 = vld [vmem:[%s2197_s0 + $0xd4] ss:$8 sps:$4 sm:$0xff]   ;;  %v1581_v5 = vld [vmem:[%s2197_s0 + $0xd0] ss:$8 sps:$4 sm:$0xff]  }
  0x16   :  { %565 = vmatpush1.bf16.msra.mxu0 %v1494_v8  ;;  %1482 = vmatpush1.bf16.msra.mxu1 %v1494_v8  ;;  %v1576_v2 = vld [vmem:[%s2197_s0 + $0x1c0] ss:$8 sps:$4 sm:$0xff]   ;;  %v1579_v4 = vld [vmem:[%s2197_s0 + $0x1d4] ss:$8 sps:$4 sm:$0xff]   ;;  %v1582_v6 = vld [vmem:[%s2197_s0 + $0x1d0] ss:$8 sps:$4 sm:$0xff]  }
  0x17   :  { %566 = vmatprep.subr.bf16.mxu0 %v1595_v0  ;;  %1473 = vmatprep.subr.bf16.mxu1 %v1595_v0  ;;  %v1583_v7 = vld [vmem:[%s2197_s0 + $0xe4] ss:$8 sps:$4 sm:$0xff]   ;;  %v1588_v10 = vld [vmem:[%s2197_s0 + $0x1e0] ss:$8 sps:$4 sm:$0xff]   ;;  %v1589_v11 = vld [vmem:[%s2197_s0 + $0xf4] ss:$8 sps:$4 sm:$0xff]  }
  0x18   :  { %v1585_v8 = vld [vmem:[%s2197_s0 + $0x1e4] ss:$8 sps:$4 sm:$0xff]   ;;  %v1593_v13 = vld [vmem:[%s2197_s0 + $0xf0] ss:$8 sps:$4 sm:$0xff]  }
  0x19   :  { %v1594_v14 = vld [vmem:[%s2197_s0 + $0x1f0] ss:$8 sps:$4 sm:$0xff]  }
  0x1a   :  { %567 = vmatpush1.bf16.msra.mxu0 %v1495_v9  ;;  %1483 = vmatpush1.bf16.msra.mxu1 %v1495_v9  ;;  %v1587_v9 = vld [vmem:[%s2197_s0 + $0xe0] ss:$8 sps:$4 sm:$0xff]  }
  0x1b   :  { %568 = vmatprep.subr.bf16.mxu0 %v1595_v0  ;;  %1474 = vmatprep.subr.bf16.mxu1 %v1595_v0 }
  0x1e   :  { %569 = vmatpush1.bf16.msra.mxu0 %v1496_v12  ;;  %1484 = vmatpush1.bf16.msra.mxu1 %v1496_v12  ;;  %v1591_v12 = vld [vmem:[%s2197_s0 + $0x1f4] ss:$8 sps:$4 sm:$0xff]  }
  0x1f   :  { %582 = vmatprep.subr.bf16.mxu0 %v1595_v0  ;;  %1475 = vmatprep.subr.bf16.mxu1 %v1595_v0 }
  0x22   :  { %583 = vmatpush2.bf16.msra.mxu0 %v552_v15  ;;  %1485 = vmatpush2.bf16.msra.mxu1 %v552_v15  ;;  %v1874_v15 = vld [vmem:[%s2198_s2] ss:$0 sm:$0xff] }
  0x23   :  { %584 = vmatprep.subr.bf16.mxu0 %v1595_v0  ;;  %1476 = vmatprep.subr.bf16.mxu1 %v1595_v0  ;;  %v1573_v0 = vld [vmem:[%s2197_s0 + $0x1c4] ss:$8 sps:$4 sm:$0xff]  }
  0x26   :  { %585 = vmatpush2.bf16.msra.mxu0 %v1498_v16  ;;  %1486 = vmatpush2.bf16.msra.mxu1 %v1498_v16 }
  0x29   :  { %587 = vmatmul.mubr.bf16.vlgmr.msra.gmra.mxu0 %v1499_v17  ;;  %715 = vmatmul.mubr.bf16.vlgmr.msra.gmra.mxu1 %v1502_v18 }
  0x2a   :  { %1308 = vmatprep.mubr.msk.bf16.mxu0 %vm450_vm0, %v1505_v19  ;;  %1324 = vmatprep.mubr.msk.bf16.mxu1 %vm450_vm0, %v1507_v20 }
  0x31   :  { %595 = vmatmul.mubr.bf16.gmra.mxu0 %v1509_v21  ;;  %723 = vmatmul.mubr.bf16.gmra.mxu1 %v1510_v22 }
  0x32   :  { %1309 = vmatprep.mubr.msk.bf16.mxu0 %vm450_vm0, %v1511_v23  ;;  %1325 = vmatprep.mubr.msk.bf16.mxu1 %vm450_vm0, %v1513_v24 }
  0x39   :  { %603 = vmatmul.mubr.bf16.gmra.mxu0 %v1515_v25  ;;  %731 = vmatmul.mubr.bf16.gmra.mxu1 %v1516_v26 }
  0x3a   :  { %1310 = vmatprep.mubr.msk.bf16.mxu0 %vm450_vm0, %v1517_v27  ;;  %1326 = vmatprep.mubr.msk.bf16.mxu1 %vm450_vm0, %v1519_v28 }
  0x41   :  { %611 = vmatmul.mubr.bf16.gmra.mxu0 %v1521_v29  ;;  %739 = vmatmul.mubr.bf16.gmra.mxu1 %v1522_v30 }
  0x42   :  { %1311 = vmatprep.mubr.msk.bf16.mxu0 %vm450_vm0, %v1523_v31  ;;  %1327 = vmatprep.mubr.msk.bf16.mxu1 %vm450_vm0, %v1525_v32 }
  0x49   :  { %619 = vmatmul.mubr.bf16.gmra.mxu0 %v1527_v33  ;;  %747 = vmatmul.mubr.bf16.gmra.mxu1 %v1528_v34 }
  0x4a   :  { %1312 = vmatprep.mubr.msk.bf16.mxu0 %vm450_vm0, %v1529_v35  ;;  %1328 = vmatprep.mubr.msk.bf16.mxu1 %vm450_vm0, %v1531_v36 }
  0x51   :  { %627 = vmatmul.mubr.bf16.gmra.mxu0 %v1533_v37  ;;  %755 = vmatmul.mubr.bf16.gmra.mxu1 %v1534_v38 }
  0x52   :  { %1313 = vmatprep.mubr.msk.bf16.mxu0 %vm450_vm0, %v1535_v39  ;;  %1329 = vmatprep.mubr.msk.bf16.mxu1 %vm450_vm0, %v1537_v40 }
  0x59   :  { %635 = vmatmul.mubr.bf16.gmra.mxu0 %v1539_v41  ;;  %763 = vmatmul.mubr.bf16.gmra.mxu1 %v1540_v42 }
  0x5a   :  { %1314 = vmatprep.mubr.msk.bf16.mxu0 %vm450_vm0, %v1541_v43  ;;  %1330 = vmatprep.mubr.msk.bf16.mxu1 %vm450_vm0, %v1543_v44 }
  0x61   :  { %643 = vmatmul.mubr.bf16.gmra.mxu0 %v1545_v45  ;;  %771 = vmatmul.mubr.bf16.gmra.mxu1 %v1546_v46 }
  0x62   :  { %1315 = vmatprep.mubr.msk.bf16.mxu0 %vm450_vm0, %v1547_v47  ;;  %1331 = vmatprep.mubr.msk.bf16.mxu1 %vm450_vm0, %v1549_v48 }
  0x69   :  { %651 = vmatmul.mubr.bf16.gmra.mxu0 %v1551_v49  ;;  %779 = vmatmul.mubr.bf16.gmra.mxu1 %v1552_v50 }
  0x6a   :  { %1316 = vmatprep.mubr.msk.bf16.mxu0 %vm450_vm0, %v1553_v51  ;;  %1332 = vmatprep.mubr.msk.bf16.mxu1 %vm450_vm0, %v1555_v52 }
  0x71   :  { %659 = vmatmul.mubr.bf16.gmra.mxu0 %v1557_v53  ;;  %787 = vmatmul.mubr.bf16.gmra.mxu1 %v1558_v54 }
  0x72   :  { %1317 = vmatprep.mubr.msk.bf16.mxu0 %vm450_vm0, %v1559_v55  ;;  %1333 = vmatprep.mubr.msk.bf16.mxu1 %vm450_vm0, %v1561_v56 }
  0x79   :  { %667 = vmatmul.mubr.bf16.gmra.mxu0 %v1563_v57  ;;  %795 = vmatmul.mubr.bf16.gmra.mxu1 %v1564_v58 }
  0x7a   :  { %1318 = vmatprep.mubr.msk.bf16.mxu0 %vm450_vm0, %v1565_v59  ;;  %1334 = vmatprep.mubr.msk.bf16.mxu1 %vm450_vm0, %v1567_v60 }
  0x81   :  { %675 = vmatmul.mubr.bf16.gmra.mxu0 %v1569_v61  ;;  %803 = vmatmul.mubr.bf16.gmra.mxu1 %v1570_v62 }
  0x82   :  { %1319 = vmatprep.mubr.msk.bf16.mxu0 %vm450_vm0, %v1571_v63  ;;  %1335 = vmatprep.mubr.msk.bf16.mxu1 %vm450_vm0, %v1573_v0 }
  0x89   :  { %683 = vmatmul.mubr.bf16.gmra.mxu0 %v1575_v1  ;;  %811 = vmatmul.mubr.bf16.gmra.mxu1 %v1576_v2 }
  0x8a   :  { %1320 = vmatprep.mubr.msk.bf16.mxu0 %vm450_vm0, %v1577_v3  ;;  %1336 = vmatprep.mubr.msk.bf16.mxu1 %vm450_vm0, %v1579_v4 }
  0x91   :  { %691 = vmatmul.mubr.bf16.gmra.mxu0 %v1581_v5  ;;  %819 = vmatmul.mubr.bf16.gmra.mxu1 %v1582_v6 }
  0x92   :  { %1321 = vmatprep.mubr.msk.bf16.mxu0 %vm450_vm0, %v1583_v7  ;;  %1337 = vmatprep.mubr.msk.bf16.mxu1 %vm450_vm0, %v1585_v8 }
  0x99   :  { %699 = vmatmul.mubr.bf16.gmra.mxu0 %v1587_v9  ;;  %827 = vmatmul.mubr.bf16.gmra.mxu1 %v1588_v10 }
  0x9a   :  { %1322 = vmatprep.mubr.msk.bf16.mxu0 %vm450_vm0, %v1589_v11  ;;  %1338 = vmatprep.mubr.msk.bf16.mxu1 %vm450_vm0, %v1591_v12 }
  0xa1   :  { %707 = vmatmul.mubr.bf16.gmra.mxu0 %v1593_v13  ;;  %835 = vmatmul.mubr.bf16.gmra.mxu1 %v1594_v14 }
  0xe9   :  { %v588_v16 = vpop.f32.mrf.mxu0  ;;  %v716_v17 = vpop.f32.mrf.mxu1 }
  0xea   :  { %v589_v18 = vadd.f32 %v1874_v15, %v588_v16  ;;  %v717_v19 = vadd.f32 %v1874_v15, %v716_v17 }
  0xeb   :  { %v590_v20 = vpop.f32.mrf.mxu0  ;;  %v718_v21 = vpop.f32.mrf.mxu1 }
  0xec   :  { %v843_v22 = vmax.f32 %v589_v18, 0.0  ;;  %v875_v23 = vmax.f32 %v717_v19, 0.0 }
  0xed   :  { %v591_v24 = vpop.f32.mrf.mxu0  ;;  %v719_v25 = vpop.f32.mrf.mxu1 }
  0xee   :  { %v1403_v26 = vpack.c.bf16 %v843_v22, %v843_v22  ;;  %v1435_v27 = vpack.c.bf16 %v875_v23, %v875_v23  ;;  %v592_v28 = vadd.f32 %v1874_v15, %v591_v24  ;;  %v720_v29 = vadd.f32 %v1874_v15, %v719_v25 }
  0xef   :  { %v593_v30 = vpop.f32.mrf.mxu0  ;;  %v721_v31 = vpop.f32.mrf.mxu1 }
  0xf0   :  { %1164 = vst.msk [vmem:[%s2199_s3] sm:$0xf] %vm1163_vm3, %v1403_v26  ;;  %1196 = vst.msk [vmem:[%s2199_s3 + $0x80] sm:$0xf] %vm1163_vm3, %v1435_v27  ;;  %v844_v32 = vmax.f32 %v592_v28, 0.0  ;;  %v876_v33 = vmax.f32 %v720_v29, 0.0 }
  0xf1   :  { %v596_v34 = vpop.f32.mrf.mxu0  ;;  %v724_v35 = vpop.f32.mrf.mxu1 }
  0xf2   :  { %v1404_v36 = vpack.c.bf16 %v844_v32, %v844_v32  ;;  %v1436_v37 = vpack.c.bf16 %v876_v33, %v876_v33  ;;  %v597_v38 = vadd.f32 %v1874_v15, %v596_v34  ;;  %v725_v39 = vadd.f32 %v1874_v15, %v724_v35 }
  0xf3   :  { %v598_v40 = vpop.f32.mrf.mxu0  ;;  %v726_v41 = vpop.f32.mrf.mxu1 }
  0xf4   :  { %1165 = vst.msk [vmem:[%s2199_s3 + $0x4] sm:$0xf] %vm1163_vm3, %v1404_v36  ;;  %1197 = vst.msk [vmem:[%s2199_s3 + $0x84] sm:$0xf] %vm1163_vm3, %v1436_v37  ;;  %v845_v42 = vmax.f32 %v597_v38, 0.0  ;;  %v877_v43 = vmax.f32 %v725_v39, 0.0 }
  0xf5   :  { %v599_v44 = vpop.f32.mrf.mxu0  ;;  %v727_v45 = vpop.f32.mrf.mxu1 }
  0xf6   :  { %v1405_v46 = vpack.c.bf16 %v845_v42, %v845_v42  ;;  %v1437_v47 = vpack.c.bf16 %v877_v43, %v877_v43  ;;  %v600_v48 = vadd.f32 %v1874_v15, %v599_v44  ;;  %v728_v49 = vadd.f32 %v1874_v15, %v727_v45 }
  0xf7   :  { %v601_v50 = vpop.f32.mrf.mxu0  ;;  %v729_v51 = vpop.f32.mrf.mxu1 }
  0xf8   :  { %1166 = vst.msk [vmem:[%s2199_s3 + $0x8] sm:$0xf] %vm1163_vm3, %v1405_v46  ;;  %1198 = vst.msk [vmem:[%s2199_s3 + $0x88] sm:$0xf] %vm1163_vm3, %v1437_v47  ;;  %v846_v52 = vmax.f32 %v600_v48, 0.0  ;;  %v878_v53 = vmax.f32 %v728_v49, 0.0 }
  0xf9   :  { %v604_v54 = vpop.f32.mrf.mxu0  ;;  %v732_v55 = vpop.f32.mrf.mxu1 }
  0xfa   :  { %v1406_v56 = vpack.c.bf16 %v846_v52, %v846_v52  ;;  %v1438_v57 = vpack.c.bf16 %v878_v53, %v878_v53  ;;  %v605_v58 = vadd.f32 %v1874_v15, %v604_v54  ;;  %v733_v59 = vadd.f32 %v1874_v15, %v732_v55 }
  0xfb   :  { %v606_v60 = vpop.f32.mrf.mxu0  ;;  %v734_v61 = vpop.f32.mrf.mxu1 }
  0xfc   :  { %1167 = vst.msk [vmem:[%s2199_s3 + $0xc] sm:$0xf] %vm1163_vm3, %v1406_v56  ;;  %1199 = vst.msk [vmem:[%s2199_s3 + $0x8c] sm:$0xf] %vm1163_vm3, %v1438_v57  ;;  %v847_v62 = vmax.f32 %v605_v58, 0.0  ;;  %v879_v63 = vmax.f32 %v733_v59, 0.0 }
  0xfd   :  { %v607_v0 = vpop.f32.mrf.mxu0  ;;  %v735_v1 = vpop.f32.mrf.mxu1 }
  0xfe   :  { %v1407_v2 = vpack.c.bf16 %v847_v62, %v847_v62  ;;  %v1439_v3 = vpack.c.bf16 %v879_v63, %v879_v63  ;;  %v608_v4 = vadd.f32 %v1874_v15, %v607_v0  ;;  %v736_v5 = vadd.f32 %v1874_v15, %v735_v1 }
  0xff   :  { %v609_v6 = vpop.f32.mrf.mxu0  ;;  %v737_v7 = vpop.f32.mrf.mxu1 }
 0x100   :  { %1168 = vst.msk [vmem:[%s2199_s3 + $0x10] sm:$0xf] %vm1163_vm3, %v1407_v2  ;;  %1200 = vst.msk [vmem:[%s2199_s3 + $0x90] sm:$0xf] %vm1163_vm3, %v1439_v3  ;;  %v848_v8 = vmax.f32 %v608_v4, 0.0  ;;  %v880_v9 = vmax.f32 %v736_v5, 0.0 }
 0x101   :  { %v612_v10 = vpop.f32.mrf.mxu0  ;;  %v740_v11 = vpop.f32.mrf.mxu1 }
 0x102   :  { %v1408_v12 = vpack.c.bf16 %v848_v8, %v848_v8  ;;  %v1440_v13 = vpack.c.bf16 %v880_v9, %v880_v9  ;;  %v613_v14 = vadd.f32 %v1874_v15, %v612_v10  ;;  %v741_v16 = vadd.f32 %v1874_v15, %v740_v11 }
 0x103   :  { %v614_v17 = vpop.f32.mrf.mxu0  ;;  %v742_v18 = vpop.f32.mrf.mxu1 }
 0x104   :  { %1169 = vst.msk [vmem:[%s2199_s3 + $0x14] sm:$0xf] %vm1163_vm3, %v1408_v12  ;;  %1201 = vst.msk [vmem:[%s2199_s3 + $0x94] sm:$0xf] %vm1163_vm3, %v1440_v13  ;;  %v849_v19 = vmax.f32 %v613_v14, 0.0  ;;  %v881_v20 = vmax.f32 %v741_v16, 0.0 }
 0x105   :  { %v615_v21 = vpop.f32.mrf.mxu0  ;;  %v743_v22 = vpop.f32.mrf.mxu1 }
 0x106   :  { %v1409_v23 = vpack.c.bf16 %v849_v19, %v849_v19  ;;  %v1441_v24 = vpack.c.bf16 %v881_v20, %v881_v20  ;;  %v616_v25 = vadd.f32 %v1874_v15, %v615_v21  ;;  %v744_v26 = vadd.f32 %v1874_v15, %v743_v22 }
 0x107   :  { %v617_v27 = vpop.f32.mrf.mxu0  ;;  %v745_v28 = vpop.f32.mrf.mxu1 }
 0x108   :  { %1170 = vst.msk [vmem:[%s2199_s3 + $0x18] sm:$0xf] %vm1163_vm3, %v1409_v23  ;;  %1202 = vst.msk [vmem:[%s2199_s3 + $0x98] sm:$0xf] %vm1163_vm3, %v1441_v24  ;;  %v850_v29 = vmax.f32 %v616_v25, 0.0  ;;  %v882_v30 = vmax.f32 %v744_v26, 0.0 }
 0x109   :  { %v620_v31 = vpop.f32.mrf.mxu0  ;;  %v748_v32 = vpop.f32.mrf.mxu1 }
 0x10a   :  { %v1410_v33 = vpack.c.bf16 %v850_v29, %v850_v29  ;;  %v1442_v34 = vpack.c.bf16 %v882_v30, %v882_v30  ;;  %v621_v35 = vadd.f32 %v1874_v15, %v620_v31  ;;  %v749_v36 = vadd.f32 %v1874_v15, %v748_v32 }
 0x10b   :  { %v622_v37 = vpop.f32.mrf.mxu0  ;;  %v750_v38 = vpop.f32.mrf.mxu1 }
 0x10c   :  { %1171 = vst.msk [vmem:[%s2199_s3 + $0x1c] sm:$0xf] %vm1163_vm3, %v1410_v33  ;;  %1203 = vst.msk [vmem:[%s2199_s3 + $0x9c] sm:$0xf] %vm1163_vm3, %v1442_v34  ;;  %v851_v39 = vmax.f32 %v621_v35, 0.0  ;;  %v883_v40 = vmax.f32 %v749_v36, 0.0 }
 0x10d   :  { %v623_v41 = vpop.f32.mrf.mxu0  ;;  %v751_v42 = vpop.f32.mrf.mxu1 }
 0x10e   :  { %v1411_v43 = vpack.c.bf16 %v851_v39, %v851_v39  ;;  %v1443_v44 = vpack.c.bf16 %v883_v40, %v883_v40  ;;  %v624_v45 = vadd.f32 %v1874_v15, %v623_v41  ;;  %v752_v46 = vadd.f32 %v1874_v15, %v751_v42 }
 0x10f   :  { %v625_v47 = vpop.f32.mrf.mxu0  ;;  %v753_v48 = vpop.f32.mrf.mxu1 }
 0x110   :  { %1172 = vst.msk [vmem:[%s2199_s3 + $0x20] sm:$0xf] %vm1163_vm3, %v1411_v43  ;;  %1204 = vst.msk [vmem:[%s2199_s3 + $0xa0] sm:$0xf] %vm1163_vm3, %v1443_v44  ;;  %v852_v49 = vmax.f32 %v624_v45, 0.0  ;;  %v884_v50 = vmax.f32 %v752_v46, 0.0 }
 0x111   :  { %v628_v51 = vpop.f32.mrf.mxu0  ;;  %v756_v52 = vpop.f32.mrf.mxu1 }
 0x112   :  { %v1412_v53 = vpack.c.bf16 %v852_v49, %v852_v49  ;;  %v1444_v54 = vpack.c.bf16 %v884_v50, %v884_v50  ;;  %v629_v55 = vadd.f32 %v1874_v15, %v628_v51  ;;  %v757_v56 = vadd.f32 %v1874_v15, %v756_v52 }
 0x113   :  { %v630_v57 = vpop.f32.mrf.mxu0  ;;  %v758_v58 = vpop.f32.mrf.mxu1 }
 0x114   :  { %1173 = vst.msk [vmem:[%s2199_s3 + $0x24] sm:$0xf] %vm1163_vm3, %v1412_v53  ;;  %1205 = vst.msk [vmem:[%s2199_s3 + $0xa4] sm:$0xf] %vm1163_vm3, %v1444_v54  ;;  %v853_v59 = vmax.f32 %v629_v55, 0.0  ;;  %v885_v60 = vmax.f32 %v757_v56, 0.0 }
 0x115   :  { %v631_v61 = vpop.f32.mrf.mxu0  ;;  %v759_v62 = vpop.f32.mrf.mxu1 }
 0x116   :  { %v1413_v63 = vpack.c.bf16 %v853_v59, %v853_v59  ;;  %v1445_v0 = vpack.c.bf16 %v885_v60, %v885_v60  ;;  %v632_v1 = vadd.f32 %v1874_v15, %v631_v61  ;;  %v760_v2 = vadd.f32 %v1874_v15, %v759_v62 }
 0x117   :  { %v633_v3 = vpop.f32.mrf.mxu0  ;;  %v761_v4 = vpop.f32.mrf.mxu1 }
 0x118   :  { %1174 = vst.msk [vmem:[%s2199_s3 + $0x28] sm:$0xf] %vm1163_vm3, %v1413_v63  ;;  %1206 = vst.msk [vmem:[%s2199_s3 + $0xa8] sm:$0xf] %vm1163_vm3, %v1445_v0  ;;  %v854_v5 = vmax.f32 %v632_v1, 0.0  ;;  %v886_v6 = vmax.f32 %v760_v2, 0.0 }
 0x119   :  { %v636_v7 = vpop.f32.mrf.mxu0  ;;  %v764_v8 = vpop.f32.mrf.mxu1 }
 0x11a   :  { %v1414_v9 = vpack.c.bf16 %v854_v5, %v854_v5  ;;  %v1446_v10 = vpack.c.bf16 %v886_v6, %v886_v6  ;;  %v637_v11 = vadd.f32 %v1874_v15, %v636_v7  ;;  %v765_v12 = vadd.f32 %v1874_v15, %v764_v8 }
 0x11b   :  { %v638_v13 = vpop.f32.mrf.mxu0  ;;  %v766_v14 = vpop.f32.mrf.mxu1 }
 0x11c   :  { %1175 = vst.msk [vmem:[%s2199_s3 + $0x2c] sm:$0xf] %vm1163_vm3, %v1414_v9  ;;  %1207 = vst.msk [vmem:[%s2199_s3 + $0xac] sm:$0xf] %vm1163_vm3, %v1446_v10  ;;  %v855_v16 = vmax.f32 %v637_v11, 0.0  ;;  %v887_v17 = vmax.f32 %v765_v12, 0.0 }
 0x11d   :  { %v639_v18 = vpop.f32.mrf.mxu0  ;;  %v767_v19 = vpop.f32.mrf.mxu1 }
 0x11e   :  { %v1415_v20 = vpack.c.bf16 %v855_v16, %v855_v16  ;;  %v1447_v21 = vpack.c.bf16 %v887_v17, %v887_v17  ;;  %v640_v22 = vadd.f32 %v1874_v15, %v639_v18  ;;  %v768_v23 = vadd.f32 %v1874_v15, %v767_v19 }
 0x11f   :  { %v641_v24 = vpop.f32.mrf.mxu0  ;;  %v769_v25 = vpop.f32.mrf.mxu1 }
 0x120   :  { %1176 = vst.msk [vmem:[%s2199_s3 + $0x30] sm:$0xf] %vm1163_vm3, %v1415_v20  ;;  %1208 = vst.msk [vmem:[%s2199_s3 + $0xb0] sm:$0xf] %vm1163_vm3, %v1447_v21  ;;  %v856_v26 = vmax.f32 %v640_v22, 0.0  ;;  %v888_v27 = vmax.f32 %v768_v23, 0.0 }
 0x121   :  { %v644_v28 = vpop.f32.mrf.mxu0  ;;  %v772_v29 = vpop.f32.mrf.mxu1 }
 0x122   :  { %v1416_v30 = vpack.c.bf16 %v856_v26, %v856_v26  ;;  %v1448_v31 = vpack.c.bf16 %v888_v27, %v888_v27  ;;  %v645_v32 = vadd.f32 %v1874_v15, %v644_v28  ;;  %v773_v33 = vadd.f32 %v1874_v15, %v772_v29 }
 0x123   :  { %v646_v34 = vpop.f32.mrf.mxu0  ;;  %v774_v35 = vpop.f32.mrf.mxu1 }
 0x124   :  { %1177 = vst.msk [vmem:[%s2199_s3 + $0x34] sm:$0xf] %vm1163_vm3, %v1416_v30  ;;  %1209 = vst.msk [vmem:[%s2199_s3 + $0xb4] sm:$0xf] %vm1163_vm3, %v1448_v31  ;;  %v857_v36 = vmax.f32 %v645_v32, 0.0  ;;  %v889_v37 = vmax.f32 %v773_v33, 0.0 }
 0x125   :  { %v647_v38 = vpop.f32.mrf.mxu0  ;;  %v775_v39 = vpop.f32.mrf.mxu1 }
 0x126   :  { %v1417_v40 = vpack.c.bf16 %v857_v36, %v857_v36  ;;  %v1449_v41 = vpack.c.bf16 %v889_v37, %v889_v37  ;;  %v648_v42 = vadd.f32 %v1874_v15, %v647_v38  ;;  %v776_v43 = vadd.f32 %v1874_v15, %v775_v39 }
 0x127   :  { %v649_v44 = vpop.f32.mrf.mxu0  ;;  %v777_v45 = vpop.f32.mrf.mxu1 }
 0x128   :  { %1178 = vst.msk [vmem:[%s2199_s3 + $0x38] sm:$0xf] %vm1163_vm3, %v1417_v40  ;;  %1210 = vst.msk [vmem:[%s2199_s3 + $0xb8] sm:$0xf] %vm1163_vm3, %v1449_v41  ;;  %v858_v46 = vmax.f32 %v648_v42, 0.0  ;;  %v890_v47 = vmax.f32 %v776_v43, 0.0 }
 0x129   :  { %v652_v48 = vpop.f32.mrf.mxu0  ;;  %v780_v49 = vpop.f32.mrf.mxu1 }
 0x12a   :  { %v1418_v50 = vpack.c.bf16 %v858_v46, %v858_v46  ;;  %v1450_v51 = vpack.c.bf16 %v890_v47, %v890_v47  ;;  %v653_v52 = vadd.f32 %v1874_v15, %v652_v48  ;;  %v781_v53 = vadd.f32 %v1874_v15, %v780_v49 }
 0x12b   :  { %v654_v54 = vpop.f32.mrf.mxu0  ;;  %v782_v55 = vpop.f32.mrf.mxu1 }
 0x12c   :  { %1179 = vst.msk [vmem:[%s2199_s3 + $0x3c] sm:$0xf] %vm1163_vm3, %v1418_v50  ;;  %1211 = vst.msk [vmem:[%s2199_s3 + $0xbc] sm:$0xf] %vm1163_vm3, %v1450_v51  ;;  %v859_v56 = vmax.f32 %v653_v52, 0.0  ;;  %v891_v57 = vmax.f32 %v781_v53, 0.0 }
 0x12d   :  { %v655_v58 = vpop.f32.mrf.mxu0  ;;  %v783_v59 = vpop.f32.mrf.mxu1 }
 0x12e   :  { %v1419_v60 = vpack.c.bf16 %v859_v56, %v859_v56  ;;  %v1451_v61 = vpack.c.bf16 %v891_v57, %v891_v57  ;;  %v656_v62 = vadd.f32 %v1874_v15, %v655_v58  ;;  %v784_v63 = vadd.f32 %v1874_v15, %v783_v59 }
 0x12f   :  { %v657_v0 = vpop.f32.mrf.mxu0  ;;  %v785_v1 = vpop.f32.mrf.mxu1 }
 0x130   :  { %1180 = vst.msk [vmem:[%s2199_s3 + $0x40] sm:$0xf] %vm1163_vm3, %v1419_v60  ;;  %1212 = vst.msk [vmem:[%s2199_s3 + $0xc0] sm:$0xf] %vm1163_vm3, %v1451_v61  ;;  %v860_v2 = vmax.f32 %v656_v62, 0.0  ;;  %v892_v3 = vmax.f32 %v784_v63, 0.0 }
 0x131   :  { %v660_v4 = vpop.f32.mrf.mxu0  ;;  %v788_v5 = vpop.f32.mrf.mxu1 }
 0x132   :  { %v1420_v6 = vpack.c.bf16 %v860_v2, %v860_v2  ;;  %v1452_v7 = vpack.c.bf16 %v892_v3, %v892_v3  ;;  %v661_v8 = vadd.f32 %v1874_v15, %v660_v4  ;;  %v789_v9 = vadd.f32 %v1874_v15, %v788_v5 }
 0x133   :  { %v662_v10 = vpop.f32.mrf.mxu0  ;;  %v790_v11 = vpop.f32.mrf.mxu1 }
 0x134   :  { %1181 = vst.msk [vmem:[%s2199_s3 + $0x44] sm:$0xf] %vm1163_vm3, %v1420_v6  ;;  %1213 = vst.msk [vmem:[%s2199_s3 + $0xc4] sm:$0xf] %vm1163_vm3, %v1452_v7  ;;  %v861_v12 = vmax.f32 %v661_v8, 0.0  ;;  %v893_v13 = vmax.f32 %v789_v9, 0.0 }
 0x135   :  { %v663_v14 = vpop.f32.mrf.mxu0  ;;  %v791_v16 = vpop.f32.mrf.mxu1 }
 0x136   :  { %v1421_v17 = vpack.c.bf16 %v861_v12, %v861_v12  ;;  %v1453_v18 = vpack.c.bf16 %v893_v13, %v893_v13  ;;  %v664_v19 = vadd.f32 %v1874_v15, %v663_v14  ;;  %v792_v20 = vadd.f32 %v1874_v15, %v791_v16 }
 0x137   :  { %v665_v21 = vpop.f32.mrf.mxu0  ;;  %v793_v22 = vpop.f32.mrf.mxu1 }
 0x138   :  { %1182 = vst.msk [vmem:[%s2199_s3 + $0x48] sm:$0xf] %vm1163_vm3, %v1421_v17  ;;  %1214 = vst.msk [vmem:[%s2199_s3 + $0xc8] sm:$0xf] %vm1163_vm3, %v1453_v18  ;;  %v862_v23 = vmax.f32 %v664_v19, 0.0  ;;  %v894_v24 = vmax.f32 %v792_v20, 0.0 }
 0x139   :  { %v668_v25 = vpop.f32.mrf.mxu0  ;;  %v796_v26 = vpop.f32.mrf.mxu1 }
 0x13a   :  { %v1422_v27 = vpack.c.bf16 %v862_v23, %v862_v23  ;;  %v1454_v28 = vpack.c.bf16 %v894_v24, %v894_v24  ;;  %v669_v29 = vadd.f32 %v1874_v15, %v668_v25  ;;  %v797_v30 = vadd.f32 %v1874_v15, %v796_v26 }
 0x13b   :  { %v670_v31 = vpop.f32.mrf.mxu0  ;;  %v798_v32 = vpop.f32.mrf.mxu1 }
 0x13c   :  { %1183 = vst.msk [vmem:[%s2199_s3 + $0x4c] sm:$0xf] %vm1163_vm3, %v1422_v27  ;;  %1215 = vst.msk [vmem:[%s2199_s3 + $0xcc] sm:$0xf] %vm1163_vm3, %v1454_v28  ;;  %v863_v33 = vmax.f32 %v669_v29, 0.0  ;;  %v895_v34 = vmax.f32 %v797_v30, 0.0 }
 0x13d   :  { %v671_v35 = vpop.f32.mrf.mxu0  ;;  %v799_v36 = vpop.f32.mrf.mxu1 }
 0x13e   :  { %v1423_v37 = vpack.c.bf16 %v863_v33, %v863_v33  ;;  %v1455_v38 = vpack.c.bf16 %v895_v34, %v895_v34  ;;  %v672_v39 = vadd.f32 %v1874_v15, %v671_v35  ;;  %v800_v40 = vadd.f32 %v1874_v15, %v799_v36 }
 0x13f   :  { %v673_v41 = vpop.f32.mrf.mxu0  ;;  %v801_v42 = vpop.f32.mrf.mxu1 }
 0x140   :  { %1184 = vst.msk [vmem:[%s2199_s3 + $0x50] sm:$0xf] %vm1163_vm3, %v1423_v37  ;;  %1216 = vst.msk [vmem:[%s2199_s3 + $0xd0] sm:$0xf] %vm1163_vm3, %v1455_v38  ;;  %v864_v43 = vmax.f32 %v672_v39, 0.0  ;;  %v896_v44 = vmax.f32 %v800_v40, 0.0 }
 0x141   :  { %v676_v45 = vpop.f32.mrf.mxu0  ;;  %v804_v46 = vpop.f32.mrf.mxu1 }
 0x142   :  { %v1424_v47 = vpack.c.bf16 %v864_v43, %v864_v43  ;;  %v1456_v48 = vpack.c.bf16 %v896_v44, %v896_v44  ;;  %v677_v49 = vadd.f32 %v1874_v15, %v676_v45  ;;  %v805_v50 = vadd.f32 %v1874_v15, %v804_v46 }
 0x143   :  { %v678_v51 = vpop.f32.mrf.mxu0  ;;  %v806_v52 = vpop.f32.mrf.mxu1 }
 0x144   :  { %1185 = vst.msk [vmem:[%s2199_s3 + $0x54] sm:$0xf] %vm1163_vm3, %v1424_v47  ;;  %1217 = vst.msk [vmem:[%s2199_s3 + $0xd4] sm:$0xf] %vm1163_vm3, %v1456_v48  ;;  %v865_v53 = vmax.f32 %v677_v49, 0.0  ;;  %v897_v54 = vmax.f32 %v805_v50, 0.0 }
 0x145   :  { %v679_v55 = vpop.f32.mrf.mxu0  ;;  %v807_v56 = vpop.f32.mrf.mxu1 }
 0x146   :  { %v1425_v57 = vpack.c.bf16 %v865_v53, %v865_v53  ;;  %v1457_v58 = vpack.c.bf16 %v897_v54, %v897_v54  ;;  %v680_v59 = vadd.f32 %v1874_v15, %v679_v55  ;;  %v808_v60 = vadd.f32 %v1874_v15, %v807_v56 }
 0x147   :  { %v681_v61 = vpop.f32.mrf.mxu0  ;;  %v809_v62 = vpop.f32.mrf.mxu1 }
 0x148   :  { %1186 = vst.msk [vmem:[%s2199_s3 + $0x58] sm:$0xf] %vm1163_vm3, %v1425_v57  ;;  %1218 = vst.msk [vmem:[%s2199_s3 + $0xd8] sm:$0xf] %vm1163_vm3, %v1457_v58  ;;  %v866_v63 = vmax.f32 %v680_v59, 0.0  ;;  %v898_v0 = vmax.f32 %v808_v60, 0.0 }
 0x149   :  { %v684_v1 = vpop.f32.mrf.mxu0  ;;  %v812_v2 = vpop.f32.mrf.mxu1 }
 0x14a   :  { %v1426_v3 = vpack.c.bf16 %v866_v63, %v866_v63  ;;  %v1458_v4 = vpack.c.bf16 %v898_v0, %v898_v0  ;;  %v685_v5 = vadd.f32 %v1874_v15, %v684_v1  ;;  %v813_v6 = vadd.f32 %v1874_v15, %v812_v2 }
 0x14b   :  { %v686_v7 = vpop.f32.mrf.mxu0  ;;  %v814_v8 = vpop.f32.mrf.mxu1 }
 0x14c   :  { %1187 = vst.msk [vmem:[%s2199_s3 + $0x5c] sm:$0xf] %vm1163_vm3, %v1426_v3  ;;  %1219 = vst.msk [vmem:[%s2199_s3 + $0xdc] sm:$0xf] %vm1163_vm3, %v1458_v4  ;;  %v867_v9 = vmax.f32 %v685_v5, 0.0  ;;  %v899_v10 = vmax.f32 %v813_v6, 0.0 }
 0x14d   :  { %v687_v11 = vpop.f32.mrf.mxu0  ;;  %v815_v12 = vpop.f32.mrf.mxu1 }
 0x14e   :  { %v1427_v13 = vpack.c.bf16 %v867_v9, %v867_v9  ;;  %v1459_v14 = vpack.c.bf16 %v899_v10, %v899_v10  ;;  %v688_v16 = vadd.f32 %v1874_v15, %v687_v11  ;;  %v816_v17 = vadd.f32 %v1874_v15, %v815_v12 }
 0x14f   :  { %v689_v18 = vpop.f32.mrf.mxu0  ;;  %v817_v19 = vpop.f32.mrf.mxu1 }
 0x150   :  { %1188 = vst.msk [vmem:[%s2199_s3 + $0x60] sm:$0xf] %vm1163_vm3, %v1427_v13  ;;  %1220 = vst.msk [vmem:[%s2199_s3 + $0xe0] sm:$0xf] %vm1163_vm3, %v1459_v14  ;;  %v868_v20 = vmax.f32 %v688_v16, 0.0  ;;  %v900_v21 = vmax.f32 %v816_v17, 0.0 }
 0x151   :  { %v692_v22 = vpop.f32.mrf.mxu0  ;;  %v820_v23 = vpop.f32.mrf.mxu1 }
 0x152   :  { %v1428_v24 = vpack.c.bf16 %v868_v20, %v868_v20  ;;  %v1460_v25 = vpack.c.bf16 %v900_v21, %v900_v21  ;;  %v693_v26 = vadd.f32 %v1874_v15, %v692_v22  ;;  %v821_v27 = vadd.f32 %v1874_v15, %v820_v23 }
 0x153   :  { %v694_v28 = vpop.f32.mrf.mxu0  ;;  %v822_v29 = vpop.f32.mrf.mxu1 }
 0x154   :  { %1189 = vst.msk [vmem:[%s2199_s3 + $0x64] sm:$0xf] %vm1163_vm3, %v1428_v24  ;;  %1221 = vst.msk [vmem:[%s2199_s3 + $0xe4] sm:$0xf] %vm1163_vm3, %v1460_v25  ;;  %v869_v30 = vmax.f32 %v693_v26, 0.0  ;;  %v901_v31 = vmax.f32 %v821_v27, 0.0 }
 0x155   :  { %v695_v32 = vpop.f32.mrf.mxu0  ;;  %v823_v33 = vpop.f32.mrf.mxu1 }
 0x156   :  { %v1429_v34 = vpack.c.bf16 %v869_v30, %v869_v30  ;;  %v1461_v35 = vpack.c.bf16 %v901_v31, %v901_v31  ;;  %v696_v36 = vadd.f32 %v1874_v15, %v695_v32  ;;  %v824_v37 = vadd.f32 %v1874_v15, %v823_v33 }
 0x157   :  { %v697_v38 = vpop.f32.mrf.mxu0  ;;  %v825_v39 = vpop.f32.mrf.mxu1 }
 0x158   :  { %1190 = vst.msk [vmem:[%s2199_s3 + $0x68] sm:$0xf] %vm1163_vm3, %v1429_v34  ;;  %1222 = vst.msk [vmem:[%s2199_s3 + $0xe8] sm:$0xf] %vm1163_vm3, %v1461_v35  ;;  %v870_v40 = vmax.f32 %v696_v36, 0.0  ;;  %v902_v41 = vmax.f32 %v824_v37, 0.0 }
 0x159   :  { %v700_v42 = vpop.f32.mrf.mxu0  ;;  %v828_v43 = vpop.f32.mrf.mxu1 }
 0x15a   :  { %v1430_v44 = vpack.c.bf16 %v870_v40, %v870_v40  ;;  %v1462_v45 = vpack.c.bf16 %v902_v41, %v902_v41  ;;  %v701_v46 = vadd.f32 %v1874_v15, %v700_v42  ;;  %v829_v47 = vadd.f32 %v1874_v15, %v828_v43 }
 0x15b   :  { %v702_v48 = vpop.f32.mrf.mxu0  ;;  %v830_v49 = vpop.f32.mrf.mxu1 }
 0x15c   :  { %1191 = vst.msk [vmem:[%s2199_s3 + $0x6c] sm:$0xf] %vm1163_vm3, %v1430_v44  ;;  %1223 = vst.msk [vmem:[%s2199_s3 + $0xec] sm:$0xf] %vm1163_vm3, %v1462_v45  ;;  %v871_v50 = vmax.f32 %v701_v46, 0.0  ;;  %v903_v51 = vmax.f32 %v829_v47, 0.0 }
 0x15d   :  { %v703_v52 = vpop.f32.mrf.mxu0  ;;  %v831_v53 = vpop.f32.mrf.mxu1 }
 0x15e   :  { %v1431_v54 = vpack.c.bf16 %v871_v50, %v871_v50  ;;  %v1463_v55 = vpack.c.bf16 %v903_v51, %v903_v51  ;;  %v704_v56 = vadd.f32 %v1874_v15, %v703_v52  ;;  %v832_v57 = vadd.f32 %v1874_v15, %v831_v53 }
 0x15f   :  { %v705_v58 = vpop.f32.mrf.mxu0  ;;  %v833_v59 = vpop.f32.mrf.mxu1 }
 0x160   :  { %1192 = vst.msk [vmem:[%s2199_s3 + $0x70] sm:$0xf] %vm1163_vm3, %v1431_v54  ;;  %1224 = vst.msk [vmem:[%s2199_s3 + $0xf0] sm:$0xf] %vm1163_vm3, %v1463_v55  ;;  %v872_v60 = vmax.f32 %v704_v56, 0.0  ;;  %v904_v61 = vmax.f32 %v832_v57, 0.0 }
 0x161   :  { %v708_v62 = vpop.f32.mrf.mxu0  ;;  %v836_v63 = vpop.f32.mrf.mxu1 }
 0x162   :  { %v1432_v0 = vpack.c.bf16 %v872_v60, %v872_v60  ;;  %v1464_v1 = vpack.c.bf16 %v904_v61, %v904_v61  ;;  %v709_v2 = vadd.f32 %v1874_v15, %v708_v62  ;;  %v837_v3 = vadd.f32 %v1874_v15, %v836_v63 }
 0x163   :  { %v710_v4 = vpop.f32.mrf.mxu0  ;;  %v838_v5 = vpop.f32.mrf.mxu1 }
 0x164   :  { %1193 = vst.msk [vmem:[%s2199_s3 + $0x74] sm:$0xf] %vm1163_vm3, %v1432_v0  ;;  %1225 = vst.msk [vmem:[%s2199_s3 + $0xf4] sm:$0xf] %vm1163_vm3, %v1464_v1  ;;  %v873_v6 = vmax.f32 %v709_v2, 0.0  ;;  %v905_v7 = vmax.f32 %v837_v3, 0.0 }
 0x165   :  { %v711_v8 = vpop.f32.mrf.mxu0  ;;  %v839_v9 = vpop.f32.mrf.mxu1 }
 0x166   :  { %v1433_v10 = vpack.c.bf16 %v873_v6, %v873_v6  ;;  %v1465_v11 = vpack.c.bf16 %v905_v7, %v905_v7  ;;  %v712_v12 = vadd.f32 %v1874_v15, %v711_v8  ;;  %v840_v13 = vadd.f32 %v1874_v15, %v839_v9 }
 0x167   :  { %v713_v14 = vpop.f32.mrf.mxu0  ;;  %v841_v16 = vpop.f32.mrf.mxu1 }
 0x168   :  { %1194 = vst.msk [vmem:[%s2199_s3 + $0x78] sm:$0xf] %vm1163_vm3, %v1433_v10  ;;  %1226 = vst.msk [vmem:[%s2199_s3 + $0xf8] sm:$0xf] %vm1163_vm3, %v1465_v11  ;;  %v874_v17 = vmax.f32 %v712_v12, 0.0  ;;  %v906_v18 = vmax.f32 %v840_v13, 0.0 }
 0x16a   :  { %v1434_v19 = vpack.c.bf16 %v874_v17, %v874_v17  ;;  %v1466_v20 = vpack.c.bf16 %v906_v18, %v906_v18 }
 0x16c   :  { %1195 = vst.msk [vmem:[%s2199_s3 + $0x7c] sm:$0xf] %vm1163_vm3, %v1434_v19  ;;  %1227 = vst.msk [vmem:[%s2199_s3 + $0xfc] sm:$0xf] %vm1163_vm3, %v1466_v20 }

// kernel: seg_template_forward.13
= control target key start
LH: loop header
LB: loop body
LE: loop exit
PB: predicated region body
PF: predicated region fallthrough
CT: control target
= control target key end

     0   :  { %vm304_vm0 = vcmask 519168   ;;  %s871_s0 = inlined_call_operand.vmem [shape: bf16[128,64], index: 0, kind: input, shape index: {}]   ;;  %s872_s1 = inlined_call_operand.vmem [shape: bf16[128,64], index: 1, kind: input, shape index: {}]   ;;  %s873_s2 = inlined_call_operand.vmem [shape: bf16[128,64], index: 2, kind: input, shape index: {}]   ;;  %s874_s3 = inlined_call_operand.vmem [shape: bf16[128,64], index: 3, kind: input, shape index: {}]   ;;  %s875_s4 = inlined_call_operand.vmem [shape: bf16[128,64], index: 4, kind: input, shape index: {}]   ;;  %s876_s5 = inlined_call_operand.vmem [shape: bf16[128,64], index: 5, kind: input, shape index: {}]   ;;  %s877_s6 = inlined_call_operand.vmem [shape: bf16[128,64], index: 6, kind: input, shape index: {}]   ;;  %s878_s7 = inlined_call_operand.vmem [shape: bf16[128,64], index: 7, kind: input, shape index: {}]   ;;  %s879_s8 = inlined_call_operand.vmem [shape: bf16[128,64], index: 8, kind: input, shape index: {}]   ;;  %s880_s9 = inlined_call_operand.vmem [shape: bf16[128,64], index: 9, kind: output, shape index: {}]  }
   0x1   :  { %v32_v0 = vld [vmem:[%s871_s0] sm:$0xf]  ;;  %v33_v6 = vld [vmem:[%s871_s0 + $0x4] sm:$0xf]  ;;  %v34_v15 = vld [vmem:[%s871_s0 + $0x8] sm:$0xf] }
   0x2   :  { %v48_v1 = vld [vmem:[%s872_s1] sm:$0xf]  ;;  %v49_v7 = vld [vmem:[%s872_s1 + $0x4] sm:$0xf]  ;;  %v50_v16 = vld [vmem:[%s872_s1 + $0x8] sm:$0xf] }
   0x3   :  { %v80_v2 = vld [vmem:[%s873_s2] sm:$0xf]  ;;  %v64_v3 = vmax.bf16 %v48_v1, %v32_v0  ;;  %v81_v8 = vld [vmem:[%s873_s2 + $0x4] sm:$0xf]  ;;  %v65_v10 = vmax.bf16 %v49_v7, %v33_v6  ;;  %v82_v17 = vld [vmem:[%s873_s2 + $0x8] sm:$0xf]  ;;  %v66_v20 = vmax.bf16 %v50_v16, %v34_v15 }
   0x4   :  { %v112_v4 = vld [vmem:[%s874_s3] sm:$0xf]  ;;  %v113_v13 = vld [vmem:[%s874_s3 + $0x4] sm:$0xf]  ;;  %v114_v24 = vld [vmem:[%s874_s3 + $0x8] sm:$0xf] }
   0x5   :  { %v96_v5 = vmax.bf16 %v80_v2, %v64_v3  ;;  %v144_v9 = vld [vmem:[%s875_s4] sm:$0xf]  ;;  %v97_v14 = vmax.bf16 %v81_v8, %v65_v10  ;;  %v145_v19 = vld [vmem:[%s875_s4 + $0x4] sm:$0xf]  ;;  %v98_v26 = vmax.bf16 %v82_v17, %v66_v20  ;;  %v35_v27 = vld [vmem:[%s871_s0 + $0xc] sm:$0xf] }
   0x6   :  { %v176_v12 = vld [vmem:[%s876_s5] sm:$0xf]  ;;  %v177_v23 = vld [vmem:[%s876_s5 + $0x4] sm:$0xf]  ;;  %v51_v28 = vld [vmem:[%s872_s1 + $0xc] sm:$0xf] }
   0x7   :  { %v128_v11 = vmax.bf16 %v112_v4, %v96_v5  ;;  %v208_v21 = vld [vmem:[%s877_s6] sm:$0xf]  ;;  %v129_v22 = vmax.bf16 %v113_v13, %v97_v14  ;;  %v83_v29 = vld [vmem:[%s873_s2 + $0xc] sm:$0xf]  ;;  %v146_v33 = vld [vmem:[%s875_s4 + $0x8] sm:$0xf]  ;;  %v67_v34 = vmax.bf16 %v51_v28, %v35_v27  ;;  %v130_v37 = vmax.bf16 %v114_v24, %v98_v26 }
   0x8   :  { %v240_v30 = vld [vmem:[%s878_s7] sm:$0xf]  ;;  %v209_v36 = vld [vmem:[%s877_s6 + $0x4] sm:$0xf]  ;;  %v178_v38 = vld [vmem:[%s876_s5 + $0x8] sm:$0xf] }
   0x9   :  { %v160_v18 = vmax.bf16 %v144_v9, %v128_v11  ;;  %v272_v31 = vld [vmem:[%s879_s8] sm:$0xf]  ;;  %v161_v32 = vmax.bf16 %v145_v19, %v129_v22  ;;  %v115_v39 = vld [vmem:[%s874_s3 + $0xc] sm:$0xf]  ;;  %v99_v41 = vmax.bf16 %v83_v29, %v67_v34  ;;  %v36_v42 = vld [vmem:[%s871_s0 + $0x10] sm:$0xf]  ;;  %v162_v48 = vmax.bf16 %v146_v33, %v130_v37 }
   0xa   :  { %v52_v43 = vld [vmem:[%s872_s1 + $0x10] sm:$0xf]  ;;  %v241_v46 = vld [vmem:[%s878_s7 + $0x4] sm:$0xf]  ;;  %v147_v49 = vld [vmem:[%s875_s4 + $0xc] sm:$0xf] }
   0xb   :  { %v192_v25 = vmax.bf16 %v176_v12, %v160_v18  ;;  %v193_v40 = vmax.bf16 %v177_v23, %v161_v32  ;;  %v84_v44 = vld [vmem:[%s873_s2 + $0x10] sm:$0xf]  ;;  %v273_v47 = vld [vmem:[%s879_s8 + $0x4] sm:$0xf]  ;;  %v68_v50 = vmax.bf16 %v52_v43, %v36_v42  ;;  %v210_v52 = vld [vmem:[%s877_s6 + $0x8] sm:$0xf]  ;;  %v131_v53 = vmax.bf16 %v115_v39, %v99_v41 }
   0xc   :  { %v179_v54 = vld [vmem:[%s876_s5 + $0xc] sm:$0xf]  ;;  %v116_v55 = vld [vmem:[%s874_s3 + $0x10] sm:$0xf]  ;;  %v194_v57 = vmax.bf16 %v178_v38, %v162_v48  ;;  %v37_v59 = vld [vmem:[%s871_s0 + $0x14] sm:$0xf] }
   0xd   :  { %v224_v35 = vmax.bf16 %v208_v21, %v192_v25  ;;  %v225_v51 = vmax.bf16 %v209_v36, %v193_v40  ;;  %v100_v58 = vmax.bf16 %v84_v44, %v68_v50  ;;  %v53_v60 = vld [vmem:[%s872_s1 + $0x14] sm:$0xf]  ;;  %v242_v63 = vld [vmem:[%s878_s7 + $0x8] sm:$0xf]  ;;  %v163_v1 = vmax.bf16 %v147_v49, %v131_v53  ;;  %v148_v2 = vld [vmem:[%s875_s4 + $0x10] sm:$0xf] }
   0xe   :  { %v85_v61 = vld [vmem:[%s873_s2 + $0x14] sm:$0xf]  ;;  %v274_v0 = vld [vmem:[%s879_s8 + $0x8] sm:$0xf]  ;;  %v69_v3 = vmax.bf16 %v53_v60, %v37_v59  ;;  %v226_v4 = vmax.bf16 %v210_v52, %v194_v57  ;;  %v211_v5 = vld [vmem:[%s877_s6 + $0xc] sm:$0xf] }
   0xf   :  { %v256_v45 = vmax.bf16 %v240_v30, %v224_v35  ;;  %v257_v62 = vmax.bf16 %v241_v46, %v225_v51  ;;  %v132_v6 = vmax.bf16 %v116_v55, %v100_v58  ;;  %v180_v7 = vld [vmem:[%s876_s5 + $0x10] sm:$0xf]  ;;  %v117_v8 = vld [vmem:[%s874_s3 + $0x14] sm:$0xf]  ;;  %v195_v10 = vmax.bf16 %v179_v54, %v163_v1  ;;  %v38_v12 = vld [vmem:[%s871_s0 + $0x18] sm:$0xf] }
  0x10   :  { %v101_v11 = vmax.bf16 %v85_v61, %v69_v3  ;;  %v54_v13 = vld [vmem:[%s872_s1 + $0x18] sm:$0xf]  ;;  %v258_v15 = vmax.bf16 %v242_v63, %v226_v4  ;;  %v243_v16 = vld [vmem:[%s878_s7 + $0xc] sm:$0xf]  ;;  %v149_v19 = vld [vmem:[%s875_s4 + $0x14] sm:$0xf] }
  0x11   :  { %v288_v56 = vmax.bf16 %v272_v31, %v256_v45  ;;  %v289_v9 = vmax.bf16 %v273_v47, %v257_v62  ;;  %v86_v14 = vld [vmem:[%s873_s2 + $0x18] sm:$0xf]  ;;  %v275_v17 = vld [vmem:[%s879_s8 + $0xc] sm:$0xf]  ;;  %v164_v18 = vmax.bf16 %v148_v2, %v132_v6  ;;  %v70_v20 = vmax.bf16 %v54_v13, %v38_v12  ;;  %v212_v22 = vld [vmem:[%s877_s6 + $0x10] sm:$0xf] }
  0x12   :  { %v227_v21 = vmax.bf16 %v211_v5, %v195_v10  ;;  %v133_v23 = vmax.bf16 %v117_v8, %v101_v11  ;;  %v181_v24 = vld [vmem:[%s876_s5 + $0x14] sm:$0xf]  ;;  %v118_v25 = vld [vmem:[%s874_s3 + $0x18] sm:$0xf]  ;;  %v290_v26 = vmax.bf16 %v274_v0, %v258_v15  ;;  %v39_v29 = vld [vmem:[%s871_s0 + $0x1c] sm:$0xf] }
  0x13   :  { %305 = vst.msk [vmem:[%s880_s9] sm:$0xf] %vm304_vm0, %v288_v56  ;;  %306 = vst.msk [vmem:[%s880_s9 + $0x4] sm:$0xf] %vm304_vm0, %v289_v9  ;;  %v196_v27 = vmax.bf16 %v180_v7, %v164_v18  ;;  %v102_v28 = vmax.bf16 %v86_v14, %v70_v20  ;;  %v55_v30 = vld [vmem:[%s872_s1 + $0x1c] sm:$0xf] }
  0x14   :  { %v87_v31 = vld [vmem:[%s873_s2 + $0x1c] sm:$0xf]  ;;  %v259_v32 = vmax.bf16 %v243_v16, %v227_v21  ;;  %v244_v33 = vld [vmem:[%s878_s7 + $0x10] sm:$0xf]  ;;  %v165_v35 = vmax.bf16 %v149_v19, %v133_v23  ;;  %v150_v36 = vld [vmem:[%s875_s4 + $0x18] sm:$0xf]  ;;  %v71_v37 = vmax.bf16 %v55_v30, %v39_v29 }
  0x15   :  { %v276_v34 = vld [vmem:[%s879_s8 + $0x10] sm:$0xf]  ;;  %307 = vst.msk [vmem:[%s880_s9 + $0x8] sm:$0xf] %vm304_vm0, %v290_v26  ;;  %v228_v38 = vmax.bf16 %v212_v22, %v196_v27  ;;  %v213_v39 = vld [vmem:[%s877_s6 + $0x14] sm:$0xf]  ;;  %v134_v40 = vmax.bf16 %v118_v25, %v102_v28 }
  0x16   :  { %v182_v41 = vld [vmem:[%s876_s5 + $0x18] sm:$0xf]  ;;  %v119_v42 = vld [vmem:[%s874_s3 + $0x1c] sm:$0xf]  ;;  %v291_v43 = vmax.bf16 %v275_v17, %v259_v32  ;;  %v197_v44 = vmax.bf16 %v181_v24, %v165_v35  ;;  %v103_v45 = vmax.bf16 %v87_v31, %v71_v37  ;;  %v40_v46 = vld [vmem:[%s871_s0 + $0x20] sm:$0xf] }
  0x17   :  { %v56_v47 = vld [vmem:[%s872_s1 + $0x20] sm:$0xf]  ;;  %v260_v49 = vmax.bf16 %v244_v33, %v228_v38  ;;  %v245_v50 = vld [vmem:[%s878_s7 + $0x14] sm:$0xf]  ;;  %v166_v52 = vmax.bf16 %v150_v36, %v134_v40  ;;  %v151_v53 = vld [vmem:[%s875_s4 + $0x1c] sm:$0xf] }
  0x18   :  { %v88_v48 = vld [vmem:[%s873_s2 + $0x20] sm:$0xf]  ;;  %v277_v51 = vld [vmem:[%s879_s8 + $0x14] sm:$0xf]  ;;  %v72_v54 = vmax.bf16 %v56_v47, %v40_v46  ;;  %308 = vst.msk [vmem:[%s880_s9 + $0xc] sm:$0xf] %vm304_vm0, %v291_v43  ;;  %v229_v55 = vmax.bf16 %v213_v39, %v197_v44  ;;  %v135_v57 = vmax.bf16 %v119_v42, %v103_v45 }
  0x19   :  { %v214_v56 = vld [vmem:[%s877_s6 + $0x18] sm:$0xf]  ;;  %v183_v58 = vld [vmem:[%s876_s5 + $0x1c] sm:$0xf]  ;;  %v120_v59 = vld [vmem:[%s874_s3 + $0x20] sm:$0xf]  ;;  %v292_v60 = vmax.bf16 %v276_v34, %v260_v49  ;;  %v198_v61 = vmax.bf16 %v182_v41, %v166_v52 }
  0x1a   :  { %v104_v62 = vmax.bf16 %v88_v48, %v72_v54  ;;  %v41_v63 = vld [vmem:[%s871_s0 + $0x24] sm:$0xf]  ;;  %v261_v2 = vmax.bf16 %v245_v50, %v229_v55  ;;  %v246_v3 = vld [vmem:[%s878_s7 + $0x18] sm:$0xf]  ;;  %v167_v5 = vmax.bf16 %v151_v53, %v135_v57  ;;  %v152_v6 = vld [vmem:[%s875_s4 + $0x20] sm:$0xf] }
  0x1b   :  { %v57_v0 = vld [vmem:[%s872_s1 + $0x24] sm:$0xf]  ;;  %v278_v4 = vld [vmem:[%s879_s8 + $0x18] sm:$0xf]  ;;  %309 = vst.msk [vmem:[%s880_s9 + $0x10] sm:$0xf] %vm304_vm0, %v292_v60  ;;  %v230_v8 = vmax.bf16 %v214_v56, %v198_v61 }
  0x1c   :  { %v89_v1 = vld [vmem:[%s873_s2 + $0x24] sm:$0xf]  ;;  %v73_v7 = vmax.bf16 %v57_v0, %v41_v63  ;;  %v215_v9 = vld [vmem:[%s877_s6 + $0x1c] sm:$0xf]  ;;  %v136_v10 = vmax.bf16 %v120_v59, %v104_v62  ;;  %v184_v11 = vld [vmem:[%s876_s5 + $0x20] sm:$0xf]  ;;  %v293_v13 = vmax.bf16 %v277_v51, %v261_v2  ;;  %v199_v14 = vmax.bf16 %v183_v58, %v167_v5 }
  0x1d   :  { %v121_v12 = vld [vmem:[%s874_s3 + $0x24] sm:$0xf]  ;;  %v42_v16 = vld [vmem:[%s871_s0 + $0x28] sm:$0xf]  ;;  %v262_v19 = vmax.bf16 %v246_v3, %v230_v8  ;;  %v247_v20 = vld [vmem:[%s878_s7 + $0x1c] sm:$0xf] }
  0x1e   :  { %v105_v15 = vmax.bf16 %v89_v1, %v73_v7  ;;  %v58_v17 = vld [vmem:[%s872_s1 + $0x28] sm:$0xf]  ;;  %v279_v21 = vld [vmem:[%s879_s8 + $0x1c] sm:$0xf]  ;;  %v168_v22 = vmax.bf16 %v152_v6, %v136_v10  ;;  %v153_v23 = vld [vmem:[%s875_s4 + $0x24] sm:$0xf]  ;;  %v231_v25 = vmax.bf16 %v215_v9, %v199_v14 }
  0x1f   :  { %v90_v18 = vld [vmem:[%s873_s2 + $0x28] sm:$0xf]  ;;  %v74_v24 = vmax.bf16 %v58_v17, %v42_v16  ;;  %310 = vst.msk [vmem:[%s880_s9 + $0x14] sm:$0xf] %vm304_vm0, %v293_v13  ;;  %v216_v26 = vld [vmem:[%s877_s6 + $0x20] sm:$0xf]  ;;  %v294_v30 = vmax.bf16 %v278_v4, %v262_v19 }
  0x20   :  { %v137_v27 = vmax.bf16 %v121_v12, %v105_v15  ;;  %v185_v28 = vld [vmem:[%s876_s5 + $0x24] sm:$0xf]  ;;  %v122_v29 = vld [vmem:[%s874_s3 + $0x28] sm:$0xf]  ;;  %v200_v31 = vmax.bf16 %v184_v11, %v168_v22  ;;  %v43_v33 = vld [vmem:[%s871_s0 + $0x2c] sm:$0xf]  ;;  %v263_v36 = vmax.bf16 %v247_v20, %v231_v25 }
  0x21   :  { %v106_v32 = vmax.bf16 %v90_v18, %v74_v24  ;;  %v59_v34 = vld [vmem:[%s872_s1 + $0x2c] sm:$0xf]  ;;  %v248_v37 = vld [vmem:[%s878_s7 + $0x20] sm:$0xf]  ;;  %v154_v40 = vld [vmem:[%s875_s4 + $0x28] sm:$0xf] }
  0x22   :  { %v91_v35 = vld [vmem:[%s873_s2 + $0x2c] sm:$0xf]  ;;  %v280_v38 = vld [vmem:[%s879_s8 + $0x20] sm:$0xf]  ;;  %v169_v39 = vmax.bf16 %v153_v23, %v137_v27  ;;  %v75_v41 = vmax.bf16 %v59_v34, %v43_v33  ;;  %311 = vst.msk [vmem:[%s880_s9 + $0x18] sm:$0xf] %vm304_vm0, %v294_v30  ;;  %v232_v42 = vmax.bf16 %v216_v26, %v200_v31  ;;  %v295_v47 = vmax.bf16 %v279_v21, %v263_v36 }
  0x23   :  { %v217_v43 = vld [vmem:[%s877_s6 + $0x24] sm:$0xf]  ;;  %v138_v44 = vmax.bf16 %v122_v29, %v106_v32  ;;  %v186_v45 = vld [vmem:[%s876_s5 + $0x28] sm:$0xf]  ;;  %v123_v46 = vld [vmem:[%s874_s3 + $0x2c] sm:$0xf] }
  0x24   :  { %v201_v48 = vmax.bf16 %v185_v28, %v169_v39  ;;  %v107_v49 = vmax.bf16 %v91_v35, %v75_v41  ;;  %v44_v50 = vld [vmem:[%s871_s0 + $0x30] sm:$0xf]  ;;  %v264_v53 = vmax.bf16 %v248_v37, %v232_v42  ;;  %v249_v54 = vld [vmem:[%s878_s7 + $0x24] sm:$0xf]  ;;  %v155_v57 = vld [vmem:[%s875_s4 + $0x2c] sm:$0xf] }
  0x25   :  { %v60_v51 = vld [vmem:[%s872_s1 + $0x30] sm:$0xf]  ;;  %v281_v55 = vld [vmem:[%s879_s8 + $0x24] sm:$0xf]  ;;  %v170_v56 = vmax.bf16 %v154_v40, %v138_v44  ;;  %312 = vst.msk [vmem:[%s880_s9 + $0x1c] sm:$0xf] %vm304_vm0, %v295_v47 }
  0x26   :  { %v92_v52 = vld [vmem:[%s873_s2 + $0x30] sm:$0xf]  ;;  %v76_v58 = vmax.bf16 %v60_v51, %v44_v50  ;;  %v233_v59 = vmax.bf16 %v217_v43, %v201_v48  ;;  %v218_v60 = vld [vmem:[%s877_s6 + $0x28] sm:$0xf]  ;;  %v139_v61 = vmax.bf16 %v123_v46, %v107_v49  ;;  %v187_v62 = vld [vmem:[%s876_s5 + $0x2c] sm:$0xf]  ;;  %v296_v0 = vmax.bf16 %v280_v38, %v264_v53 }
  0x27   :  { %v124_v63 = vld [vmem:[%s874_s3 + $0x30] sm:$0xf]  ;;  %v202_v1 = vmax.bf16 %v186_v45, %v170_v56  ;;  %v45_v3 = vld [vmem:[%s871_s0 + $0x34] sm:$0xf]  ;;  %v250_v7 = vld [vmem:[%s878_s7 + $0x28] sm:$0xf] }
  0x28   :  { %v108_v2 = vmax.bf16 %v92_v52, %v76_v58  ;;  %v61_v4 = vld [vmem:[%s872_s1 + $0x34] sm:$0xf]  ;;  %v265_v6 = vmax.bf16 %v249_v54, %v233_v59  ;;  %v282_v8 = vld [vmem:[%s879_s8 + $0x28] sm:$0xf]  ;;  %v171_v9 = vmax.bf16 %v155_v57, %v139_v61  ;;  %v156_v10 = vld [vmem:[%s875_s4 + $0x30] sm:$0xf] }
  0x29   :  { %v93_v5 = vld [vmem:[%s873_s2 + $0x34] sm:$0xf]  ;;  %v77_v11 = vmax.bf16 %v61_v4, %v45_v3  ;;  %313 = vst.msk [vmem:[%s880_s9 + $0x20] sm:$0xf] %vm304_vm0, %v296_v0  ;;  %v234_v12 = vmax.bf16 %v218_v60, %v202_v1  ;;  %v219_v13 = vld [vmem:[%s877_s6 + $0x2c] sm:$0xf] }
  0x2a   :  { %v140_v14 = vmax.bf16 %v124_v63, %v108_v2  ;;  %v188_v15 = vld [vmem:[%s876_s5 + $0x30] sm:$0xf]  ;;  %v125_v16 = vld [vmem:[%s874_s3 + $0x34] sm:$0xf]  ;;  %v297_v17 = vmax.bf16 %v281_v55, %v265_v6  ;;  %v203_v18 = vmax.bf16 %v187_v62, %v171_v9  ;;  %v46_v20 = vld [vmem:[%s871_s0 + $0x38] sm:$0xf] }
  0x2b   :  { %v109_v19 = vmax.bf16 %v93_v5, %v77_v11  ;;  %v62_v21 = vld [vmem:[%s872_s1 + $0x38] sm:$0xf]  ;;  %v266_v23 = vmax.bf16 %v250_v7, %v234_v12  ;;  %v251_v24 = vld [vmem:[%s878_s7 + $0x2c] sm:$0xf]  ;;  %v157_v27 = vld [vmem:[%s875_s4 + $0x34] sm:$0xf] }
  0x2c   :  { %v94_v22 = vld [vmem:[%s873_s2 + $0x38] sm:$0xf]  ;;  %v283_v25 = vld [vmem:[%s879_s8 + $0x2c] sm:$0xf]  ;;  %v172_v26 = vmax.bf16 %v156_v10, %v140_v14  ;;  %v78_v28 = vmax.bf16 %v62_v21, %v46_v20  ;;  %314 = vst.msk [vmem:[%s880_s9 + $0x24] sm:$0xf] %vm304_vm0, %v297_v17  ;;  %v235_v29 = vmax.bf16 %v219_v13, %v203_v18 }
  0x2d   :  { %v220_v30 = vld [vmem:[%s877_s6 + $0x30] sm:$0xf]  ;;  %v141_v31 = vmax.bf16 %v125_v16, %v109_v19  ;;  %v189_v32 = vld [vmem:[%s876_s5 + $0x34] sm:$0xf]  ;;  %v126_v33 = vld [vmem:[%s874_s3 + $0x38] sm:$0xf]  ;;  %v298_v34 = vmax.bf16 %v282_v8, %v266_v23 }
  0x2e   :  { %v204_v35 = vmax.bf16 %v188_v15, %v172_v26  ;;  %v110_v36 = vmax.bf16 %v94_v22, %v78_v28  ;;  %v47_v37 = vld [vmem:[%s871_s0 + $0x3c] sm:$0xf]  ;;  %v267_v40 = vmax.bf16 %v251_v24, %v235_v29  ;;  %v252_v41 = vld [vmem:[%s878_s7 + $0x30] sm:$0xf]  ;;  %v158_v43 = vld [vmem:[%s875_s4 + $0x38] sm:$0xf] }
  0x2f   :  { %v63_v38 = vld [vmem:[%s872_s1 + $0x3c] sm:$0xf]  ;;  %v173_v42 = vmax.bf16 %v157_v27, %v141_v31  ;;  %315 = vst.msk [vmem:[%s880_s9 + $0x28] sm:$0xf] %vm304_vm0, %v298_v34  ;;  %v221_v46 = vld [vmem:[%s877_s6 + $0x34] sm:$0xf] }
  0x30   :  { %v95_v39 = vld [vmem:[%s873_s2 + $0x3c] sm:$0xf]  ;;  %v79_v44 = vmax.bf16 %v63_v38, %v47_v37  ;;  %v236_v45 = vmax.bf16 %v220_v30, %v204_v35  ;;  %v142_v47 = vmax.bf16 %v126_v33, %v110_v36  ;;  %v299_v49 = vmax.bf16 %v283_v25, %v267_v40  ;;  %v284_v50 = vld [vmem:[%s879_s8 + $0x30] sm:$0xf]  ;;  %v190_v52 = vld [vmem:[%s876_s5 + $0x38] sm:$0xf] }
  0x31   :  { %v127_v48 = vld [vmem:[%s874_s3 + $0x3c] sm:$0xf]  ;;  %v205_v51 = vmax.bf16 %v189_v32, %v173_v42  ;;  %v253_v55 = vld [vmem:[%s878_s7 + $0x34] sm:$0xf]  ;;  %v222_v59 = vld [vmem:[%s877_s6 + $0x38] sm:$0xf] }
  0x32   :  { %v111_v53 = vmax.bf16 %v95_v39, %v79_v44  ;;  %v268_v54 = vmax.bf16 %v252_v41, %v236_v45  ;;  %v174_v56 = vmax.bf16 %v158_v43, %v142_v47  ;;  %v159_v57 = vld [vmem:[%s875_s4 + $0x3c] sm:$0xf]  ;;  %316 = vst.msk [vmem:[%s880_s9 + $0x2c] sm:$0xf] %vm304_vm0, %v299_v49  ;;  %v285_v62 = vld [vmem:[%s879_s8 + $0x34] sm:$0xf] }
  0x33   :  { %v237_v58 = vmax.bf16 %v221_v46, %v205_v51  ;;  %v191_v0 = vld [vmem:[%s876_s5 + $0x3c] sm:$0xf]  ;;  %v254_v2 = vld [vmem:[%s878_s7 + $0x38] sm:$0xf] }
  0x34   :  { %v143_v60 = vmax.bf16 %v127_v48, %v111_v53  ;;  %v300_v61 = vmax.bf16 %v284_v50, %v268_v54  ;;  %v206_v63 = vmax.bf16 %v190_v52, %v174_v56  ;;  %v223_v5 = vld [vmem:[%s877_s6 + $0x3c] sm:$0xf]  ;;  %v286_v7 = vld [vmem:[%s879_s8 + $0x38] sm:$0xf] }
  0x35   :  { %v269_v1 = vmax.bf16 %v253_v55, %v237_v58  ;;  %v255_v10 = vld [vmem:[%s878_s7 + $0x3c] sm:$0xf] }
  0x36   :  { %v175_v3 = vmax.bf16 %v159_v57, %v143_v60  ;;  %317 = vst.msk [vmem:[%s880_s9 + $0x30] sm:$0xf] %vm304_vm0, %v300_v61  ;;  %v238_v4 = vmax.bf16 %v222_v59, %v206_v63  ;;  %v287_v13 = vld [vmem:[%s879_s8 + $0x3c] sm:$0xf] }
  0x37   :  { %v301_v6 = vmax.bf16 %v285_v62, %v269_v1 }
  0x38   :  { %v207_v8 = vmax.bf16 %v191_v0, %v175_v3  ;;  %v270_v9 = vmax.bf16 %v254_v2, %v238_v4 }
  0x39   :  { %318 = vst.msk [vmem:[%s880_s9 + $0x34] sm:$0xf] %vm304_vm0, %v301_v6 }
  0x3a   :  { %v239_v11 = vmax.bf16 %v223_v5, %v207_v8  ;;  %v302_v12 = vmax.bf16 %v286_v7, %v270_v9 }
  0x3c   :  { %v271_v14 = vmax.bf16 %v255_v10, %v239_v11  ;;  %319 = vst.msk [vmem:[%s880_s9 + $0x38] sm:$0xf] %vm304_vm0, %v302_v12 }
  0x3e   :  { %v303_v15 = vmax.bf16 %v287_v13, %v271_v14 }
  0x40   :  { %320 = vst.msk [vmem:[%s880_s9 + $0x3c] sm:$0xf] %vm304_vm0, %v303_v15 }

// kernel: seg_template_forward.14
= control target key start
LH: loop header
LB: loop body
LE: loop exit
PB: predicated region body
PF: predicated region fallthrough
CT: control target
= control target key end

     0   :  { %v470_v1 = vmov 0   ;;  %vm131_vm0 = vcmask 523264   ;;  %v41_v17 = vlaneseq  ;;  %s634_s1 = inlined_call_operand.vmem [shape: bf16[64,256], index: 1, kind: input, shape index: {}]   ;;  %s635_s0 = inlined_call_operand.vmem [shape: bf16[128,64], index: 0, kind: input, shape index: {}]   ;;  %s636_s2 = inlined_call_operand.vmem [shape: f32[1,256], index: 2, kind: input, shape index: {}]   ;;  %s637_s3 = inlined_call_operand.vmem [shape: bf16[128,256], index: 3, kind: output, shape index: {}]  }
   0x1   :  { %v450_v0 = vld [vmem:[%s634_s1 + $0x34] ss:$8 sps:$4 sm:$0xff]   ;;  %188 = vmatprep.mubr.bf16.mxu0 %v470_v1  ;;  %228 = vmatprep.mubr.bf16.mxu1 %v470_v1  ;;  %v452_v2 = vld [vmem:[%s634_s1 + $0x30] ss:$8 sps:$4 sm:$0xff]   ;;  %v453_v3 = vld [vmem:[%s634_s1 + $0x24] ss:$8 sps:$4 sm:$0xff]  }
   0x2   :  { %164 = vmatprep.subr.bf16.mxu0 %v450_v0  ;;  %441 = vmatprep.subr.bf16.mxu1 %v450_v0  ;;  %v455_v4 = vld [vmem:[%s634_s1 + $0x20] ss:$8 sps:$4 sm:$0xff]   ;;  %v456_v5 = vld [vmem:[%s634_s1 + $0x14] ss:$8 sps:$4 sm:$0xff]   ;;  %v458_v6 = vld [vmem:[%s634_s1 + $0x10] ss:$8 sps:$4 sm:$0xff]  }
   0x3   :  { %165 = vmatpush1.bf16.msra.mxu0 %v452_v2  ;;  %445 = vmatpush1.bf16.msra.mxu1 %v452_v2  ;;  %v459_v7 = vld [vmem:[%s634_s1 + $0x4] ss:$8 sps:$4 sm:$0xff]   ;;  %v461_v8 = vld [vmem:[%s634_s1] ss:$8 sps:$4 sm:$0xff]   ;;  %v466_v13 = vld [vmem:[%s635_s0 + $0x10] sm:$0xff]   ;;  %v42_v18 = vshrl.u32 %v41_v17, 7 }
   0x4   :  { %166 = vmatprep.subr.bf16.mxu0 %v453_v3  ;;  %442 = vmatprep.subr.bf16.mxu1 %v453_v3  ;;  %v462_v9 = vld [vmem:[%s635_s0] sm:$0xff]   ;;  %v464_v11 = vld [vmem:[%s635_s0 + $0x8] sm:$0xff]   ;;  %v467_v14 = vld [vmem:[%s635_s0 + $0x30] sm:$0xff]  }
   0x5   :  { %v463_v10 = vld [vmem:[%s635_s0 + $0x20] sm:$0xff]   ;;  %v465_v12 = vld [vmem:[%s635_s0 + $0x28] sm:$0xff]   ;;  %v468_v15 = vld [vmem:[%s635_s0 + $0x18] sm:$0xff]   ;;  %v43_v19 = vsub.s32 0, %v42_v18  ;;  %v47_v20 = vsub.s32 1, %v42_v18 }
   0x6   :  { %v469_v16 = vld [vmem:[%s635_s0 + $0x38] sm:$0xff]   ;;  %v39_v21 = vld [vmem:[%s636_s2] sm:$0x3] }
   0x7   :  { %167 = vmatpush1.bf16.msra.mxu0 %v455_v4  ;;  %446 = vmatpush1.bf16.msra.mxu1 %v455_v4  ;;  %v550_v22 = vrot.slane %v39_v21, %v43_v19  ;;  %v552_v23 = vrot.slane %v39_v21, %v47_v20 }
   0x8   :  { %168 = vmatprep.subr.bf16.mxu0 %v456_v5  ;;  %443 = vmatprep.subr.bf16.mxu1 %v456_v5 }
   0xb   :  { %169 = vmatpush1.bf16.msra.mxu0 %v458_v6  ;;  %447 = vmatpush1.bf16.msra.mxu1 %v458_v6 }
   0xc   :  { %170 = vmatprep.subr.bf16.mxu0 %v459_v7  ;;  %444 = vmatprep.subr.bf16.mxu1 %v459_v7 }
   0xf   :  { %171 = vmatpush1.bf16.msra.mxu0 %v461_v8  ;;  %448 = vmatpush1.bf16.msra.mxu1 %v461_v8 }
  0x12   :  { %401 = vmatmul.mubr.msk.bf16.vlgmr.msra.gmra.mxu0 %vm131_vm0, %v462_v9  ;;  %405 = vmatmul.mubr.msk.bf16.vlgmr.msra.gmra.mxu1 %vm131_vm0, %v463_v10 }
  0x13   :  { %198 = vmatprep.mubr.bf16.mxu0 %v470_v1  ;;  %238 = vmatprep.mubr.bf16.mxu1 %v470_v1 }
  0x1a   :  { %402 = vmatmul.mubr.msk.bf16.gmra.mxu0 %vm131_vm0, %v464_v11  ;;  %406 = vmatmul.mubr.msk.bf16.gmra.mxu1 %vm131_vm0, %v465_v12 }
  0x1b   :  { %208 = vmatprep.mubr.bf16.mxu0 %v470_v1  ;;  %248 = vmatprep.mubr.bf16.mxu1 %v470_v1 }
  0x22   :  { %403 = vmatmul.mubr.msk.bf16.gmra.mxu0 %vm131_vm0, %v466_v13  ;;  %407 = vmatmul.mubr.msk.bf16.gmra.mxu1 %vm131_vm0, %v467_v14 }
  0x23   :  { %218 = vmatprep.mubr.bf16.mxu0 %v470_v1  ;;  %258 = vmatprep.mubr.bf16.mxu1 %v470_v1 }
  0x2a   :  { %404 = vmatmul.mubr.msk.bf16.gmra.mxu0 %vm131_vm0, %v468_v15  ;;  %408 = vmatmul.mubr.msk.bf16.gmra.mxu1 %vm131_vm0, %v469_v16 }
  0xd2   :  { %v190_v24 = vpop.f32.mrf.mxu0  ;;  %v230_v25 = vpop.f32.mrf.mxu1 }
  0xd3   :  { %v191_v28 = vadd.f32 %v190_v24, %v550_v22  ;;  %v231_v29 = vadd.f32 %v230_v25, %v550_v22 }
  0xd4   :  { %v192_v26 = vpop.f32.mrf.mxu0  ;;  %v232_v27 = vpop.f32.mrf.mxu1 }
  0xd5   :  { %v193_v30 = vadd.f32 %v192_v26, %v552_v23  ;;  %v233_v31 = vadd.f32 %v232_v27, %v552_v23 }
  0xd6   :  { %v194_v32 = vpop.f32.mrf.mxu0  ;;  %v234_v33 = vpop.f32.mrf.mxu1 }
  0xd7   :  { %v425_v34 = vpack.c.bf16 %v193_v30, %v191_v28  ;;  %v433_v35 = vpack.c.bf16 %v233_v31, %v231_v29  ;;  %v195_v38 = vadd.f32 %v194_v32, %v550_v22  ;;  %v235_v39 = vadd.f32 %v234_v33, %v550_v22 }
  0xd8   :  { %v196_v36 = vpop.f32.mrf.mxu0  ;;  %v236_v37 = vpop.f32.mrf.mxu1 }
  0xd9   :  { %365 = vst [vmem:[%s637_s3] sm:$0xff] %v425_v34  ;;  %373 = vst [vmem:[%s637_s3 + $0x40] sm:$0xff] %v433_v35  ;;  %v197_v40 = vadd.f32 %v196_v36, %v552_v23  ;;  %v237_v41 = vadd.f32 %v236_v37, %v552_v23 }
  0xda   :  { %v200_v42 = vpop.f32.mrf.mxu0  ;;  %v240_v43 = vpop.f32.mrf.mxu1 }
  0xdb   :  { %v426_v44 = vpack.c.bf16 %v197_v40, %v195_v38  ;;  %v434_v45 = vpack.c.bf16 %v237_v41, %v235_v39  ;;  %v201_v48 = vadd.f32 %v200_v42, %v550_v22  ;;  %v241_v49 = vadd.f32 %v240_v43, %v550_v22 }
  0xdc   :  { %v202_v46 = vpop.f32.mrf.mxu0  ;;  %v242_v47 = vpop.f32.mrf.mxu1 }
  0xdd   :  { %366 = vst [vmem:[%s637_s3 + $0x8] sm:$0xff] %v426_v44  ;;  %374 = vst [vmem:[%s637_s3 + $0x48] sm:$0xff] %v434_v45  ;;  %v203_v50 = vadd.f32 %v202_v46, %v552_v23  ;;  %v243_v51 = vadd.f32 %v242_v47, %v552_v23 }
  0xde   :  { %v204_v52 = vpop.f32.mrf.mxu0  ;;  %v244_v53 = vpop.f32.mrf.mxu1 }
  0xdf   :  { %v427_v54 = vpack.c.bf16 %v203_v50, %v201_v48  ;;  %v435_v55 = vpack.c.bf16 %v243_v51, %v241_v49  ;;  %v205_v58 = vadd.f32 %v204_v52, %v550_v22  ;;  %v245_v59 = vadd.f32 %v244_v53, %v550_v22 }
  0xe0   :  { %v206_v56 = vpop.f32.mrf.mxu0  ;;  %v246_v57 = vpop.f32.mrf.mxu1 }
  0xe1   :  { %367 = vst [vmem:[%s637_s3 + $0x10] sm:$0xff] %v427_v54  ;;  %375 = vst [vmem:[%s637_s3 + $0x50] sm:$0xff] %v435_v55  ;;  %v207_v60 = vadd.f32 %v206_v56, %v552_v23  ;;  %v247_v61 = vadd.f32 %v246_v57, %v552_v23 }
  0xe2   :  { %v210_v62 = vpop.f32.mrf.mxu0  ;;  %v250_v63 = vpop.f32.mrf.mxu1 }
  0xe3   :  { %v428_v0 = vpack.c.bf16 %v207_v60, %v205_v58  ;;  %v436_v1 = vpack.c.bf16 %v247_v61, %v245_v59  ;;  %v211_v4 = vadd.f32 %v210_v62, %v550_v22  ;;  %v251_v5 = vadd.f32 %v250_v63, %v550_v22 }
  0xe4   :  { %v212_v2 = vpop.f32.mrf.mxu0  ;;  %v252_v3 = vpop.f32.mrf.mxu1 }
  0xe5   :  { %368 = vst [vmem:[%s637_s3 + $0x18] sm:$0xff] %v428_v0  ;;  %376 = vst [vmem:[%s637_s3 + $0x58] sm:$0xff] %v436_v1  ;;  %v213_v6 = vadd.f32 %v212_v2, %v552_v23  ;;  %v253_v7 = vadd.f32 %v252_v3, %v552_v23 }
  0xe6   :  { %v214_v8 = vpop.f32.mrf.mxu0  ;;  %v254_v9 = vpop.f32.mrf.mxu1 }
  0xe7   :  { %v429_v10 = vpack.c.bf16 %v213_v6, %v211_v4  ;;  %v437_v11 = vpack.c.bf16 %v253_v7, %v251_v5  ;;  %v215_v14 = vadd.f32 %v214_v8, %v550_v22  ;;  %v255_v15 = vadd.f32 %v254_v9, %v550_v22 }
  0xe8   :  { %v216_v12 = vpop.f32.mrf.mxu0  ;;  %v256_v13 = vpop.f32.mrf.mxu1 }
  0xe9   :  { %369 = vst [vmem:[%s637_s3 + $0x20] sm:$0xff] %v429_v10  ;;  %377 = vst [vmem:[%s637_s3 + $0x60] sm:$0xff] %v437_v11  ;;  %v217_v16 = vadd.f32 %v216_v12, %v552_v23  ;;  %v257_v17 = vadd.f32 %v256_v13, %v552_v23 }
  0xea   :  { %v220_v18 = vpop.f32.mrf.mxu0  ;;  %v260_v19 = vpop.f32.mrf.mxu1 }
  0xeb   :  { %v430_v20 = vpack.c.bf16 %v217_v16, %v215_v14  ;;  %v438_v21 = vpack.c.bf16 %v257_v17, %v255_v15  ;;  %v221_v26 = vadd.f32 %v220_v18, %v550_v22  ;;  %v261_v27 = vadd.f32 %v260_v19, %v550_v22 }
  0xec   :  { %v222_v24 = vpop.f32.mrf.mxu0  ;;  %v262_v25 = vpop.f32.mrf.mxu1 }
  0xed   :  { %370 = vst [vmem:[%s637_s3 + $0x28] sm:$0xff] %v430_v20  ;;  %378 = vst [vmem:[%s637_s3 + $0x68] sm:$0xff] %v438_v21  ;;  %v223_v28 = vadd.f32 %v222_v24, %v552_v23  ;;  %v263_v29 = vadd.f32 %v262_v25, %v552_v23 }
  0xee   :  { %v224_v30 = vpop.f32.mrf.mxu0  ;;  %v264_v31 = vpop.f32.mrf.mxu1 }
  0xef   :  { %v431_v32 = vpack.c.bf16 %v223_v28, %v221_v26  ;;  %v439_v33 = vpack.c.bf16 %v263_v29, %v261_v27  ;;  %v225_v36 = vadd.f32 %v224_v30, %v550_v22  ;;  %v265_v37 = vadd.f32 %v264_v31, %v550_v22 }
  0xf0   :  { %v226_v34 = vpop.f32.mrf.mxu0  ;;  %v266_v35 = vpop.f32.mrf.mxu1 }
  0xf1   :  { %371 = vst [vmem:[%s637_s3 + $0x30] sm:$0xff] %v431_v32  ;;  %379 = vst [vmem:[%s637_s3 + $0x70] sm:$0xff] %v439_v33  ;;  %v227_v38 = vadd.f32 %v226_v34, %v552_v23  ;;  %v267_v39 = vadd.f32 %v266_v35, %v552_v23 }
  0xf3   :  { %v432_v40 = vpack.c.bf16 %v227_v38, %v225_v36  ;;  %v440_v41 = vpack.c.bf16 %v267_v39, %v265_v37 }
  0xf5   :  { %372 = vst [vmem:[%s637_s3 + $0x38] sm:$0xff] %v432_v40  ;;  %380 = vst [vmem:[%s637_s3 + $0x78] sm:$0xff] %v440_v41 }

// kernel: seg_template_forward.17
= control target key start
LH: loop header
LB: loop body
LE: loop exit
PB: predicated region body
PF: predicated region fallthrough
CT: control target
= control target key end

     0   :  { %v585_v1 = vmov 0   ;;  %vm134_vm0 = vcmask 523264   ;;  %v44_v17 = vlaneseq  ;;  %s886_s1 = inlined_call_operand.vmem [shape: bf16[64,256], index: 1, kind: input, shape index: {}]   ;;  %s887_s0 = inlined_call_operand.vmem [shape: bf16[128,64], index: 0, kind: input, shape index: {}]   ;;  %s888_s2 = inlined_call_operand.vmem [shape: f32[1,256], index: 2, kind: input, shape index: {}]   ;;  %s889_s3 = inlined_call_operand.vmem [shape: bf16[128,256], index: 3, kind: input, shape index: {}]   ;;  %s890_s4 = inlined_call_operand.vmem [shape: bf16[128,256], index: 4, kind: output, shape index: {}]  }
   0x1   :  { %v565_v0 = vld [vmem:[%s886_s1 + $0x34] ss:$8 sps:$4 sm:$0xff]   ;;  %191 = vmatprep.mubr.bf16.mxu0 %v585_v1  ;;  %231 = vmatprep.mubr.bf16.mxu1 %v585_v1  ;;  %v567_v2 = vld [vmem:[%s886_s1 + $0x30] ss:$8 sps:$4 sm:$0xff]   ;;  %v568_v3 = vld [vmem:[%s886_s1 + $0x24] ss:$8 sps:$4 sm:$0xff]  }
   0x2   :  { %167 = vmatprep.subr.bf16.mxu0 %v565_v0  ;;  %556 = vmatprep.subr.bf16.mxu1 %v565_v0  ;;  %v570_v4 = vld [vmem:[%s886_s1 + $0x20] ss:$8 sps:$4 sm:$0xff]   ;;  %v571_v5 = vld [vmem:[%s886_s1 + $0x14] ss:$8 sps:$4 sm:$0xff]   ;;  %v573_v6 = vld [vmem:[%s886_s1 + $0x10] ss:$8 sps:$4 sm:$0xff]  }
   0x3   :  { %168 = vmatpush1.bf16.msra.mxu0 %v567_v2  ;;  %560 = vmatpush1.bf16.msra.mxu1 %v567_v2  ;;  %v574_v7 = vld [vmem:[%s886_s1 + $0x4] ss:$8 sps:$4 sm:$0xff]   ;;  %v576_v8 = vld [vmem:[%s886_s1] ss:$8 sps:$4 sm:$0xff]   ;;  %v581_v13 = vld [vmem:[%s887_s0 + $0x10] sm:$0xff]   ;;  %v45_v18 = vshrl.u32 %v44_v17, 7 }
   0x4   :  { %169 = vmatprep.subr.bf16.mxu0 %v568_v3  ;;  %557 = vmatprep.subr.bf16.mxu1 %v568_v3  ;;  %v577_v9 = vld [vmem:[%s887_s0] sm:$0xff]   ;;  %v579_v11 = vld [vmem:[%s887_s0 + $0x8] sm:$0xff]   ;;  %v582_v14 = vld [vmem:[%s887_s0 + $0x30] sm:$0xff]  }
   0x5   :  { %v578_v10 = vld [vmem:[%s887_s0 + $0x20] sm:$0xff]   ;;  %v580_v12 = vld [vmem:[%s887_s0 + $0x28] sm:$0xff]   ;;  %v583_v15 = vld [vmem:[%s887_s0 + $0x18] sm:$0xff]   ;;  %v46_v19 = vsub.s32 0, %v45_v18  ;;  %v50_v22 = vsub.s32 1, %v45_v18 }
   0x6   :  { %v584_v16 = vld [vmem:[%s887_s0 + $0x38] sm:$0xff]   ;;  %v42_v20 = vld [vmem:[%s888_s2] sm:$0x3]  ;;  %v681_v25 = vld [vmem:[%s889_s3 + $0x8] sm:$0xff] }
   0x7   :  { %170 = vmatpush1.bf16.msra.mxu0 %v570_v4  ;;  %561 = vmatpush1.bf16.msra.mxu1 %v570_v4  ;;  %v272_v21 = vld [vmem:[%s889_s3] sm:$0xff]  ;;  %v676_v24 = vrot.slane %v42_v20, %v46_v19  ;;  %v686_v26 = vld [vmem:[%s889_s3 + $0x48] sm:$0xff]  ;;  %v691_v28 = vld [vmem:[%s889_s3 + $0x10] sm:$0xff]  ;;  %v698_v31 = vrot.slane %v42_v20, %v50_v22  ;;  %v290_v38 = vunpack.c.l.bf16 %v681_v25  ;;  %v291_v40 = vunpack.c.h.bf16 %v681_v25 }
   0x8   :  { %171 = vmatprep.subr.bf16.mxu0 %v571_v5  ;;  %558 = vmatprep.subr.bf16.mxu1 %v571_v5  ;;  %v280_v23 = vld [vmem:[%s889_s3 + $0x40] sm:$0xff]  ;;  %v288_v27 = vunpack.c.l.bf16 %v272_v21  ;;  %v696_v29 = vld [vmem:[%s889_s3 + $0x50] sm:$0xff]  ;;  %v289_v32 = vunpack.c.h.bf16 %v272_v21  ;;  %v703_v34 = vld [vmem:[%s889_s3 + $0x18] sm:$0xff]  ;;  %v306_v39 = vunpack.c.l.bf16 %v686_v26  ;;  %v307_v41 = vunpack.c.h.bf16 %v686_v26 }
   0x9   :  { %v304_v30 = vunpack.c.l.bf16 %v280_v23  ;;  %v305_v33 = vunpack.c.h.bf16 %v280_v23  ;;  %v708_v35 = vld [vmem:[%s889_s3 + $0x58] sm:$0xff]  ;;  %v292_v44 = vunpack.c.l.bf16 %v691_v28  ;;  %v308_v45 = vunpack.c.l.bf16 %v696_v29  ;;  %v721_v46 = vld [vmem:[%s889_s3 + $0x20] sm:$0xff]  ;;  %v743_v4 = vld [vmem:[%s889_s3 + $0x28] sm:$0xff] }
   0xa   :  { %v726_v47 = vld [vmem:[%s889_s3 + $0x60] sm:$0xff]  ;;  %v293_v50 = vunpack.c.h.bf16 %v691_v28  ;;  %v309_v51 = vunpack.c.h.bf16 %v696_v29  ;;  %v294_v52 = vunpack.c.l.bf16 %v703_v34  ;;  %v310_v53 = vunpack.c.l.bf16 %v708_v35  ;;  %v748_v5 = vld [vmem:[%s889_s3 + $0x68] sm:$0xff] }
   0xb   :  { %172 = vmatpush1.bf16.msra.mxu0 %v573_v6  ;;  %562 = vmatpush1.bf16.msra.mxu1 %v573_v6  ;;  %v295_v60 = vunpack.c.h.bf16 %v703_v34  ;;  %v311_v61 = vunpack.c.h.bf16 %v708_v35  ;;  %v296_v62 = vunpack.c.l.bf16 %v721_v46  ;;  %v312_v63 = vunpack.c.l.bf16 %v726_v47 }
   0xc   :  { %173 = vmatprep.subr.bf16.mxu0 %v574_v7  ;;  %559 = vmatprep.subr.bf16.mxu1 %v574_v7  ;;  %v297_v2 = vunpack.c.h.bf16 %v721_v46  ;;  %v313_v3 = vunpack.c.h.bf16 %v726_v47  ;;  %v298_v20 = vunpack.c.l.bf16 %v743_v4  ;;  %v314_v21 = vunpack.c.l.bf16 %v748_v5 }
   0xf   :  { %174 = vmatpush1.bf16.msra.mxu0 %v576_v8  ;;  %563 = vmatpush1.bf16.msra.mxu1 %v576_v8 }
  0x12   :  { %516 = vmatmul.mubr.msk.bf16.vlgmr.msra.gmra.mxu0 %vm134_vm0, %v577_v9  ;;  %520 = vmatmul.mubr.msk.bf16.vlgmr.msra.gmra.mxu1 %vm134_vm0, %v578_v10 }
  0x13   :  { %201 = vmatprep.mubr.bf16.mxu0 %v585_v1  ;;  %241 = vmatprep.mubr.bf16.mxu1 %v585_v1 }
  0x1a   :  { %517 = vmatmul.mubr.msk.bf16.gmra.mxu0 %vm134_vm0, %v579_v11  ;;  %521 = vmatmul.mubr.msk.bf16.gmra.mxu1 %vm134_vm0, %v580_v12 }
  0x1b   :  { %211 = vmatprep.mubr.bf16.mxu0 %v585_v1  ;;  %251 = vmatprep.mubr.bf16.mxu1 %v585_v1 }
  0x22   :  { %518 = vmatmul.mubr.msk.bf16.gmra.mxu0 %vm134_vm0, %v581_v13  ;;  %522 = vmatmul.mubr.msk.bf16.gmra.mxu1 %vm134_vm0, %v582_v14 }
  0x23   :  { %221 = vmatprep.mubr.bf16.mxu0 %v585_v1  ;;  %261 = vmatprep.mubr.bf16.mxu1 %v585_v1 }
  0x2a   :  { %519 = vmatmul.mubr.msk.bf16.gmra.mxu0 %vm134_vm0, %v583_v15  ;;  %523 = vmatmul.mubr.msk.bf16.gmra.mxu1 %vm134_vm0, %v584_v16 }
  0xd2   :  { %v193_v36 = vpop.f32.mrf.mxu0  ;;  %v233_v37 = vpop.f32.mrf.mxu1 }
  0xd3   :  { %v194_v42 = vadd.f32 %v193_v36, %v676_v24  ;;  %v234_v43 = vadd.f32 %v233_v37, %v676_v24 }
  0xd4   :  { %v195_v48 = vpop.f32.mrf.mxu0  ;;  %v235_v49 = vpop.f32.mrf.mxu1 }
  0xd5   :  { %v320_v54 = vadd.f32 %v288_v27, %v194_v42  ;;  %v336_v55 = vadd.f32 %v304_v30, %v234_v43  ;;  %v196_v56 = vadd.f32 %v195_v48, %v698_v31  ;;  %v236_v57 = vadd.f32 %v235_v49, %v698_v31 }
  0xd6   :  { %v197_v58 = vpop.f32.mrf.mxu0  ;;  %v237_v59 = vpop.f32.mrf.mxu1  ;;  %v299_v48 = vunpack.c.h.bf16 %v743_v4  ;;  %v315_v49 = vunpack.c.h.bf16 %v748_v5 }
  0xd7   :  { %v321_v0 = vadd.f32 %v289_v32, %v196_v56  ;;  %v337_v1 = vadd.f32 %v305_v33, %v236_v57  ;;  %v352_v6 = vmax.f32 %v320_v54, 0.0  ;;  %v368_v7 = vmax.f32 %v336_v55, 0.0 }
  0xd8   :  { %v198_v8 = vadd.f32 %v197_v58, %v676_v24  ;;  %v238_v9 = vadd.f32 %v237_v59, %v676_v24  ;;  %v199_v10 = vpop.f32.mrf.mxu0  ;;  %v239_v11 = vpop.f32.mrf.mxu1  ;;  %v771_v58 = vld [vmem:[%s889_s3 + $0x30] sm:$0xff] }
  0xd9   :  { %v353_v12 = vmax.f32 %v321_v0, 0.0  ;;  %v369_v13 = vmax.f32 %v337_v1, 0.0  ;;  %v200_v14 = vadd.f32 %v199_v10, %v698_v31  ;;  %v240_v15 = vadd.f32 %v239_v11, %v698_v31 }
  0xda   :  { %v322_v16 = vadd.f32 %v290_v38, %v198_v8  ;;  %v338_v17 = vadd.f32 %v306_v39, %v238_v9  ;;  %v203_v18 = vpop.f32.mrf.mxu0  ;;  %v243_v19 = vpop.f32.mrf.mxu1 }
  0xdb   :  { %v540_v22 = vpack.c.bf16 %v353_v12, %v352_v6  ;;  %v548_v23 = vpack.c.bf16 %v369_v13, %v368_v7  ;;  %v323_v25 = vadd.f32 %v291_v40, %v200_v14  ;;  %v339_v26 = vadd.f32 %v307_v41, %v240_v15 }
  0xdc   :  { %v354_v27 = vmax.f32 %v322_v16, 0.0  ;;  %v370_v28 = vmax.f32 %v338_v17, 0.0  ;;  %v204_v29 = vadd.f32 %v203_v18, %v676_v24  ;;  %v244_v30 = vadd.f32 %v243_v19, %v676_v24  ;;  %v205_v32 = vpop.f32.mrf.mxu0  ;;  %v245_v33 = vpop.f32.mrf.mxu1 }
  0xdd   :  { %480 = vst [vmem:[%s890_s4] sm:$0xff] %v540_v22  ;;  %488 = vst [vmem:[%s890_s4 + $0x40] sm:$0xff] %v548_v23  ;;  %v355_v36 = vmax.f32 %v323_v25, 0.0  ;;  %v371_v37 = vmax.f32 %v339_v26, 0.0  ;;  %v206_v38 = vadd.f32 %v205_v32, %v698_v31  ;;  %v246_v39 = vadd.f32 %v245_v33, %v698_v31 }
  0xde   :  { %v324_v40 = vadd.f32 %v292_v44, %v204_v29  ;;  %v340_v41 = vadd.f32 %v308_v45, %v244_v30  ;;  %v207_v42 = vpop.f32.mrf.mxu0  ;;  %v247_v43 = vpop.f32.mrf.mxu1  ;;  %v776_v44 = vld [vmem:[%s889_s3 + $0x70] sm:$0xff]  ;;  %v300_v14 = vunpack.c.l.bf16 %v771_v58  ;;  %v301_v32 = vunpack.c.h.bf16 %v771_v58 }
  0xdf   :  { %v541_v54 = vpack.c.bf16 %v355_v36, %v354_v27  ;;  %v549_v55 = vpack.c.bf16 %v371_v37, %v370_v28  ;;  %v325_v56 = vadd.f32 %v293_v50, %v206_v38  ;;  %v341_v57 = vadd.f32 %v309_v51, %v246_v39 }
  0xe0   :  { %v356_v45 = vmax.f32 %v324_v40, 0.0  ;;  %v372_v59 = vmax.f32 %v340_v41, 0.0  ;;  %v208_v0 = vadd.f32 %v207_v42, %v676_v24  ;;  %v248_v1 = vadd.f32 %v247_v43, %v676_v24  ;;  %v209_v6 = vpop.f32.mrf.mxu0  ;;  %v249_v7 = vpop.f32.mrf.mxu1 }
  0xe1   :  { %481 = vst [vmem:[%s890_s4 + $0x8] sm:$0xff] %v541_v54  ;;  %489 = vst [vmem:[%s890_s4 + $0x48] sm:$0xff] %v549_v55  ;;  %v357_v50 = vmax.f32 %v325_v56, 0.0  ;;  %v373_v51 = vmax.f32 %v341_v57, 0.0  ;;  %v210_v8 = vadd.f32 %v209_v6, %v698_v31  ;;  %v250_v9 = vadd.f32 %v249_v7, %v698_v31 }
  0xe2   :  { %v326_v10 = vadd.f32 %v294_v52, %v208_v0  ;;  %v342_v11 = vadd.f32 %v310_v53, %v248_v1  ;;  %v213_v12 = vpop.f32.mrf.mxu0  ;;  %v253_v13 = vpop.f32.mrf.mxu1  ;;  %v316_v15 = vunpack.c.l.bf16 %v776_v44  ;;  %v317_v33 = vunpack.c.h.bf16 %v776_v44 }
  0xe3   :  { %v542_v16 = vpack.c.bf16 %v357_v50, %v356_v45  ;;  %v550_v17 = vpack.c.bf16 %v373_v51, %v372_v59  ;;  %v327_v18 = vadd.f32 %v295_v60, %v210_v8  ;;  %v343_v19 = vadd.f32 %v311_v61, %v250_v9 }
  0xe4   :  { %v358_v22 = vmax.f32 %v326_v10, 0.0  ;;  %v374_v23 = vmax.f32 %v342_v11, 0.0  ;;  %v214_v52 = vadd.f32 %v213_v12, %v676_v24  ;;  %v254_v53 = vadd.f32 %v253_v13, %v676_v24  ;;  %v215_v25 = vpop.f32.mrf.mxu0  ;;  %v255_v26 = vpop.f32.mrf.mxu1 }
  0xe5   :  { %482 = vst [vmem:[%s890_s4 + $0x10] sm:$0xff] %v542_v16  ;;  %490 = vst [vmem:[%s890_s4 + $0x50] sm:$0xff] %v550_v17  ;;  %v359_v34 = vmax.f32 %v327_v18, 0.0  ;;  %v375_v60 = vmax.f32 %v343_v19, 0.0  ;;  %v216_v35 = vadd.f32 %v215_v25, %v698_v31  ;;  %v256_v61 = vadd.f32 %v255_v26, %v698_v31 }
  0xe6   :  { %v328_v27 = vadd.f32 %v296_v62, %v214_v52  ;;  %v344_v28 = vadd.f32 %v312_v63, %v254_v53  ;;  %v217_v29 = vpop.f32.mrf.mxu0  ;;  %v257_v30 = vpop.f32.mrf.mxu1  ;;  %v821_v62 = vld [vmem:[%s889_s3 + $0x38] sm:$0xff] }
  0xe7   :  { %v543_v36 = vpack.c.bf16 %v359_v34, %v358_v22  ;;  %v551_v37 = vpack.c.bf16 %v375_v60, %v374_v23  ;;  %v329_v38 = vadd.f32 %v297_v2, %v216_v35  ;;  %v345_v39 = vadd.f32 %v313_v3, %v256_v61  ;;  %v826_v63 = vld [vmem:[%s889_s3 + $0x78] sm:$0xff] }
  0xe8   :  { %v360_v40 = vmax.f32 %v328_v27, 0.0  ;;  %v376_v41 = vmax.f32 %v344_v28, 0.0  ;;  %v218_v42 = vadd.f32 %v217_v29, %v676_v24  ;;  %v258_v46 = vadd.f32 %v257_v30, %v676_v24  ;;  %v219_v2 = vpop.f32.mrf.mxu0  ;;  %v259_v43 = vpop.f32.mrf.mxu1 }
  0xe9   :  { %483 = vst [vmem:[%s890_s4 + $0x18] sm:$0xff] %v543_v36  ;;  %491 = vst [vmem:[%s890_s4 + $0x58] sm:$0xff] %v551_v37  ;;  %v361_v47 = vmax.f32 %v329_v38, 0.0  ;;  %v377_v3 = vmax.f32 %v345_v39, 0.0  ;;  %v220_v54 = vadd.f32 %v219_v2, %v698_v31  ;;  %v260_v55 = vadd.f32 %v259_v43, %v698_v31 }
  0xea   :  { %v330_v56 = vadd.f32 %v298_v20, %v218_v42  ;;  %v346_v57 = vadd.f32 %v314_v21, %v258_v46  ;;  %v223_v45 = vpop.f32.mrf.mxu0  ;;  %v263_v59 = vpop.f32.mrf.mxu1  ;;  %v302_v0 = vunpack.c.l.bf16 %v821_v62  ;;  %v318_v1 = vunpack.c.l.bf16 %v826_v63 }
  0xeb   :  { %v544_v6 = vpack.c.bf16 %v361_v47, %v360_v40  ;;  %v552_v7 = vpack.c.bf16 %v377_v3, %v376_v41  ;;  %v331_v50 = vadd.f32 %v299_v48, %v220_v54  ;;  %v347_v51 = vadd.f32 %v315_v49, %v260_v55 }
  0xec   :  { %v362_v8 = vmax.f32 %v330_v56, 0.0  ;;  %v378_v9 = vmax.f32 %v346_v57, 0.0  ;;  %v224_v20 = vadd.f32 %v223_v45, %v676_v24  ;;  %v264_v21 = vadd.f32 %v263_v59, %v676_v24  ;;  %v225_v10 = vpop.f32.mrf.mxu0  ;;  %v265_v11 = vpop.f32.mrf.mxu1 }
  0xed   :  { %484 = vst [vmem:[%s890_s4 + $0x20] sm:$0xff] %v544_v6  ;;  %492 = vst [vmem:[%s890_s4 + $0x60] sm:$0xff] %v552_v7  ;;  %v363_v4 = vmax.f32 %v331_v50, 0.0  ;;  %v379_v48 = vmax.f32 %v347_v51, 0.0  ;;  %v226_v5 = vadd.f32 %v225_v10, %v698_v31  ;;  %v266_v49 = vadd.f32 %v265_v11, %v698_v31 }
  0xee   :  { %v332_v12 = vadd.f32 %v300_v14, %v224_v20  ;;  %v348_v13 = vadd.f32 %v316_v15, %v264_v21  ;;  %v227_v16 = vpop.f32.mrf.mxu0  ;;  %v267_v17 = vpop.f32.mrf.mxu1  ;;  %v303_v18 = vunpack.c.h.bf16 %v821_v62  ;;  %v319_v19 = vunpack.c.h.bf16 %v826_v63 }
  0xef   :  { %v545_v22 = vpack.c.bf16 %v363_v4, %v362_v8  ;;  %v553_v23 = vpack.c.bf16 %v379_v48, %v378_v9  ;;  %v333_v52 = vadd.f32 %v301_v32, %v226_v5  ;;  %v349_v53 = vadd.f32 %v317_v33, %v266_v49 }
  0xf0   :  { %v364_v25 = vmax.f32 %v332_v12, 0.0  ;;  %v380_v26 = vmax.f32 %v348_v13, 0.0  ;;  %v228_v34 = vadd.f32 %v227_v16, %v676_v24  ;;  %v268_v58 = vadd.f32 %v267_v17, %v676_v24  ;;  %v229_v14 = vpop.f32.mrf.mxu0  ;;  %v269_v60 = vpop.f32.mrf.mxu1 }
  0xf1   :  { %485 = vst [vmem:[%s890_s4 + $0x28] sm:$0xff] %v545_v22  ;;  %493 = vst [vmem:[%s890_s4 + $0x68] sm:$0xff] %v553_v23  ;;  %v365_v44 = vmax.f32 %v333_v52, 0.0  ;;  %v381_v15 = vmax.f32 %v349_v53, 0.0  ;;  %v230_v35 = vadd.f32 %v229_v14, %v698_v31  ;;  %v270_v61 = vadd.f32 %v269_v60, %v698_v31 }
  0xf2   :  { %v334_v27 = vadd.f32 %v302_v0, %v228_v34  ;;  %v350_v28 = vadd.f32 %v318_v1, %v268_v58 }
  0xf3   :  { %v546_v29 = vpack.c.bf16 %v365_v44, %v364_v25  ;;  %v554_v24 = vpack.c.bf16 %v381_v15, %v380_v26  ;;  %v335_v30 = vadd.f32 %v303_v18, %v230_v35  ;;  %v351_v32 = vadd.f32 %v319_v19, %v270_v61 }
  0xf4   :  { %v366_v33 = vmax.f32 %v334_v27, 0.0  ;;  %v382_v36 = vmax.f32 %v350_v28, 0.0 }
  0xf5   :  { %486 = vst [vmem:[%s890_s4 + $0x30] sm:$0xff] %v546_v29  ;;  %494 = vst [vmem:[%s890_s4 + $0x70] sm:$0xff] %v554_v24  ;;  %v367_v37 = vmax.f32 %v335_v30, 0.0  ;;  %v383_v38 = vmax.f32 %v351_v32, 0.0 }
  0xf7   :  { %v547_v39 = vpack.c.bf16 %v367_v37, %v366_v33  ;;  %v555_v31 = vpack.c.bf16 %v383_v38, %v382_v36 }
  0xf9   :  { %487 = vst [vmem:[%s890_s4 + $0x38] sm:$0xff] %v547_v39  ;;  %495 = vst [vmem:[%s890_s4 + $0x78] sm:$0xff] %v555_v31 }

// kernel: seg_template_forward.16
= control target key start
LH: loop header
LB: loop body
LE: loop exit
PB: predicated region body
PF: predicated region fallthrough
CT: control target
= control target key end

     0   :  { %vm558_vm0 = vcmask 523264   ;;  %vm954_vm1 = vcmask 519168   ;;  %s1775_s1 = inlined_call_operand.vmem [shape: bf16[576,64], index: 1, kind: input, shape index: {}]   ;;  %s1776_s0 = inlined_call_operand.vmem [shape: bf16[128,576], index: 0, kind: input, shape index: {}]   ;;  %s1777_s2 = inlined_call_operand.vmem [shape: f32[1,64], index: 2, kind: input, shape index: {}]   ;;  %s1778_s3 = inlined_call_operand.vmem [shape: bf16[128,64], index: 3, kind: output, shape index: {}]  }
   0x1   :  { %v1264_v0 = vld [vmem:[%s1775_s1 + $0x78] sm:$0xff]   ;;  %v1268_v4 = vld [vmem:[%s1775_s1 + $0x70] sm:$0xff]   ;;  %v1272_v8 = vld [vmem:[%s1775_s1 + $0x68] sm:$0xff]  }
   0x2   :  { %v1265_v1 = vld [vmem:[%s1775_s1 + $0xf8] sm:$0xff]   ;;  %1092 = vmatprep.subr.bf16.mxu0 %v1264_v0  ;;  %v1269_v5 = vld [vmem:[%s1775_s1 + $0xf0] sm:$0xff]   ;;  %v1273_v9 = vld [vmem:[%s1775_s1 + $0xe8] sm:$0xff]  }
   0x3   :  { %v1266_v2 = vld [vmem:[%s1775_s1 + $0x38] sm:$0xff]   ;;  %1156 = vmatprep.subr.bf16.mxu1 %v1265_v1  ;;  %v1270_v6 = vld [vmem:[%s1775_s1 + $0x30] sm:$0xff]   ;;  %v1274_v10 = vld [vmem:[%s1775_s1 + $0x28] sm:$0xff]  }
   0x4   :  { %v1267_v3 = vld [vmem:[%s1775_s1 + $0xb8] sm:$0xff]   ;;  %1093 = vmatpush3.bf16.msra.mxu0 %v1266_v2  ;;  %v1271_v7 = vld [vmem:[%s1775_s1 + $0xb0] sm:$0xff]   ;;  %v1275_v11 = vld [vmem:[%s1775_s1 + $0xa8] sm:$0xff]  }
   0x5   :  { %1157 = vmatpush3.bf16.msra.mxu1 %v1267_v3  ;;  %1094 = vmatprep.subr.bf16.mxu0 %v1268_v4  ;;  %v1276_v12 = vld [vmem:[%s1775_s1 + $0x60] sm:$0xff]   ;;  %v1280_v16 = vld [vmem:[%s1775_s1 + $0x58] sm:$0xff]   ;;  %v1284_v20 = vld [vmem:[%s1775_s1 + $0x50] sm:$0xff]  }
   0x6   :  { %1158 = vmatprep.subr.bf16.mxu1 %v1269_v5  ;;  %v1277_v13 = vld [vmem:[%s1775_s1 + $0xe0] sm:$0xff]   ;;  %v1281_v17 = vld [vmem:[%s1775_s1 + $0xd8] sm:$0xff]   ;;  %v1285_v21 = vld [vmem:[%s1775_s1 + $0xd0] sm:$0xff]  }
   0x7   :  { %v1278_v14 = vld [vmem:[%s1775_s1 + $0x20] sm:$0xff]   ;;  %v1282_v18 = vld [vmem:[%s1775_s1 + $0x18] sm:$0xff]   ;;  %v1286_v22 = vld [vmem:[%s1775_s1 + $0x10] sm:$0xff]  }
   0x8   :  { %1095 = vmatpush3.bf16.msra.mxu0 %v1270_v6  ;;  %v1279_v15 = vld [vmem:[%s1775_s1 + $0xa0] sm:$0xff]   ;;  %v1283_v19 = vld [vmem:[%s1775_s1 + $0x98] sm:$0xff]   ;;  %v1287_v23 = vld [vmem:[%s1775_s1 + $0x90] sm:$0xff]  }
   0x9   :  { %1159 = vmatpush3.bf16.msra.mxu1 %v1271_v7  ;;  %1096 = vmatprep.subr.bf16.mxu0 %v1272_v8  ;;  %v1288_v24 = vld [vmem:[%s1775_s1 + $0x48] sm:$0xff]   ;;  %v1292_v28 = vld [vmem:[%s1775_s1 + $0x40] sm:$0xff]   ;;  %v1302_v36 = vld [vmem:[%s1775_s1 + $0x118] sm:$0xff]  }
   0xa   :  { %1160 = vmatprep.subr.bf16.mxu1 %v1273_v9  ;;  %v1289_v25 = vld [vmem:[%s1775_s1 + $0xc8] sm:$0xff]   ;;  %v1293_v29 = vld [vmem:[%s1775_s1 + $0xc0] sm:$0xff]   ;;  %v1315_v42 = vld [vmem:[%s1775_s1 + $0x110] sm:$0xff]  }
   0xb   :  { %v1290_v26 = vld [vmem:[%s1775_s1 + $0x8] sm:$0xff]   ;;  %v1294_v30 = vld [vmem:[%s1775_s1] sm:$0xff]   ;;  %v1311_v43 = vld [vmem:[%s1776_s0 + $0x5c] ss:$20 sps:$4 sm:$0xff]  }
   0xc   :  { %1097 = vmatpush3.bf16.msra.mxu0 %v1274_v10  ;;  %v1291_v27 = vld [vmem:[%s1775_s1 + $0x88] sm:$0xff]   ;;  %v1295_v31 = vld [vmem:[%s1775_s1 + $0x80] sm:$0xff]   ;;  %v1316_v47 = vld [vmem:[%s1776_s0 + $0x7c] ss:$20 sps:$4 sm:$0xff]  }
   0xd   :  { %1161 = vmatpush3.bf16.msra.mxu1 %v1275_v11  ;;  %1098 = vmatprep.subr.bf16.mxu0 %v1276_v12  ;;  %v1296_v32 = vld [vmem:[%s1776_s0] ss:$20 sps:$4 sm:$0xff]   ;;  %v1298_v33 = vld [vmem:[%s1776_s0 + $0x4] ss:$20 sps:$4 sm:$0xff]   ;;  %v1299_v34 = vld [vmem:[%s1776_s0 + $0x8] ss:$20 sps:$4 sm:$0xff]  }
   0xe   :  { %1162 = vmatprep.subr.bf16.mxu1 %v1277_v13  ;;  %v1301_v35 = vld [vmem:[%s1776_s0 + $0xc] ss:$20 sps:$4 sm:$0xff]   ;;  %615 = vmatprep.mubr.bf16.mxu0 %v1298_v33  ;;  %v1305_v38 = vld [vmem:[%s1776_s0 + $0x34] ss:$20 sps:$4 sm:$0xff]   ;;  %v1308_v40 = vld [vmem:[%s1776_s0 + $0x30] ss:$20 sps:$4 sm:$0xff]  }
   0xf   :  { %712 = vmatprep.mubr.bf16.mxu1 %v1301_v35  ;;  %v1303_v37 = vld [vmem:[%s1776_s0 + $0x2c] ss:$20 sps:$4 sm:$0xff]   ;;  %v1307_v39 = vld [vmem:[%s1776_s0 + $0x28] ss:$20 sps:$4 sm:$0xff]   ;;  %v1313_v44 = vld [vmem:[%s1776_s0 + $0x50] ss:$20 sps:$4 sm:$0xff]  }
  0x10   :  { %1099 = vmatpush3.bf16.msra.mxu0 %v1278_v14  ;;  %v1309_v41 = vld [vmem:[%s1776_s0 + $0x54] ss:$20 sps:$4 sm:$0xff]   ;;  %v1314_v45 = vld [vmem:[%s1776_s0 + $0x58] ss:$20 sps:$4 sm:$0xff]   ;;  %v1341_v49 = vld [vmem:[%s1775_s1 + $0x100] sm:$0xff]  }
  0x11   :  { %1163 = vmatpush3.bf16.msra.mxu1 %v1279_v15  ;;  %1100 = vmatprep.subr.bf16.mxu0 %v1280_v16  ;;  %v1328_v46 = vld [vmem:[%s1775_s1 + $0x108] sm:$0xff]   ;;  %v1318_v48 = vld [vmem:[%s1776_s0 + $0x84] ss:$20 sps:$4 sm:$0xff]   ;;  %v1321_v51 = vld [vmem:[%s1776_s0 + $0x80] ss:$20 sps:$4 sm:$0xff]  }
  0x12   :  { %1164 = vmatprep.subr.bf16.mxu1 %v1281_v17  ;;  %v1320_v50 = vld [vmem:[%s1776_s0 + $0x78] ss:$20 sps:$4 sm:$0xff]   ;;  %v1326_v54 = vld [vmem:[%s1776_s0 + $0xa0] ss:$20 sps:$4 sm:$0xff]   ;;  %v1327_v55 = vld [vmem:[%s1776_s0 + $0xa8] ss:$20 sps:$4 sm:$0xff]  }
  0x13   :  { %v1322_v52 = vld [vmem:[%s1776_s0 + $0xa4] ss:$20 sps:$4 sm:$0xff]   ;;  %v1324_v53 = vld [vmem:[%s1776_s0 + $0xac] ss:$20 sps:$4 sm:$0xff]   ;;  %v1331_v57 = vld [vmem:[%s1776_s0 + $0xd4] ss:$20 sps:$4 sm:$0xff]  }
  0x14   :  { %1101 = vmatpush3.bf16.msra.mxu0 %v1282_v18  ;;  %v1329_v56 = vld [vmem:[%s1776_s0 + $0xcc] ss:$20 sps:$4 sm:$0xff]   ;;  %v1333_v58 = vld [vmem:[%s1776_s0 + $0xc8] ss:$20 sps:$4 sm:$0xff]   ;;  %v1334_v59 = vld [vmem:[%s1776_s0 + $0xd0] ss:$20 sps:$4 sm:$0xff]  }
  0x15   :  { %1165 = vmatpush3.bf16.msra.mxu1 %v1283_v19  ;;  %1102 = vmatprep.subr.bf16.mxu0 %v1284_v20  ;;  %v1335_v60 = vld [vmem:[%s1776_s0 + $0xf4] ss:$20 sps:$4 sm:$0xff]   ;;  %v1337_v61 = vld [vmem:[%s1776_s0 + $0xfc] ss:$20 sps:$4 sm:$0xff]   ;;  %v1340_v63 = vld [vmem:[%s1776_s0 + $0xf8] ss:$20 sps:$4 sm:$0xff]  }
  0x16   :  { %1166 = vmatprep.subr.bf16.mxu1 %v1285_v21  ;;  %v1339_v62 = vld [vmem:[%s1776_s0 + $0xf0] ss:$20 sps:$4 sm:$0xff]   ;;  %v1346_v2 = vld [vmem:[%s1776_s0 + $0x118] ss:$20 sps:$4 sm:$0xff]   ;;  %v1347_v3 = vld [vmem:[%s1776_s0 + $0x120] ss:$20 sps:$4 sm:$0xff]  }
  0x17   :  { %v1342_v0 = vld [vmem:[%s1776_s0 + $0x11c] ss:$20 sps:$4 sm:$0xff]   ;;  %v1344_v1 = vld [vmem:[%s1776_s0 + $0x124] ss:$20 sps:$4 sm:$0xff]   ;;  %v1352_v8 = vld [vmem:[%s1776_s0 + $0x60] ss:$20 sps:$4 sm:$0xff]  }
  0x18   :  { %1103 = vmatpush3.bf16.msra.mxu0 %v1286_v22  ;;  %v1348_v4 = vld [vmem:[%s1776_s0 + $0x10] ss:$20 sps:$4 sm:$0xff]   ;;  %v1350_v6 = vld [vmem:[%s1776_s0 + $0x38] ss:$20 sps:$4 sm:$0xff]   ;;  %v1353_v9 = vld [vmem:[%s1776_s0 + $0x100] ss:$20 sps:$4 sm:$0xff]  }
  0x19   :  { %1167 = vmatpush3.bf16.msra.mxu1 %v1287_v23  ;;  %1104 = vmatprep.subr.bf16.mxu0 %v1288_v24  ;;  %v1349_v5 = vld [vmem:[%s1776_s0 + $0xb0] ss:$20 sps:$4 sm:$0xff]   ;;  %v1351_v7 = vld [vmem:[%s1776_s0 + $0xd8] ss:$20 sps:$4 sm:$0xff]   ;;  %v1354_v10 = vld [vmem:[%s1776_s0 + $0x88] ss:$20 sps:$4 sm:$0xff]  }
  0x1a   :  { %1168 = vmatprep.subr.bf16.mxu1 %v1289_v25  ;;  %v1355_v11 = vld [vmem:[%s1776_s0 + $0x128] ss:$20 sps:$4 sm:$0xff]  }
  0x1c   :  { %1105 = vmatpush3.bf16.msra.mxu0 %v1290_v26 }
  0x1d   :  { %1169 = vmatpush3.bf16.msra.mxu1 %v1291_v27  ;;  %1106 = vmatprep.subr.bf16.mxu0 %v1292_v28 }
  0x1e   :  { %1170 = vmatprep.subr.bf16.mxu1 %v1293_v29 }
  0x20   :  { %1107 = vmatpush3.bf16.msra.mxu0 %v1294_v30 }
  0x21   :  { %1171 = vmatpush3.bf16.msra.mxu1 %v1295_v31  ;;  %1232 = vmatprep.subr.bf16.mxu0 %v1302_v36 }
  0x22   :  { %1256 = vmatprep.subr.bf16.mxu1 %v1302_v36 }
  0x23   :  { %616 = vmatmul.mubr.bf16.vlgmr.msra.gmra.mxu0 %v1296_v32 }
  0x24   :  { %713 = vmatmul.mubr.bf16.vlgmr.msra.gmra.mxu1 %v1299_v34  ;;  %1233 = vmatpush3.bf16.msra.mxu0 %v1302_v36 }
  0x25   :  { %1260 = vmatpush3.bf16.msra.mxu1 %v1302_v36  ;;  %623 = vmatprep.mubr.bf16.mxu0 %v1303_v37 }
  0x26   :  { %720 = vmatprep.mubr.bf16.mxu1 %v1305_v38  ;;  %1234 = vmatprep.subr.bf16.mxu0 %v1315_v42 }
  0x27   :  { %1257 = vmatprep.subr.bf16.mxu1 %v1315_v42 }
  0x28   :  { %1235 = vmatpush3.bf16.msra.mxu0 %v1315_v42 }
  0x29   :  { %1261 = vmatpush3.bf16.msra.mxu1 %v1315_v42  ;;  %1236 = vmatprep.subr.bf16.mxu0 %v1328_v46 }
  0x2a   :  { %1258 = vmatprep.subr.bf16.mxu1 %v1328_v46 }
  0x2b   :  { %624 = vmatmul.mubr.bf16.gmra.mxu0 %v1307_v39 }
  0x2c   :  { %721 = vmatmul.mubr.bf16.gmra.mxu1 %v1308_v40  ;;  %631 = vmatprep.mubr.bf16.mxu0 %v1309_v41 }
  0x2d   :  { %728 = vmatprep.mubr.bf16.mxu1 %v1311_v43  ;;  %1237 = vmatpush3.bf16.msra.mxu0 %v1328_v46 }
  0x2e   :  { %1262 = vmatpush3.bf16.msra.mxu1 %v1328_v46  ;;  %1238 = vmatprep.subr.bf16.mxu0 %v1341_v49 }
  0x2f   :  { %1259 = vmatprep.subr.bf16.mxu1 %v1341_v49 }
  0x31   :  { %1239 = vmatpush3.bf16.msra.mxu0 %v1341_v49 }
  0x32   :  { %1263 = vmatpush3.bf16.msra.mxu1 %v1341_v49 }
  0x33   :  { %632 = vmatmul.mubr.bf16.gmra.mxu0 %v1313_v44 }
  0x34   :  { %729 = vmatmul.mubr.bf16.gmra.mxu1 %v1314_v45  ;;  %639 = vmatprep.mubr.bf16.mxu0 %v1316_v47 }
  0x35   :  { %736 = vmatprep.mubr.bf16.mxu1 %v1318_v48 }
  0x3b   :  { %640 = vmatmul.mubr.bf16.gmra.mxu0 %v1320_v50 }
  0x3c   :  { %737 = vmatmul.mubr.bf16.gmra.mxu1 %v1321_v51  ;;  %647 = vmatprep.mubr.bf16.mxu0 %v1322_v52 }
  0x3d   :  { %744 = vmatprep.mubr.bf16.mxu1 %v1324_v53 }
  0x43   :  { %648 = vmatmul.mubr.bf16.gmra.mxu0 %v1326_v54 }
  0x44   :  { %745 = vmatmul.mubr.bf16.gmra.mxu1 %v1327_v55  ;;  %655 = vmatprep.mubr.bf16.mxu0 %v1329_v56 }
  0x45   :  { %752 = vmatprep.mubr.bf16.mxu1 %v1331_v57 }
  0x4b   :  { %656 = vmatmul.mubr.bf16.gmra.mxu0 %v1333_v58 }
  0x4c   :  { %753 = vmatmul.mubr.bf16.gmra.mxu1 %v1334_v59  ;;  %663 = vmatprep.mubr.bf16.mxu0 %v1335_v60 }
  0x4d   :  { %760 = vmatprep.mubr.bf16.mxu1 %v1337_v61 }
  0x53   :  { %664 = vmatmul.mubr.bf16.gmra.mxu0 %v1339_v62 }
  0x54   :  { %761 = vmatmul.mubr.bf16.gmra.mxu1 %v1340_v63  ;;  %671 = vmatprep.mubr.bf16.mxu0 %v1342_v0 }
  0x55   :  { %768 = vmatprep.mubr.bf16.mxu1 %v1344_v1 }
  0x5b   :  { %672 = vmatmul.mubr.bf16.gmra.mxu0 %v1346_v2 }
  0x5c   :  { %769 = vmatmul.mubr.bf16.gmra.mxu1 %v1347_v3  ;;  %1240 = vmatprep.mubr.msk.bf16.mxu0 %vm558_vm0, %v1348_v4  ;;  %v1649_v3 = vld [vmem:[%s1777_s2] ss:$0 sm:$0xff] }
  0x5d   :  { %1248 = vmatprep.mubr.msk.bf16.mxu1 %vm558_vm0, %v1349_v5 }
  0x63   :  { %1241 = vmatmul.mubr.msk.bf16.vlgmr.msra.gmra.mxu0 %vm558_vm0, %v1350_v6 }
  0x64   :  { %1249 = vmatmul.mubr.msk.bf16.vlgmr.msra.gmra.mxu1 %vm558_vm0, %v1351_v7  ;;  %1244 = vmatprep.mubr.msk.bf16.mxu0 %vm558_vm0, %v1352_v8 }
  0x65   :  { %1252 = vmatprep.mubr.msk.bf16.mxu1 %vm558_vm0, %v1353_v9 }
  0x6b   :  { %1245 = vmatmul.mubr.msk.bf16.gmra.mxu0 %vm558_vm0, %v1354_v10 }
  0x6c   :  { %1253 = vmatmul.mubr.msk.bf16.gmra.mxu1 %vm558_vm0, %v1355_v11 }
  0xe3   :  { %v1108_v12 = vpop.f32.mrf.mxu0 }
  0xe4   :  { %v1172_v13 = vpop.f32.mrf.mxu1 }
  0xe5   :  { %v1109_v14 = vpop.f32.mrf.mxu0 }
  0xe6   :  { %v1173_v15 = vpop.f32.mrf.mxu1  ;;  %v1110_v63 = vadd.f32 %v1109_v14, %v1108_v12 }
  0xe7   :  { %v1111_v16 = vpop.f32.mrf.mxu0  ;;  %v1174_v10 = vadd.f32 %v1173_v15, %v1172_v13 }
  0xe8   :  { %v1175_v17 = vpop.f32.mrf.mxu1  ;;  %v618_v9 = vadd.f32 %v1110_v63, %v1649_v3 }
  0xe9   :  { %v1112_v18 = vpop.f32.mrf.mxu0 }
  0xea   :  { %v1176_v19 = vpop.f32.mrf.mxu1  ;;  %v1113_v0 = vadd.f32 %v1112_v18, %v1111_v16 }
  0xeb   :  { %v1114_v20 = vpop.f32.mrf.mxu0  ;;  %v1177_v16 = vadd.f32 %v1176_v19, %v1175_v17  ;;  %v715_v19 = vadd.f32 %v1174_v10, %v618_v9 }
  0xec   :  { %v1612_v21 = vpop.f32.mrf.mxu1  ;;  %v621_v11 = vadd.f32 %v1113_v0, %v1649_v3 }
  0xed   :  { %v1115_v22 = vpop.f32.mrf.mxu0 }
  0xee   :  { %v1179_v23 = vpop.f32.mrf.mxu1  ;;  %v1116_v1 = vadd.f32 %v1115_v22, %v1114_v20 }
  0xef   :  { %v1117_v24 = vpop.f32.mrf.mxu0 }
  0xf0   :  { %v1614_v25 = vpop.f32.mrf.mxu1  ;;  %v626_v12 = vadd.f32 %v1116_v1, %v1649_v3 }
  0xf1   :  { %v1118_v26 = vpop.f32.mrf.mxu0 }
  0xf2   :  { %v1182_v27 = vpop.f32.mrf.mxu1  ;;  %v1119_v4 = vadd.f32 %v1118_v26, %v1117_v24  ;;  %v1180_v26 = vadd.f32 %v1179_v23, %v1612_v21 }
  0xf3   :  { %v1120_v28 = vpop.f32.mrf.mxu0  ;;  %v1183_v13 = vadd.f32 %v1182_v27, %v1614_v25 }
  0xf4   :  { %v1184_v29 = vpop.f32.mrf.mxu1  ;;  %v629_v18 = vadd.f32 %v1119_v4, %v1649_v3  ;;  %v723_v17 = vadd.f32 %v1180_v26, %v626_v12  ;;  %v718_v4 = vadd.f32 %v1177_v16, %v621_v11 }
  0xf5   :  { %v1121_v30 = vpop.f32.mrf.mxu0 }
  0xf6   :  { %v1185_v31 = vpop.f32.mrf.mxu1  ;;  %v1122_v5 = vadd.f32 %v1121_v30, %v1120_v28  ;;  %v726_v23 = vadd.f32 %v1183_v13, %v629_v18 }
  0xf7   :  { %v1616_v32 = vpop.f32.mrf.mxu0  ;;  %v1186_v15 = vadd.f32 %v1185_v31, %v1184_v29 }
  0xf8   :  { %v1618_v33 = vpop.f32.mrf.mxu1  ;;  %v634_v20 = vadd.f32 %v1122_v5, %v1649_v3 }
  0xf9   :  { %v1620_v34 = vpop.f32.mrf.mxu0 }
  0xfa   :  { %v1622_v35 = vpop.f32.mrf.mxu1 }
  0xfb   :  { %v1126_v36 = vpop.f32.mrf.mxu0  ;;  %v1673_v25 = vadd.f32 %v1622_v35, %v1618_v33 }
  0xfc   :  { %v1624_v37 = vpop.f32.mrf.mxu1 }
  0xfd   :  { %v1127_v38 = vpop.f32.mrf.mxu0 }
  0xfe   :  { %v1626_v39 = vpop.f32.mrf.mxu1  ;;  %v1128_v28 = vadd.f32 %v1127_v38, %v1126_v36  ;;  %v1669_v36 = vadd.f32 %v1186_v15, %v634_v20 }
  0xff   :  { %v1129_v40 = vpop.f32.mrf.mxu0 }
 0x100   :  { %v1628_v41 = vpop.f32.mrf.mxu1  ;;  %v642_v27 = vadd.f32 %v1128_v28, %v1649_v3 }
 0x101   :  { %v1130_v42 = vpop.f32.mrf.mxu0 }
 0x102   :  { %v1630_v43 = vpop.f32.mrf.mxu1  ;;  %v1131_v30 = vadd.f32 %v1130_v42, %v1129_v40 }
 0x103   :  { %v1132_v44 = vpop.f32.mrf.mxu0  ;;  %v1195_v33 = vadd.f32 %v1630_v43, %v1628_v41 }
 0x104   :  { %v1632_v45 = vpop.f32.mrf.mxu1  ;;  %v645_v29 = vadd.f32 %v1131_v30, %v1649_v3 }
 0x105   :  { %v1133_v46 = vpop.f32.mrf.mxu0 }
 0x106   :  { %v1634_v47 = vpop.f32.mrf.mxu1  ;;  %v1694_v41 = vadd.f32 %v1195_v33, %v645_v29 }
 0x107   :  { %v1135_v48 = vpop.f32.mrf.mxu0  ;;  %v1198_v35 = vadd.f32 %v1634_v47, %v1632_v45 }
 0x108   :  { %v1636_v49 = vpop.f32.mrf.mxu1 }
 0x109   :  { %v1136_v50 = vpop.f32.mrf.mxu0 }
 0x10a   :  { %v1638_v51 = vpop.f32.mrf.mxu1  ;;  %v1137_v0 = vadd.f32 %v1136_v50, %v1135_v48 }
 0x10b   :  { %v1138_v52 = vpop.f32.mrf.mxu0 }
 0x10c   :  { %v1202_v53 = vpop.f32.mrf.mxu1 }
 0x10d   :  { %v1139_v54 = vpop.f32.mrf.mxu0 }
 0x10e   :  { %v1203_v55 = vpop.f32.mrf.mxu1  ;;  %v1140_v22 = vadd.f32 %v1139_v54, %v1138_v52  ;;  %v1125_v52 = vadd.f32 %v1620_v34, %v1616_v32  ;;  %v653_v32 = vadd.f32 %v1137_v0, %v1649_v3 }
 0x10f   :  { %v1141_v56 = vpop.f32.mrf.mxu0  ;;  %v1204_v34 = vadd.f32 %v1203_v55, %v1202_v53  ;;  %v1201_v53 = vadd.f32 %v1638_v51, %v1636_v49 }
 0x110   :  { %v1640_v57 = vpop.f32.mrf.mxu1  ;;  %v658_v54 = vadd.f32 %v1140_v22, %v1649_v3 }
 0x111   :  { %v1142_v58 = vpop.f32.mrf.mxu0 }
 0x112   :  { %v1206_v59 = vpop.f32.mrf.mxu1  ;;  %v1143_v1 = vadd.f32 %v1142_v58, %v1141_v56  ;;  %v1689_v56 = vadd.f32 %v1125_v52, %v1649_v3 }
 0x113   :  { %v1144_v60 = vpop.f32.mrf.mxu0  ;;  %v1207_v55 = vadd.f32 %v1206_v59, %v1640_v57 }
 0x114   :  { %v1642_v61 = vpop.f32.mrf.mxu1  ;;  %v661_v40 = vadd.f32 %v1143_v1, %v1649_v3 }
 0x115   :  { %v1145_v62 = vpop.f32.mrf.mxu0 }
 0x116   :  { %v1644_v2 = vpop.f32.mrf.mxu1  ;;  %v1146_v42 = vadd.f32 %v1145_v62, %v1144_v60  ;;  %v755_v60 = vadd.f32 %v1204_v34, %v658_v54 }
 0x117   :  { %v1651_v6 = vpop.f32.mrf.mxu0  ;;  %v1210_v9 = vadd.f32 %v1644_v2, %v1642_v61 }
 0x118   :  { %v1653_v7 = vpop.f32.mrf.mxu1  ;;  %v666_v43 = vadd.f32 %v1146_v42, %v1649_v3 }
 0x119   :  { %1779 = vst [vmem:[#allocation2_spill] sm:$0xff] %v1653_v7  ;;  %v1655_v8 = vpop.f32.mrf.mxu0  ;;  %v1134_v7 = vadd.f32 %v1133_v46, %v1132_v44  ;;  %v1192_v46 = vadd.f32 %v1626_v39, %v1624_v37 }
 0x11a   :  { %1780 = vst [vmem:[#allocation3_spill] sm:$0xff] %v1655_v8  ;;  %v1660_v14 = vpop.f32.mrf.mxu1  ;;  %v763_v0 = vadd.f32 %v1210_v9, %v666_v43 }
 0x11b   :  { %1781 = vst [vmem:[#allocation4_spill] sm:$0xff] %v1660_v14  ;;  %v1150_v24 = vpop.f32.mrf.mxu0  ;;  %v650_v31 = vadd.f32 %v1134_v7, %v1649_v3  ;;  %v739_v5 = vadd.f32 %v1192_v46, %v642_v27  ;;  %v758_v7 = vadd.f32 %v1207_v55, %v661_v40 }
 0x11c   :  { %v1214_v63 = vpop.f32.mrf.mxu1 }
 0x11d   :  { %v1151_v8 = vpop.f32.mrf.mxu0  ;;  %v747_v39 = vadd.f32 %v1198_v35, %v650_v31 }
 0x11e   :  { %v1215_v14 = vpop.f32.mrf.mxu1  ;;  %v1152_v48 = vadd.f32 %v1151_v8, %v1150_v24  ;;  %v750_v8 = vadd.f32 %v1201_v53, %v653_v32 }
 0x11f   :  { %v1153_v21 = vpop.f32.mrf.mxu0  ;;  %v1216_v22 = vadd.f32 %v1215_v14, %v1214_v63 }
 0x120   :  { %v1678_v38 = vpop.f32.mrf.mxu1  ;;  %v674_v49 = vadd.f32 %v1152_v48, %v1649_v3  ;;  %v1783_v46 = vld [vmem:[#allocation2_spill] sm:$0xff] }
 0x121   :  { %v1154_v44 = vpop.f32.mrf.mxu0  ;;  %v1782_v10 = vld [vmem:[#allocation3_spill] sm:$0xff] }
 0x122   :  { %v1218_v50 = vpop.f32.mrf.mxu1  ;;  %v1149_v11 = vadd.f32 %v1782_v10, %v1651_v6  ;;  %v1155_v12 = vadd.f32 %v1154_v44, %v1153_v21  ;;  %v771_v52 = vadd.f32 %v1216_v22, %v674_v49  ;;  %v1784_v33 = vld [vmem:[#allocation4_spill] sm:$0xff] }
 0x123   :  { %v1242_v58 = vpop.f32.mrf.mxu0  ;;  %v1219_v34 = vadd.f32 %v1218_v50, %v1678_v38  ;;  %v1213_v35 = vadd.f32 %v1784_v33, %v1783_v46 }
 0x124   :  { %v820_v62 = vadd.f32 %v1242_v58, %v723_v17  ;;  %v1250_v37 = vpop.f32.mrf.mxu1  ;;  %v677_v14 = vadd.f32 %v1155_v12, %v1649_v3  ;;  %v669_v27 = vadd.f32 %v1149_v11, %v1649_v3 }
 0x125   :  { %v852_v45 = vadd.f32 %v1250_v37, %v755_v60  ;;  %v811_v47 = vpop.f32.mrf.mxu0 }
 0x126   :  { %v876_v51 = vmax.f32 %v820_v62, 0.0  ;;  %v812_v57 = vadd.f32 %v811_v47, %v715_v19  ;;  %v843_v59 = vpop.f32.mrf.mxu1  ;;  %v774_v37 = vadd.f32 %v1219_v34, %v677_v14  ;;  %v766_v49 = vadd.f32 %v1213_v35, %v669_v27 }
 0x127   :  { %v884_v16 = vmax.f32 %v852_v45, 0.0  ;;  %v844_v18 = vadd.f32 %v843_v59, %v747_v39  ;;  %v1243_v20 = vpop.f32.mrf.mxu0  ;;  %v734_v45 = vadd.f32 %v1673_v25, %v1689_v56 }
 0x128   :  { %v1078_v24 = vpack.c.bf16 %v876_v51, %v876_v51  ;;  %v874_v26 = vmax.f32 %v812_v57, 0.0  ;;  %v823_v28 = vadd.f32 %v1243_v20, %v726_v23  ;;  %v1251_v30 = vpop.f32.mrf.mxu1 }
 0x129   :  { %v1086_v13 = vpack.c.bf16 %v884_v16, %v884_v16  ;;  %v882_v15 = vmax.f32 %v844_v18, 0.0  ;;  %v855_v61 = vadd.f32 %v1251_v30, %v758_v7  ;;  %v814_v2 = vpop.f32.mrf.mxu0 }
 0x12a   :  { %957 = vst.msk [vmem:[%s1778_s3 + $0x8] sm:$0xf] %vm954_vm1, %v1078_v24  ;;  %v1076_v6 = vpack.c.bf16 %v874_v26, %v874_v26  ;;  %v877_v1 = vmax.f32 %v823_v28, 0.0  ;;  %v815_v17 = vadd.f32 %v814_v2, %v718_v4  ;;  %v846_v19 = vpop.f32.mrf.mxu1 }
 0x12b   :  { %965 = vst.msk [vmem:[%s1778_s3 + $0x28] sm:$0xf] %vm954_vm1, %v1086_v13  ;;  %v1084_v63 = vpack.c.bf16 %v882_v15, %v882_v15  ;;  %v885_v54 = vmax.f32 %v855_v61, 0.0  ;;  %v847_v21 = vadd.f32 %v846_v19, %v750_v8  ;;  %v1246_v23 = vpop.f32.mrf.mxu0 }
 0x12c   :  { %955 = vst.msk [vmem:[%s1778_s3] sm:$0xf] %vm954_vm1, %v1076_v6  ;;  %v1079_v4 = vpack.c.bf16 %v877_v1, %v877_v1  ;;  %v875_v29 = vmax.f32 %v815_v17, 0.0  ;;  %v836_v31 = vadd.f32 %v1246_v23, %v739_v5  ;;  %v1254_v32 = vpop.f32.mrf.mxu1 }
 0x12d   :  { %963 = vst.msk [vmem:[%s1778_s3 + $0x20] sm:$0xf] %vm954_vm1, %v1084_v63  ;;  %v1087_v40 = vpack.c.bf16 %v885_v54, %v885_v54  ;;  %v883_v42 = vmax.f32 %v847_v21, 0.0  ;;  %v868_v44 = vadd.f32 %v1254_v32, %v771_v52  ;;  %v827_v3 = vpop.f32.mrf.mxu0 }
 0x12e   :  { %958 = vst.msk [vmem:[%s1778_s3 + $0xc] sm:$0xf] %vm954_vm1, %v1079_v4  ;;  %v1077_v48 = vpack.c.bf16 %v875_v29, %v875_v29  ;;  %v880_v53 = vmax.f32 %v836_v31, 0.0  ;;  %v828_v38 = vadd.f32 %v827_v3, %v1669_v36  ;;  %v859_v50 = vpop.f32.mrf.mxu1 }
 0x12f   :  { %966 = vst.msk [vmem:[%s1778_s3 + $0x2c] sm:$0xf] %vm954_vm1, %v1087_v40  ;;  %v1085_v55 = vpack.c.bf16 %v883_v42, %v883_v42  ;;  %v888_v58 = vmax.f32 %v868_v44, 0.0  ;;  %v860_v60 = vadd.f32 %v859_v50, %v763_v0  ;;  %v1247_v62 = vpop.f32.mrf.mxu0 }
 0x130   :  { %956 = vst.msk [vmem:[%s1778_s3 + $0x4] sm:$0xf] %vm954_vm1, %v1077_v48  ;;  %v1082_v39 = vpack.c.bf16 %v880_v53, %v880_v53  ;;  %v878_v5 = vmax.f32 %v828_v38, 0.0  ;;  %v839_v36 = vadd.f32 %v1247_v62, %v1694_v41  ;;  %v1255_v43 = vpop.f32.mrf.mxu1 }
 0x131   :  { %964 = vst.msk [vmem:[%s1778_s3 + $0x24] sm:$0xf] %vm954_vm1, %v1085_v55  ;;  %v1090_v47 = vpack.c.bf16 %v888_v58, %v888_v58  ;;  %v886_v7 = vmax.f32 %v860_v60, 0.0  ;;  %v871_v8 = vadd.f32 %v1255_v43, %v774_v37  ;;  %v830_v9 = vpop.f32.mrf.mxu0 }
 0x132   :  { %961 = vst.msk [vmem:[%s1778_s3 + $0x18] sm:$0xf] %vm954_vm1, %v1082_v39  ;;  %v1080_v41 = vpack.c.bf16 %v878_v5, %v878_v5  ;;  %v881_v51 = vmax.f32 %v839_v36, 0.0  ;;  %v831_v57 = vadd.f32 %v830_v9, %v734_v45  ;;  %v862_v59 = vpop.f32.mrf.mxu1 }
 0x133   :  { %969 = vst.msk [vmem:[%s1778_s3 + $0x38] sm:$0xf] %vm954_vm1, %v1090_v47  ;;  %v1088_v25 = vpack.c.bf16 %v886_v7, %v886_v7  ;;  %v889_v56 = vmax.f32 %v871_v8, 0.0  ;;  %v863_v10 = vadd.f32 %v862_v59, %v766_v49 }
 0x134   :  { %959 = vst.msk [vmem:[%s1778_s3 + $0x10] sm:$0xf] %vm954_vm1, %v1080_v41  ;;  %v1083_v11 = vpack.c.bf16 %v881_v51, %v881_v51  ;;  %v879_v12 = vmax.f32 %v831_v57, 0.0 }
 0x135   :  { %967 = vst.msk [vmem:[%s1778_s3 + $0x30] sm:$0xf] %vm954_vm1, %v1088_v25  ;;  %v1091_v16 = vpack.c.bf16 %v889_v56, %v889_v56  ;;  %v887_v18 = vmax.f32 %v863_v10, 0.0 }
 0x136   :  { %962 = vst.msk [vmem:[%s1778_s3 + $0x1c] sm:$0xf] %vm954_vm1, %v1083_v11  ;;  %v1081_v20 = vpack.c.bf16 %v879_v12, %v879_v12 }
 0x137   :  { %970 = vst.msk [vmem:[%s1778_s3 + $0x3c] sm:$0xf] %vm954_vm1, %v1091_v16  ;;  %v1089_v22 = vpack.c.bf16 %v887_v18, %v887_v18 }
 0x138   :  { %960 = vst.msk [vmem:[%s1778_s3 + $0x14] sm:$0xf] %vm954_vm1, %v1081_v20 }
 0x139   :  { %968 = vst.msk [vmem:[%s1778_s3 + $0x34] sm:$0xf] %vm954_vm1, %v1089_v22 }

// kernel: seg_template_forward.18
= control target key start
LH: loop header
LB: loop body
LE: loop exit
PB: predicated region body
PF: predicated region fallthrough
CT: control target
= control target key end

     0   :  { %vm423_vm0 = vcmask 519168   ;;  %s830_s1 = inlined_call_operand.vmem [shape: bf16[256,64], index: 1, kind: input, shape index: {}]   ;;  %s831_s0 = inlined_call_operand.vmem [shape: bf16[128,256], index: 0, kind: input, shape index: {}]   ;;  %s832_s2 = inlined_call_operand.vmem [shape: f32[1,64], index: 2, kind: input, shape index: {}]   ;;  %s833_s3 = inlined_call_operand.vmem [shape: bf16[128,64], index: 3, kind: output, shape index: {}]  }
   0x1   :  { %v589_v0 = vld [vmem:[%s830_s1 + $0x78] sm:$0xff]   ;;  %v591_v2 = vld [vmem:[%s830_s1 + $0x70] sm:$0xff]   ;;  %v593_v4 = vld [vmem:[%s830_s1 + $0x68] sm:$0xff]  }
   0x2   :  { %v590_v1 = vld [vmem:[%s830_s1 + $0x38] sm:$0xff]   ;;  %509 = vmatprep.subr.bf16.mxu0 %v589_v0  ;;  %573 = vmatprep.subr.bf16.mxu1 %v589_v0  ;;  %v592_v3 = vld [vmem:[%s830_s1 + $0x30] sm:$0xff]   ;;  %v594_v5 = vld [vmem:[%s830_s1 + $0x28] sm:$0xff]  }
   0x3   :  { %510 = vmatpush3.bf16.msra.mxu0 %v590_v1  ;;  %581 = vmatpush3.bf16.msra.mxu1 %v590_v1  ;;  %v595_v6 = vld [vmem:[%s830_s1 + $0x60] sm:$0xff]   ;;  %v597_v8 = vld [vmem:[%s830_s1 + $0x58] sm:$0xff]   ;;  %v599_v10 = vld [vmem:[%s830_s1 + $0x50] sm:$0xff]  }
   0x4   :  { %511 = vmatprep.subr.bf16.mxu0 %v591_v2  ;;  %574 = vmatprep.subr.bf16.mxu1 %v591_v2  ;;  %v596_v7 = vld [vmem:[%s830_s1 + $0x20] sm:$0xff]   ;;  %v598_v9 = vld [vmem:[%s830_s1 + $0x18] sm:$0xff]   ;;  %v600_v13 = vld [vmem:[%s830_s1 + $0x10] sm:$0xff]  }
   0x5   :  { %v607_v11 = vld [vmem:[%s831_s0 + $0x4] ss:$8 sps:$4 sm:$0xff]   ;;  %v605_v18 = vld [vmem:[%s831_s0] ss:$8 sps:$4 sm:$0xff]   ;;  %v611_v20 = vld [vmem:[%s831_s0 + $0x14] ss:$8 sps:$4 sm:$0xff]  }
   0x6   :  { %v610_v12 = vld [vmem:[%s831_s0 + $0x44] ss:$8 sps:$4 sm:$0xff]   ;;  %278 = vmatprep.mubr.bf16.mxu0 %v607_v11  ;;  %v608_v19 = vld [vmem:[%s831_s0 + $0x40] ss:$8 sps:$4 sm:$0xff]   ;;  %v613_v21 = vld [vmem:[%s831_s0 + $0x54] ss:$8 sps:$4 sm:$0xff]  }
   0x7   :  { %512 = vmatpush3.bf16.msra.mxu0 %v592_v3  ;;  %582 = vmatpush3.bf16.msra.mxu1 %v592_v3  ;;  %v601_v14 = vld [vmem:[%s830_s1 + $0x48] sm:$0xff]   ;;  %v603_v16 = vld [vmem:[%s830_s1 + $0x40] sm:$0xff]   ;;  %v615_v22 = vld [vmem:[%s831_s0 + $0x10] ss:$8 sps:$4 sm:$0xff]  }
   0x8   :  { %513 = vmatprep.subr.bf16.mxu0 %v593_v4  ;;  %575 = vmatprep.subr.bf16.mxu1 %v593_v4  ;;  %v602_v15 = vld [vmem:[%s830_s1 + $0x8] sm:$0xff]   ;;  %v604_v17 = vld [vmem:[%s830_s1] sm:$0xff]   ;;  %v616_v23 = vld [vmem:[%s831_s0 + $0x50] ss:$8 sps:$4 sm:$0xff]  }
   0x9   :  { %310 = vmatprep.mubr.bf16.mxu1 %v610_v12  ;;  %v617_v24 = vld [vmem:[%s831_s0 + $0x24] ss:$8 sps:$4 sm:$0xff]   ;;  %v621_v26 = vld [vmem:[%s831_s0 + $0x20] ss:$8 sps:$4 sm:$0xff]   ;;  %v623_v28 = vld [vmem:[%s831_s0 + $0x34] ss:$8 sps:$4 sm:$0xff]  }
   0xa   :  { %v619_v25 = vld [vmem:[%s831_s0 + $0x64] ss:$8 sps:$4 sm:$0xff]   ;;  %v622_v27 = vld [vmem:[%s831_s0 + $0x60] ss:$8 sps:$4 sm:$0xff]   ;;  %v625_v29 = vld [vmem:[%s831_s0 + $0x74] ss:$8 sps:$4 sm:$0xff]  }
   0xb   :  { %514 = vmatpush3.bf16.msra.mxu0 %v594_v5  ;;  %583 = vmatpush3.bf16.msra.mxu1 %v594_v5  ;;  %v627_v30 = vld [vmem:[%s831_s0 + $0x30] ss:$8 sps:$4 sm:$0xff]   ;;  %v748_v34 = vld [vmem:[%s832_s2] ss:$0 sm:$0xff] }
   0xc   :  { %515 = vmatprep.subr.bf16.mxu0 %v595_v6  ;;  %576 = vmatprep.subr.bf16.mxu1 %v595_v6  ;;  %v628_v31 = vld [vmem:[%s831_s0 + $0x70] ss:$8 sps:$4 sm:$0xff]  }
   0xf   :  { %516 = vmatpush3.bf16.msra.mxu0 %v596_v7  ;;  %584 = vmatpush3.bf16.msra.mxu1 %v596_v7 }
  0x10   :  { %517 = vmatprep.subr.bf16.mxu0 %v597_v8  ;;  %577 = vmatprep.subr.bf16.mxu1 %v597_v8 }
  0x13   :  { %518 = vmatpush3.bf16.msra.mxu0 %v598_v9  ;;  %585 = vmatpush3.bf16.msra.mxu1 %v598_v9 }
  0x14   :  { %519 = vmatprep.subr.bf16.mxu0 %v599_v10  ;;  %578 = vmatprep.subr.bf16.mxu1 %v599_v10 }
  0x17   :  { %520 = vmatpush3.bf16.msra.mxu0 %v600_v13  ;;  %586 = vmatpush3.bf16.msra.mxu1 %v600_v13 }
  0x18   :  { %521 = vmatprep.subr.bf16.mxu0 %v601_v14  ;;  %579 = vmatprep.subr.bf16.mxu1 %v601_v14 }
  0x1b   :  { %522 = vmatpush3.bf16.msra.mxu0 %v602_v15  ;;  %587 = vmatpush3.bf16.msra.mxu1 %v602_v15 }
  0x1c   :  { %523 = vmatprep.subr.bf16.mxu0 %v603_v16  ;;  %580 = vmatprep.subr.bf16.mxu1 %v603_v16 }
  0x1f   :  { %524 = vmatpush3.bf16.msra.mxu0 %v604_v17  ;;  %588 = vmatpush3.bf16.msra.mxu1 %v604_v17 }
  0x22   :  { %279 = vmatmul.mubr.bf16.vlgmr.msra.gmra.mxu0 %v605_v18  ;;  %311 = vmatmul.mubr.bf16.vlgmr.msra.gmra.mxu1 %v608_v19 }
  0x23   :  { %286 = vmatprep.mubr.bf16.mxu0 %v611_v20  ;;  %318 = vmatprep.mubr.bf16.mxu1 %v613_v21 }
  0x2a   :  { %287 = vmatmul.mubr.bf16.gmra.mxu0 %v615_v22  ;;  %319 = vmatmul.mubr.bf16.gmra.mxu1 %v616_v23 }
  0x2b   :  { %294 = vmatprep.mubr.bf16.mxu0 %v617_v24  ;;  %326 = vmatprep.mubr.bf16.mxu1 %v619_v25 }
  0x32   :  { %295 = vmatmul.mubr.bf16.gmra.mxu0 %v621_v26  ;;  %327 = vmatmul.mubr.bf16.gmra.mxu1 %v622_v27 }
  0x33   :  { %302 = vmatprep.mubr.bf16.mxu0 %v623_v28  ;;  %334 = vmatprep.mubr.bf16.mxu1 %v625_v29 }
  0x3a   :  { %303 = vmatmul.mubr.bf16.gmra.mxu0 %v627_v30  ;;  %335 = vmatmul.mubr.bf16.gmra.mxu1 %v628_v31 }
  0xe2   :  { %v525_v32 = vpop.f32.mrf.mxu0  ;;  %v549_v33 = vpop.f32.mrf.mxu1 }
  0xe4   :  { %v526_v35 = vpop.f32.mrf.mxu0  ;;  %v550_v36 = vpop.f32.mrf.mxu1 }
  0xe5   :  { %v527_v37 = vadd.f32 %v526_v35, %v525_v32  ;;  %v551_v38 = vadd.f32 %v550_v36, %v549_v33 }
  0xe6   :  { %v528_v39 = vpop.f32.mrf.mxu0  ;;  %v552_v40 = vpop.f32.mrf.mxu1 }
  0xe7   :  { %v281_v41 = vadd.f32 %v527_v37, %v748_v34  ;;  %v313_v42 = vadd.f32 %v551_v38, %v748_v34 }
  0xe8   :  { %v529_v43 = vpop.f32.mrf.mxu0  ;;  %v553_v44 = vpop.f32.mrf.mxu1 }
  0xe9   :  { %v343_v45 = vmax.f32 %v281_v41, 0.0  ;;  %v351_v46 = vmax.f32 %v313_v42, 0.0  ;;  %v530_v47 = vadd.f32 %v529_v43, %v528_v39  ;;  %v554_v48 = vadd.f32 %v553_v44, %v552_v40 }
  0xea   :  { %v531_v49 = vpop.f32.mrf.mxu0  ;;  %v555_v50 = vpop.f32.mrf.mxu1 }
  0xeb   :  { %v493_v51 = vpack.c.bf16 %v343_v45, %v343_v45  ;;  %v501_v52 = vpack.c.bf16 %v351_v46, %v351_v46  ;;  %v284_v53 = vadd.f32 %v530_v47, %v748_v34  ;;  %v316_v54 = vadd.f32 %v554_v48, %v748_v34 }
  0xec   :  { %v532_v55 = vpop.f32.mrf.mxu0  ;;  %v556_v56 = vpop.f32.mrf.mxu1 }
  0xed   :  { %424 = vst.msk [vmem:[%s833_s3] sm:$0xf] %vm423_vm0, %v493_v51  ;;  %432 = vst.msk [vmem:[%s833_s3 + $0x20] sm:$0xf] %vm423_vm0, %v501_v52  ;;  %v344_v57 = vmax.f32 %v284_v53, 0.0  ;;  %v352_v58 = vmax.f32 %v316_v54, 0.0  ;;  %v533_v59 = vadd.f32 %v532_v55, %v531_v49  ;;  %v557_v60 = vadd.f32 %v556_v56, %v555_v50 }
  0xee   :  { %v534_v61 = vpop.f32.mrf.mxu0  ;;  %v558_v62 = vpop.f32.mrf.mxu1 }
  0xef   :  { %v494_v63 = vpack.c.bf16 %v344_v57, %v344_v57  ;;  %v502_v0 = vpack.c.bf16 %v352_v58, %v352_v58  ;;  %v289_v1 = vadd.f32 %v533_v59, %v748_v34  ;;  %v321_v2 = vadd.f32 %v557_v60, %v748_v34 }
  0xf0   :  { %v535_v3 = vpop.f32.mrf.mxu0  ;;  %v559_v4 = vpop.f32.mrf.mxu1 }
  0xf1   :  { %425 = vst.msk [vmem:[%s833_s3 + $0x4] sm:$0xf] %vm423_vm0, %v494_v63  ;;  %433 = vst.msk [vmem:[%s833_s3 + $0x24] sm:$0xf] %vm423_vm0, %v502_v0  ;;  %v345_v5 = vmax.f32 %v289_v1, 0.0  ;;  %v353_v6 = vmax.f32 %v321_v2, 0.0  ;;  %v536_v7 = vadd.f32 %v535_v3, %v534_v61  ;;  %v560_v8 = vadd.f32 %v559_v4, %v558_v62 }
  0xf2   :  { %v537_v9 = vpop.f32.mrf.mxu0  ;;  %v561_v10 = vpop.f32.mrf.mxu1 }
  0xf3   :  { %v495_v11 = vpack.c.bf16 %v345_v5, %v345_v5  ;;  %v503_v12 = vpack.c.bf16 %v353_v6, %v353_v6  ;;  %v292_v13 = vadd.f32 %v536_v7, %v748_v34  ;;  %v324_v14 = vadd.f32 %v560_v8, %v748_v34 }
  0xf4   :  { %v538_v15 = vpop.f32.mrf.mxu0  ;;  %v562_v16 = vpop.f32.mrf.mxu1 }
  0xf5   :  { %426 = vst.msk [vmem:[%s833_s3 + $0x8] sm:$0xf] %vm423_vm0, %v495_v11  ;;  %434 = vst.msk [vmem:[%s833_s3 + $0x28] sm:$0xf] %vm423_vm0, %v503_v12  ;;  %v346_v17 = vmax.f32 %v292_v13, 0.0  ;;  %v354_v18 = vmax.f32 %v324_v14, 0.0  ;;  %v539_v19 = vadd.f32 %v538_v15, %v537_v9  ;;  %v563_v20 = vadd.f32 %v562_v16, %v561_v10 }
  0xf6   :  { %v540_v21 = vpop.f32.mrf.mxu0  ;;  %v564_v22 = vpop.f32.mrf.mxu1 }
  0xf7   :  { %v496_v23 = vpack.c.bf16 %v346_v17, %v346_v17  ;;  %v504_v24 = vpack.c.bf16 %v354_v18, %v354_v18  ;;  %v297_v25 = vadd.f32 %v539_v19, %v748_v34  ;;  %v329_v26 = vadd.f32 %v563_v20, %v748_v34 }
  0xf8   :  { %v541_v27 = vpop.f32.mrf.mxu0  ;;  %v565_v28 = vpop.f32.mrf.mxu1 }
  0xf9   :  { %427 = vst.msk [vmem:[%s833_s3 + $0xc] sm:$0xf] %vm423_vm0, %v496_v23  ;;  %435 = vst.msk [vmem:[%s833_s3 + $0x2c] sm:$0xf] %vm423_vm0, %v504_v24  ;;  %v347_v29 = vmax.f32 %v297_v25, 0.0  ;;  %v355_v30 = vmax.f32 %v329_v26, 0.0  ;;  %v542_v31 = vadd.f32 %v541_v27, %v540_v21  ;;  %v566_v32 = vadd.f32 %v565_v28, %v564_v22 }
  0xfa   :  { %v543_v33 = vpop.f32.mrf.mxu0  ;;  %v567_v35 = vpop.f32.mrf.mxu1 }
  0xfb   :  { %v497_v36 = vpack.c.bf16 %v347_v29, %v347_v29  ;;  %v505_v37 = vpack.c.bf16 %v355_v30, %v355_v30  ;;  %v300_v38 = vadd.f32 %v542_v31, %v748_v34  ;;  %v332_v39 = vadd.f32 %v566_v32, %v748_v34 }
  0xfc   :  { %v544_v40 = vpop.f32.mrf.mxu0  ;;  %v568_v41 = vpop.f32.mrf.mxu1 }
  0xfd   :  { %428 = vst.msk [vmem:[%s833_s3 + $0x10] sm:$0xf] %vm423_vm0, %v497_v36  ;;  %436 = vst.msk [vmem:[%s833_s3 + $0x30] sm:$0xf] %vm423_vm0, %v505_v37  ;;  %v348_v42 = vmax.f32 %v300_v38, 0.0  ;;  %v356_v43 = vmax.f32 %v332_v39, 0.0  ;;  %v545_v44 = vadd.f32 %v544_v40, %v543_v33  ;;  %v569_v45 = vadd.f32 %v568_v41, %v567_v35 }
  0xfe   :  { %v546_v46 = vpop.f32.mrf.mxu0  ;;  %v570_v47 = vpop.f32.mrf.mxu1 }
  0xff   :  { %v498_v48 = vpack.c.bf16 %v348_v42, %v348_v42  ;;  %v506_v49 = vpack.c.bf16 %v356_v43, %v356_v43  ;;  %v305_v50 = vadd.f32 %v545_v44, %v748_v34  ;;  %v337_v51 = vadd.f32 %v569_v45, %v748_v34 }
 0x100   :  { %v547_v52 = vpop.f32.mrf.mxu0  ;;  %v571_v53 = vpop.f32.mrf.mxu1 }
 0x101   :  { %429 = vst.msk [vmem:[%s833_s3 + $0x14] sm:$0xf] %vm423_vm0, %v498_v48  ;;  %437 = vst.msk [vmem:[%s833_s3 + $0x34] sm:$0xf] %vm423_vm0, %v506_v49  ;;  %v349_v54 = vmax.f32 %v305_v50, 0.0  ;;  %v357_v55 = vmax.f32 %v337_v51, 0.0  ;;  %v548_v56 = vadd.f32 %v547_v52, %v546_v46  ;;  %v572_v57 = vadd.f32 %v571_v53, %v570_v47 }
 0x103   :  { %v499_v58 = vpack.c.bf16 %v349_v54, %v349_v54  ;;  %v507_v59 = vpack.c.bf16 %v357_v55, %v357_v55  ;;  %v308_v60 = vadd.f32 %v548_v56, %v748_v34  ;;  %v340_v61 = vadd.f32 %v572_v57, %v748_v34 }
 0x105   :  { %430 = vst.msk [vmem:[%s833_s3 + $0x18] sm:$0xf] %vm423_vm0, %v499_v58  ;;  %438 = vst.msk [vmem:[%s833_s3 + $0x38] sm:$0xf] %vm423_vm0, %v507_v59  ;;  %v350_v62 = vmax.f32 %v308_v60, 0.0  ;;  %v358_v63 = vmax.f32 %v340_v61, 0.0 }
 0x107   :  { %v500_v0 = vpack.c.bf16 %v350_v62, %v350_v62  ;;  %v508_v1 = vpack.c.bf16 %v358_v63, %v358_v63 }
 0x109   :  { %431 = vst.msk [vmem:[%s833_s3 + $0x1c] sm:$0xf] %vm423_vm0, %v500_v0  ;;  %439 = vst.msk [vmem:[%s833_s3 + $0x3c] sm:$0xf] %vm423_vm0, %v508_v1 }

// kernel: seg_template_forward.23
= control target key start
LH: loop header
LB: loop body
LE: loop exit
PB: predicated region body
PF: predicated region fallthrough
CT: control target
= control target key end

     0   :  { %v511_v2 = vmov 0   ;;  %s718_s0 = inlined_call_operand.vmem [shape: bf16[128,64], index: 0, kind: input, shape index: {}]   ;;  %s719_s1 = inlined_call_operand.vmem [shape: bf16[64,256], index: 1, kind: input, shape index: {}]   ;;  %s720_s2 = inlined_call_operand.vmem [shape: f32[1,256], index: 2, kind: input, shape index: {}]   ;;  %s721_s3 = inlined_call_operand.vmem [shape: bf16[128,256], index: 3, kind: input, shape index: {}]   ;;  %s722_s4 = inlined_call_operand.hbm [shape: f32[128,256], index: 4, kind: output, shape index: {}]  }
   0x1   :  { %v469_v0 = vld [vmem:[%s719_s1 + $0x34] ss:$8 sps:$4 sm:$0xff]   ;;  %v471_v1 = vld [vmem:[%s719_s1 + $0x30] ss:$8 sps:$4 sm:$0xff]   ;;  %192 = vmatprep.mubr.bf16.mxu0 %v511_v2  ;;  %232 = vmatprep.mubr.bf16.mxu1 %v511_v2  ;;  %v472_v3 = vld [vmem:[%s719_s1 + $0x24] ss:$8 sps:$4 sm:$0xff]  }
   0x2   :  { %168 = vmatprep.subr.bf16.mxu0 %v469_v0  ;;  %457 = vmatprep.subr.bf16.mxu1 %v469_v0  ;;  %v474_v4 = vld [vmem:[%s719_s1 + $0x20] ss:$8 sps:$4 sm:$0xff]   ;;  %v475_v5 = vld [vmem:[%s719_s1 + $0x14] ss:$8 sps:$4 sm:$0xff]   ;;  %v477_v6 = vld [vmem:[%s719_s1 + $0x10] ss:$8 sps:$4 sm:$0xff]  }
   0x3   :  { %169 = vmatpush1.bf16.msra.mxu0 %v471_v1  ;;  %461 = vmatpush1.bf16.msra.mxu1 %v471_v1  ;;  %v478_v7 = vld [vmem:[%s719_s1 + $0x4] ss:$8 sps:$4 sm:$0xff]   ;;  %v480_v8 = vld [vmem:[%s719_s1] ss:$8 sps:$4 sm:$0xff]  }
   0x4   :  { %170 = vmatprep.subr.bf16.mxu0 %v472_v3  ;;  %458 = vmatprep.subr.bf16.mxu1 %v472_v3 }
   0x7   :  { %171 = vmatpush1.bf16.msra.mxu0 %v474_v4  ;;  %462 = vmatpush1.bf16.msra.mxu1 %v474_v4 }
   0x8   :  { %172 = vmatprep.subr.bf16.mxu0 %v475_v5  ;;  %459 = vmatprep.subr.bf16.mxu1 %v475_v5 }
   0xb   :  { %173 = vmatpush1.bf16.msra.mxu0 %v477_v6  ;;  %463 = vmatpush1.bf16.msra.mxu1 %v477_v6 }
   0xc   :  { %174 = vmatprep.subr.bf16.mxu0 %v478_v7  ;;  %460 = vmatprep.subr.bf16.mxu1 %v478_v7 }
   0xd   :  { %9 = vsyncpa [#allocation3], 0  ;;  %v481_v9 = vld [vmem:[%s718_s0] sm:$0xff]   ;;  %vm135_vm0 = vcmask 523264   ;;  %v483_v11 = vld [vmem:[%s718_s0 + $0x8] sm:$0xff]   ;;  %v45_v17 = vlaneseq }
   0xe   :  { %v482_v10 = vld [vmem:[%s718_s0 + $0x20] sm:$0xff]   ;;  %v484_v12 = vld [vmem:[%s718_s0 + $0x28] sm:$0xff]   ;;  %v485_v13 = vld [vmem:[%s718_s0 + $0x10] sm:$0xff]  }
   0xf   :  { %175 = vmatpush1.bf16.msra.mxu0 %v480_v8  ;;  %464 = vmatpush1.bf16.msra.mxu1 %v480_v8  ;;  %v486_v14 = vld [vmem:[%s718_s0 + $0x30] sm:$0xff]   ;;  %v487_v15 = vld [vmem:[%s718_s0 + $0x18] sm:$0xff]   ;;  %v46_v18 = vshrl.u32 %v45_v17, 7  ;;  %v43_v20 = vld [vmem:[%s720_s2] sm:$0x3] }
  0x10   :  { %v488_v16 = vld [vmem:[%s718_s0 + $0x38] sm:$0xff]   ;;  %v273_v22 = vld [vmem:[%s721_s3] sm:$0xff]  ;;  %v274_v34 = vld [vmem:[%s721_s3 + $0x8] sm:$0xff] }
  0x11   :  { %v47_v19 = vsub.s32 0, %v46_v18  ;;  %v51_v21 = vsub.s32 1, %v46_v18  ;;  %v281_v23 = vld [vmem:[%s721_s3 + $0x40] sm:$0xff]  ;;  %v289_v25 = vunpack.c.l.bf16 %v273_v22  ;;  %v290_v32 = vunpack.c.h.bf16 %v273_v22  ;;  %v282_v35 = vld [vmem:[%s721_s3 + $0x48] sm:$0xff]  ;;  %v622_v42 = vld [vmem:[%s721_s3 + $0x10] sm:$0xff] }
  0x12   :  { %449 = vmatmul.mubr.msk.bf16.vlgmr.msra.gmra.mxu0 %vm135_vm0, %v481_v9  ;;  %453 = vmatmul.mubr.msk.bf16.vlgmr.msra.gmra.mxu1 %vm135_vm0, %v482_v10  ;;  %v305_v26 = vunpack.c.l.bf16 %v281_v23  ;;  %v306_v33 = vunpack.c.h.bf16 %v281_v23  ;;  %v627_v43 = vld [vmem:[%s721_s3 + $0x50] sm:$0xff]  ;;  %v291_v45 = vunpack.c.l.bf16 %v274_v34  ;;  %v307_v47 = vunpack.c.l.bf16 %v282_v35  ;;  %v638_v0 = vld [vmem:[%s721_s3 + $0x18] sm:$0xff]  ;;  %v654_v22 = vld [vmem:[%s721_s3 + $0x20] sm:$0xff] }
  0x13   :  { %202 = vmatprep.mubr.bf16.mxu0 %v511_v2  ;;  %242 = vmatprep.mubr.bf16.mxu1 %v511_v2  ;;  %v605_v24 = vrot.slane %v43_v20, %v47_v19  ;;  %v607_v27 = vrot.slane %v43_v20, %v51_v21  ;;  %v292_v48 = vunpack.c.h.bf16 %v274_v34  ;;  %v308_v49 = vunpack.c.h.bf16 %v282_v35  ;;  %v643_v1 = vld [vmem:[%s721_s3 + $0x58] sm:$0xff]  ;;  %v659_v23 = vld [vmem:[%s721_s3 + $0x60] sm:$0xff] }
  0x14   :  { %v293_v58 = vunpack.c.l.bf16 %v622_v42  ;;  %v309_v59 = vunpack.c.l.bf16 %v627_v43  ;;  %v294_v6 = vunpack.c.h.bf16 %v622_v42  ;;  %v310_v7 = vunpack.c.h.bf16 %v627_v43 }
  0x15   :  { %v311_v17 = vunpack.c.l.bf16 %v643_v1 }
  0x1a   :  { %450 = vmatmul.mubr.msk.bf16.gmra.mxu0 %vm135_vm0, %v483_v11  ;;  %454 = vmatmul.mubr.msk.bf16.gmra.mxu1 %vm135_vm0, %v484_v12 }
  0x1b   :  { %212 = vmatprep.mubr.bf16.mxu0 %v511_v2  ;;  %252 = vmatprep.mubr.bf16.mxu1 %v511_v2 }
  0x22   :  { %451 = vmatmul.mubr.msk.bf16.gmra.mxu0 %vm135_vm0, %v485_v13  ;;  %455 = vmatmul.mubr.msk.bf16.gmra.mxu1 %vm135_vm0, %v486_v14 }
  0x23   :  { %222 = vmatprep.mubr.bf16.mxu0 %v511_v2  ;;  %262 = vmatprep.mubr.bf16.mxu1 %v511_v2 }
  0x2a   :  { %452 = vmatmul.mubr.msk.bf16.gmra.mxu0 %vm135_vm0, %v487_v15  ;;  %456 = vmatmul.mubr.msk.bf16.gmra.mxu1 %vm135_vm0, %v488_v16  ;;  %v295_v16 = vunpack.c.l.bf16 %v638_v0 }
  0xd2   :  { %v194_v28 = vpop.f32.mrf.mxu0  ;;  %v234_v29 = vpop.f32.mrf.mxu1 }
  0xd3   :  { %v195_v30 = vadd.f32 %v194_v28, %v605_v24  ;;  %v235_v31 = vadd.f32 %v234_v29, %v605_v24 }
  0xd4   :  { %v196_v36 = vpop.f32.mrf.mxu0  ;;  %v236_v37 = vpop.f32.mrf.mxu1 }
  0xd5   :  { %v321_v38 = vadd.f32 %v289_v25, %v195_v30  ;;  %v337_v39 = vadd.f32 %v305_v26, %v235_v31  ;;  %v197_v40 = vadd.f32 %v196_v36, %v607_v27  ;;  %v237_v41 = vadd.f32 %v236_v37, %v607_v27 }
  0xd6   :  { %v198_v44 = vpop.f32.mrf.mxu0  ;;  %v238_v46 = vpop.f32.mrf.mxu1  ;;  %v296_v30 = vunpack.c.h.bf16 %v638_v0  ;;  %v312_v31 = vunpack.c.h.bf16 %v643_v1 }
  0xd7   :  { %v353_v50 = vmax.f32 %v321_v38, 0.0  ;;  %v369_v51 = vmax.f32 %v337_v39, 0.0  ;;  %v322_v52 = vadd.f32 %v290_v32, %v197_v40  ;;  %v338_v53 = vadd.f32 %v306_v33, %v237_v41 }
  0xd8   :  { %v199_v54 = vadd.f32 %v198_v44, %v605_v24  ;;  %v239_v55 = vadd.f32 %v238_v46, %v605_v24  ;;  %v200_v56 = vpop.f32.mrf.mxu0  ;;  %v240_v57 = vpop.f32.mrf.mxu1  ;;  %v297_v40 = vunpack.c.l.bf16 %v654_v22  ;;  %v313_v41 = vunpack.c.l.bf16 %v659_v23  ;;  %v674_v46 = vld [vmem:[%s721_s3 + $0x28] sm:$0xff] }
  0xd9   :  { %385 = vst [vmem:[#allocation2] sm:$0xff] %v353_v50  ;;  %401 = vst [vmem:[#allocation2 + $0x80] sm:$0xff] %v369_v51  ;;  %v354_v60 = vmax.f32 %v322_v52, 0.0  ;;  %v370_v61 = vmax.f32 %v338_v53, 0.0  ;;  %v201_v62 = vadd.f32 %v200_v56, %v607_v27  ;;  %v241_v63 = vadd.f32 %v240_v57, %v607_v27 }
  0xda   :  { %v323_v2 = vadd.f32 %v291_v45, %v199_v54  ;;  %v339_v3 = vadd.f32 %v307_v47, %v239_v55  ;;  %v204_v4 = vpop.f32.mrf.mxu0  ;;  %v244_v5 = vpop.f32.mrf.mxu1  ;;  %v679_v47 = vld [vmem:[%s721_s3 + $0x68] sm:$0xff]  ;;  %v298_v52 = vunpack.c.h.bf16 %v654_v22  ;;  %v314_v53 = vunpack.c.h.bf16 %v659_v23 }
  0xdb   :  { %386 = vst [vmem:[#allocation2 + $0x8] sm:$0xff] %v354_v60  ;;  %402 = vst [vmem:[#allocation2 + $0x88] sm:$0xff] %v370_v61  ;;  %v324_v8 = vadd.f32 %v292_v48, %v201_v62  ;;  %v340_v9 = vadd.f32 %v308_v49, %v241_v63  ;;  %v205_v10 = vadd.f32 %v204_v4, %v605_v24  ;;  %v299_v62 = vunpack.c.l.bf16 %v674_v46  ;;  %v279_v4 = vld [vmem:[%s721_s3 + $0x30] sm:$0xff] }
  0xdc   :  { %v245_v11 = vadd.f32 %v244_v5, %v605_v24  ;;  %v355_v12 = vmax.f32 %v323_v2, 0.0  ;;  %v371_v13 = vmax.f32 %v339_v3, 0.0  ;;  %v206_v14 = vpop.f32.mrf.mxu0  ;;  %v246_v15 = vpop.f32.mrf.mxu1  ;;  %v315_v63 = vunpack.c.l.bf16 %v679_v47  ;;  %v287_v5 = vld [vmem:[%s721_s3 + $0x70] sm:$0xff] }
  0xdd   :  { %v356_v18 = vmax.f32 %v324_v8, 0.0  ;;  %v372_v19 = vmax.f32 %v340_v9, 0.0  ;;  %v325_v20 = vadd.f32 %v293_v58, %v205_v10  ;;  %v207_v25 = vadd.f32 %v206_v14, %v607_v27 }
  0xde   :  { %v341_v21 = vadd.f32 %v309_v59, %v245_v11  ;;  %387 = vst [vmem:[#allocation2 + $0x10] sm:$0xff] %v355_v12  ;;  %403 = vst [vmem:[#allocation2 + $0x90] sm:$0xff] %v371_v13  ;;  %v247_v26 = vadd.f32 %v246_v15, %v607_v27  ;;  %v208_v28 = vpop.f32.mrf.mxu0  ;;  %v248_v29 = vpop.f32.mrf.mxu1  ;;  %v300_v10 = vunpack.c.h.bf16 %v674_v46  ;;  %v316_v11 = vunpack.c.h.bf16 %v679_v47 }
  0xdf   :  { %388 = vst [vmem:[#allocation2 + $0x18] sm:$0xff] %v356_v18  ;;  %404 = vst [vmem:[#allocation2 + $0x98] sm:$0xff] %v372_v19  ;;  %v357_v32 = vmax.f32 %v325_v20, 0.0  ;;  %v209_v34 = vadd.f32 %v208_v28, %v605_v24  ;;  %v249_v35 = vadd.f32 %v248_v29, %v605_v24  ;;  %v326_v36 = vadd.f32 %v294_v6, %v207_v25  ;;  %v280_v28 = vld [vmem:[%s721_s3 + $0x38] sm:$0xff] }
  0xe0   :  { %v373_v33 = vmax.f32 %v341_v21, 0.0  ;;  %v342_v37 = vadd.f32 %v310_v7, %v247_v26  ;;  %v210_v38 = vpop.f32.mrf.mxu0  ;;  %v250_v39 = vpop.f32.mrf.mxu1  ;;  %v301_v20 = vunpack.c.l.bf16 %v279_v4  ;;  %v317_v21 = vunpack.c.l.bf16 %v287_v5  ;;  %v288_v29 = vld [vmem:[%s721_s3 + $0x78] sm:$0xff]  ;;  %s512_s3 = smov [#allocation2]  }
  0xe1   :  { %389 = vst [vmem:[#allocation2 + $0x20] sm:$0xff] %v357_v32  ;;  %v327_v42 = vadd.f32 %v295_v16, %v209_v34  ;;  %v343_v43 = vadd.f32 %v311_v17, %v249_v35  ;;  %v211_v44 = vadd.f32 %v210_v38, %v607_v27  ;;  %v251_v45 = vadd.f32 %v250_v39, %v607_v27  ;;  %s422_s25 = sshll.u32 %s512_s3, 4  ;;  %s423_s25 = int_to_ptr.vmem [resolvable:$true] %s422_s25 }
  0xe2   :  { %405 = vst [vmem:[#allocation2 + $0xa0] sm:$0xff] %v373_v33  ;;  %v358_v48 = vmax.f32 %v326_v36, 0.0  ;;  %v374_v49 = vmax.f32 %v342_v37, 0.0  ;;  %v214_v50 = vpop.f32.mrf.mxu0  ;;  %v254_v51 = vpop.f32.mrf.mxu1  ;;  %v302_v34 = vunpack.c.h.bf16 %v279_v4  ;;  %v318_v35 = vunpack.c.h.bf16 %v287_v5  ;;  %s489_s0 = scalar_lea.vmem %s423_s25, 4096  ;;  %p494_p1 = scmp.lt.s32.totalorder %s423_s25, %s423_s25 }
  0xe3   :  { %v359_v54 = vmax.f32 %v327_v42, 0.0  ;;  %v375_v55 = vmax.f32 %v343_v43, 0.0  ;;  %v328_v56 = vadd.f32 %v296_v30, %v211_v44  ;;  %v344_v57 = vadd.f32 %v312_v31, %v251_v45  ;;  %p490_p0 = scmp.ne.s32.totalorder %s423_s25, %s489_s0  ;;  %p495_p2 = scmp.lt.s32.totalorder %s489_s0, %s489_s0 }
  0xe4   :  { %390 = vst [vmem:[#allocation2 + $0x28] sm:$0xff] %v358_v48  ;;  %406 = vst [vmem:[#allocation2 + $0xa8] sm:$0xff] %v374_v49  ;;  %v215_v58 = vadd.f32 %v214_v50, %v605_v24  ;;  %v255_v59 = vadd.f32 %v254_v51, %v605_v24  ;;  %v216_v60 = vpop.f32.mrf.mxu0  ;;  %v256_v61 = vpop.f32.mrf.mxu1  ;;  %v303_v44 = vunpack.c.l.bf16 %v280_v28  ;;  %v319_v45 = vunpack.c.l.bf16 %v288_v29 }
  0xe5   :  { %391 = vst [vmem:[#allocation2 + $0x30] sm:$0xff] %v359_v54  ;;  %407 = vst [vmem:[#allocation2 + $0xb0] sm:$0xff] %v375_v55  ;;  %v360_v0 = vmax.f32 %v328_v56, 0.0  ;;  %v376_v1 = vmax.f32 %v344_v57, 0.0  ;;  %v217_v2 = vadd.f32 %v216_v60, %v607_v27  ;;  %v257_v3 = vadd.f32 %v256_v61, %v607_v27  ;;  %p496_p3 = por %p495_p2, %p494_p1 }
  0xe6   :  { %v329_v6 = vadd.f32 %v297_v40, %v215_v58  ;;  %v345_v7 = vadd.f32 %v313_v41, %v255_v59  ;;  %v218_v8 = vpop.f32.mrf.mxu0  ;;  %v258_v9 = vpop.f32.mrf.mxu1  ;;  %v304_v54 = vunpack.c.h.bf16 %v280_v28  ;;  %v320_v55 = vunpack.c.h.bf16 %v288_v29 }
  0xe7   :  { %392 = vst [vmem:[#allocation2 + $0x38] sm:$0xff] %v360_v0  ;;  %408 = vst [vmem:[#allocation2 + $0xb8] sm:$0xff] %v376_v1  ;;  %v330_v12 = vadd.f32 %v298_v52, %v217_v2  ;;  %v346_v13 = vadd.f32 %v314_v53, %v257_v3  ;;  %v219_v14 = vadd.f32 %v218_v8, %v605_v24  ;;  %p497_p4 = pnand %p496_p3, %p490_p0 }
  0xe8   :  { %v259_v15 = vadd.f32 %v258_v9, %v605_v24  ;;  %v361_v16 = vmax.f32 %v329_v6, 0.0  ;;  %v377_v17 = vmax.f32 %v345_v7, 0.0  ;;  %v220_v18 = vpop.f32.mrf.mxu0  ;;  %v260_v19 = vpop.f32.mrf.mxu1 }
  0xe9   :  { %v362_v22 = vmax.f32 %v330_v12, 0.0  ;;  %v378_v23 = vmax.f32 %v346_v13, 0.0  ;;  %v331_v25 = vadd.f32 %v299_v62, %v219_v14  ;;  %v221_v30 = vadd.f32 %v220_v18, %v607_v27 }
  0xea   :  { %v347_v26 = vadd.f32 %v315_v63, %v259_v15  ;;  %393 = vst [vmem:[#allocation2 + $0x40] sm:$0xff] %v361_v16  ;;  %409 = vst [vmem:[#allocation2 + $0xc0] sm:$0xff] %v377_v17  ;;  %v261_v31 = vadd.f32 %v260_v19, %v607_v27  ;;  %v224_v32 = vpop.f32.mrf.mxu0  ;;  %v264_v33 = vpop.f32.mrf.mxu1 }
  0xeb   :  { %394 = vst [vmem:[#allocation2 + $0x48] sm:$0xff] %v362_v22  ;;  %410 = vst [vmem:[#allocation2 + $0xc8] sm:$0xff] %v378_v23  ;;  %v363_v36 = vmax.f32 %v331_v25, 0.0  ;;  %v225_v38 = vadd.f32 %v224_v32, %v605_v24  ;;  %v265_v39 = vadd.f32 %v264_v33, %v605_v24  ;;  %v332_v40 = vadd.f32 %v300_v10, %v221_v30 }
  0xec   :  { %v379_v37 = vmax.f32 %v347_v26, 0.0  ;;  %v348_v41 = vadd.f32 %v316_v11, %v261_v31  ;;  %v226_v42 = vpop.f32.mrf.mxu0  ;;  %v266_v43 = vpop.f32.mrf.mxu1 }
  0xed   :  { %395 = vst [vmem:[#allocation2 + $0x50] sm:$0xff] %v363_v36  ;;  %v333_v46 = vadd.f32 %v301_v20, %v225_v38  ;;  %v349_v47 = vadd.f32 %v317_v21, %v265_v39  ;;  %v227_v48 = vadd.f32 %v226_v42, %v607_v27  ;;  %v267_v49 = vadd.f32 %v266_v43, %v607_v27 }
  0xee   :  { %411 = vst [vmem:[#allocation2 + $0xd0] sm:$0xff] %v379_v37  ;;  %v364_v50 = vmax.f32 %v332_v40, 0.0  ;;  %v380_v51 = vmax.f32 %v348_v41, 0.0  ;;  %v228_v52 = vpop.f32.mrf.mxu0  ;;  %v268_v53 = vpop.f32.mrf.mxu1 }
  0xef   :  { %v365_v56 = vmax.f32 %v333_v46, 0.0  ;;  %v381_v57 = vmax.f32 %v349_v47, 0.0  ;;  %v334_v58 = vadd.f32 %v302_v34, %v227_v48  ;;  %v350_v59 = vadd.f32 %v318_v35, %v267_v49 }
  0xf0   :  { %396 = vst [vmem:[#allocation2 + $0x58] sm:$0xff] %v364_v50  ;;  %412 = vst [vmem:[#allocation2 + $0xd8] sm:$0xff] %v380_v51  ;;  %v229_v60 = vadd.f32 %v228_v52, %v605_v24  ;;  %v269_v61 = vadd.f32 %v268_v53, %v605_v24  ;;  %v230_v62 = vpop.f32.mrf.mxu0  ;;  %v270_v63 = vpop.f32.mrf.mxu1 }
  0xf1   :  { %397 = vst [vmem:[#allocation2 + $0x60] sm:$0xff] %v365_v56  ;;  %413 = vst [vmem:[#allocation2 + $0xe0] sm:$0xff] %v381_v57  ;;  %v366_v0 = vmax.f32 %v334_v58, 0.0  ;;  %v382_v1 = vmax.f32 %v350_v59, 0.0  ;;  %v231_v2 = vadd.f32 %v230_v62, %v607_v27  ;;  %v271_v3 = vadd.f32 %v270_v63, %v607_v27 }
  0xf2   :  { %v335_v4 = vadd.f32 %v303_v44, %v229_v60  ;;  %v351_v5 = vadd.f32 %v319_v45, %v269_v61 }
  0xf3   :  { %398 = vst [vmem:[#allocation2 + $0x68] sm:$0xff] %v366_v0  ;;  %414 = vst [vmem:[#allocation2 + $0xe8] sm:$0xff] %v382_v1  ;;  %v336_v6 = vadd.f32 %v304_v54, %v231_v2  ;;  %v352_v7 = vadd.f32 %v320_v55, %v271_v3 }
  0xf4   :  { %v367_v8 = vmax.f32 %v335_v4, 0.0  ;;  %v383_v24 = vmax.f32 %v351_v5, 0.0 }
  0xf5   :  { %v368_v9 = vmax.f32 %v336_v6, 0.0  ;;  %v384_v10 = vmax.f32 %v352_v7, 0.0 }
  0xf6   :  { %399 = vst [vmem:[#allocation2 + $0x70] sm:$0xff] %v367_v8  ;;  %415 = vst [vmem:[#allocation2 + $0xf0] sm:$0xff] %v383_v24 }
  0xf7   :  { %400 = vst [vmem:[#allocation2 + $0x78] sm:$0xff] %v368_v9  ;;  %416 = vst [vmem:[#allocation2 + $0xf8] sm:$0xff] %v384_v10 }
  0xf8   :  { %500 = shalt.err (!%p497_p4)
}
  0xf9   :  { %s513_s2 = smov 256   ;;  %s514_s26 = smov 16  }
  0xfa   :  { %428 = dma.vmem_to_hbm [thread:$0]  %s423_s25, 4096, %s722_s4, [#allocation3], %s513_s2, %s513_s2, %s514_s26  }
  0xfb   :  { %509 = dma.done.wait [#allocation3], 4096  }
  0xfc   :  { %510 = vsyncadd [#allocation3], 4294963200 }
  0xfd   :  { %432 = vsyncpa [#allocation3], 1 }

</bundles_post_ra>
